<compile_context>
chip_gen: v7x
topology: tpu7x:2x2x1
jax: 0.10.0
libtpu: 0.0.40
codegen_flags: <defaults>
</compile_context>

<pallas_src>
import jax
import jax.numpy as jnp
from jax.experimental import pallas as pl
from jax.experimental.pallas import tpu as pltpu


def _round_up(x, m):
    return (x + m - 1) // m * m


def _pick_row_tile(H, target=8):
    """Largest divisor of H that is <= target (row-block height)."""
    for th in range(min(target, H), 0, -1):
        if H % th == 0:
            return th
    return H


def _vmem_limit_bytes(H, W, TH, Cp, Cop):
    """Per-step VMEM footprint (with headroom), clamped to [32 MiB, 56 MiB]."""
    bf16, f32 = 2, 4
    rows1 = TH + 2
    in_blk = (H + 4) * (W + 2) * Cp * bf16 * 2            # double-buffered input
    out_blk = TH * W * Cop * bf16 * 2                     # double-buffered output
    weights = (9 * Cp * Cop + 9 * Cop * Cop) * bf16 * 2   # double-buffered weights
    bn = 4 * Cop * f32 * 2
    mid = rows1 * (W + 2) * Cop * bf16                    # scratch
    transients = (rows1 * W * (3 * Cp * bf16 + Cop * f32)     # conv1 patch + acc
                  + TH * W * (3 * Cop * bf16 + Cop * f32))    # conv2 patch + acc
    total = in_blk + out_blk + weights + bn + mid + transients
    return int(min(max(2 * total + (8 << 20), 32 << 20), 56 << 20))


def _make_fused_kernel(H, W, TH, Cp, Cop):
    rows1 = TH + 2          # conv1 rows computed per step (incl. overlap / halo)
    HW1 = rows1 * W
    HW2 = TH * W

    def kernel(x_ref, w1_ref, s1_ref, b1_ref, w2_ref, s2_ref, b2_ref,
               out_ref, mid_ref):
        rb = pl.program_id(1)
        r0 = pl.multiple_of(rb * TH, TH)

        # ---- conv1 (3x3, pad=1) + BN1 + ReLU, K-stripped per kernel row ----
        acc1 = None
        for dy in range(3):
            # extended conv1 output rows [r0-1, r0+TH+1) need padded-input
            # rows [r0+dy, r0+dy+TH+2) for this tap row.
            slab = x_ref[0, pl.ds(r0 + dy, rows1), :, :]        # (TH+2, W+2, Cp)
            patch = jnp.concatenate(
                [slab[:, dx:dx + W, :].reshape(HW1, Cp) for dx in range(3)],
                axis=-1)                                        # (HW1, 3*Cp) bf16
            part = jnp.dot(patch, w1_ref[dy * 3 * Cp:(dy + 1) * 3 * Cp, :],
                           preferred_element_type=jnp.float32)  # MXU, f32 acc
            acc1 = part if acc1 is None else acc1 + part
        h1 = jnp.maximum(acc1 * s1_ref[0] + b1_ref[0], 0.0)     # f32 BN + ReLU
        mid_ref[:, 1:W + 1, :] = h1.reshape(rows1, W, Cop).astype(mid_ref.dtype)

        # Halo-only zeroing (this is conv2's zero padding): always the two
        # column strips; the phantom top/bottom rows only at image boundaries.
        col_zero = jnp.zeros((rows1, 1, Cop), mid_ref.dtype)
        mid_ref[:, 0:1, :] = col_zero
        mid_ref[:, W + 1:W + 2, :] = col_zero

        row_zero = jnp.zeros((1, W + 2, Cop), mid_ref.dtype)

        @pl.when(rb == 0)
        def _():
            mid_ref[0:1, :, :] = row_zero

        @pl.when(rb == pl.num_programs(1) - 1)
        def _():
            mid_ref[rows1 - 1:rows1, :, :] = row_zero

        # ---- conv2 (3x3, pad=1) + BN2 + residual + ReLU --------------------
        acc2 = None
        for dy in range(3):
            slab = mid_ref[dy:dy + TH, :, :]                    # (TH, W+2, Cop)
            patch = jnp.concatenate(
                [slab[:, dx:dx + W, :].reshape(HW2, Cop) for dx in range(3)],
                axis=-1)                                        # (HW2, 3*Cop)
            part = jnp.dot(patch, w2_ref[dy * 3 * Cop:(dy + 1) * 3 * Cop, :],
                           preferred_element_type=jnp.float32)
            acc2 = part if acc2 is None else acc2 + part

        res = x_ref[0, pl.ds(r0 + 2, TH), 1:W + 1, :].reshape(HW2, Cp)
        out = jnp.maximum(
            acc2 * s2_ref[0] + b2_ref[0] + res.astype(jnp.float32), 0.0)
        out_ref[0] = out.reshape(TH, W, Cop).astype(out_ref.dtype)

    return kernel


def _pack_conv_weight(w_hwio, cin_p, cout_p, dtype):
    """(3,3,Cin,Cout) -> (9*cin_p, cout_p), zero-padded, (dy,dx,cin) row order."""
    kh, kw, cin, cout = w_hwio.shape
    w = jnp.pad(w_hwio, ((0, 0), (0, 0), (0, cin_p - cin), (0, cout_p - cout)))
    return w.reshape(kh * kw * cin_p, cout_p).astype(dtype)


def _bn_fold(gamma, beta, mean, var, eps=1e-5):
    scale = gamma / jnp.sqrt(var + eps)
    bias = beta - mean * scale
    return scale, bias


def basic_block_fused_nhwc(x_nhwc, w1_hwio, s1, b1, w2_hwio, s2, b2,
                           compute_dtype=jnp.bfloat16, row_tile_target=8):
    """Fused BasicBlock (stride=1, dilation=1, no downsample), NHWC in/out (bf16 out)."""
    N, H, W, Cin = x_nhwc.shape
    Cout = w1_hwio.shape[-1]
    assert w2_hwio.shape[2] == Cout and w2_hwio.shape[3] == Cout
    assert Cin == Cout, "identity residual requires inplanes == planes"

    Cp = _round_up(Cin, 128)    # lane-dense input channels
    Cop = _round_up(Cout, 128)  # lane-dense output channels
    TH = _pick_row_tile(H, row_tile_target)
    n_rb = H // TH

    # bf16 cast + 2-row / 1-col zero halo (covers conv1 receptive field of the
    # conv2 halo rows) + channel pad to lane width.
    x_pad = jnp.pad(x_nhwc.astype(compute_dtype),
                    ((0, 0), (2, 2), (1, 1), (0, Cp - Cin)))

    w1m = _pack_conv_weight(w1_hwio, Cp, Cop, compute_dtype)
    w2m = _pack_conv_weight(w2_hwio, Cop, Cop, compute_dtype)

    def pad_vec(v):
        return jnp.pad(v.astype(jnp.float32), (0, Cop - Cout)).reshape(1, Cop)

    s1p, b1p, s2p, b2p = pad_vec(s1), pad_vec(b1), pad_vec(s2), pad_vec(b2)

    kernel = _make_fused_kernel(H, W, TH, Cp, Cop)

    grid_spec = pltpu.PrefetchScalarGridSpec(
        num_scalar_prefetch=0,
        grid=(N, n_rb),
        in_specs=[
            # whole padded image per batch; index depends only on n, so it is
            # NOT re-fetched across row blocks.
            pl.BlockSpec((1, H + 4, W + 2, Cp), lambda n, r: (n, 0, 0, 0)),
            pl.BlockSpec((9 * Cp, Cop), lambda n, r: (0, 0)),
            pl.BlockSpec((1, Cop), lambda n, r: (0, 0)),
            pl.BlockSpec((1, Cop), lambda n, r: (0, 0)),
            pl.BlockSpec((9 * Cop, Cop), lambda n, r: (0, 0)),
            pl.BlockSpec((1, Cop), lambda n, r: (0, 0)),
            pl.BlockSpec((1, Cop), lambda n, r: (0, 0)),
        ],
        out_specs=pl.BlockSpec((1, TH, W, Cop), lambda n, r: (n, r, 0, 0)),
        scratch_shapes=[pltpu.VMEM((TH + 2, W + 2, Cop), compute_dtype)],
    )

    out = pl.pallas_call(
        kernel,
        out_shape=jax.ShapeDtypeStruct((N, H, W, Cop), compute_dtype),  # bf16 out
        grid_spec=grid_spec,
        compiler_params=pltpu.CompilerParams(
            dimension_semantics=("parallel", "parallel"),
            vmem_limit_bytes=_vmem_limit_bytes(H, W, TH, Cp, Cop)),
    )(x_pad, w1m, s1p, b1p, w2m, s2p, b2p)

    return out[..., :Cout]


@jax.jit
def basic_block_forward(x_nchw, params):
    """BasicBlock.forward (eval mode) with stride=1, dilation=1, no downsample."""
    x = jnp.transpose(x_nchw, (0, 2, 3, 1))  # NCHW -> NHWC (PyTorch boundary)
    s1, b1 = _bn_fold(params["bn1_g"], params["bn1_b"],
                      params["bn1_m"], params["bn1_v"])
    s2, b2 = _bn_fold(params["bn2_g"], params["bn2_b"],
                      params["bn2_m"], params["bn2_v"])
    out = basic_block_fused_nhwc(x, params["w1_hwio"], s1, b1,
                                 params["w2_hwio"], s2, b2)
    return jnp.transpose(out, (0, 3, 1, 2))  # NHWC -> NCHW (bf16)


def _reference_forward(x, params, eps=1e-5):
    """Pure-JAX reference (NCHW) matching the kernel's bf16-in / f32-acc /
    bf16-out numerics."""
    def q(a):  # bf16 rounding of operands, like the kernel's boundary casts
        return a.astype(jnp.bfloat16).astype(jnp.float32)

    def conv(a, w_oihw):
        return jax.lax.conv_general_dilated(
            q(a), q(w_oihw), window_strides=(1, 1), padding=((1, 1), (1, 1)),
            dimension_numbers=("NCHW", "OIHW", "NCHW"))

    def bn(a, g, b, m, v):
        def e(t):
            return t[None, :, None, None]
        return (a - e(m)) / jnp.sqrt(e(v) + eps) * e(g) + e(b)

    out = jnp.maximum(
        bn(conv(x, params["w1_oihw"]), params["bn1_g"], params["bn1_b"],
           params["bn1_m"], params["bn1_v"]), 0.0)
    out = bn(conv(out, params["w2_oihw"]), params["bn2_g"], params["bn2_b"],
             params["bn2_m"], params["bn2_v"]) + q(x)
    out = jnp.maximum(out, 0.0)
    return q(out)  # kernel emits bf16 output


if __name__ == "__main__":
    key = jax.random.PRNGKey(0)
    N, C, H, W = 2, 4, 16, 16          # inplanes = planes = 4
    inplanes = planes = C

    ks = jax.random.split(key, 8)
    x = jax.random.normal(ks[0], (N, C, H, W), jnp.float32)

    # conv weights in PyTorch OIHW layout
    w1_oihw = 0.1 * jax.random.normal(ks[1], (planes, inplanes, 3, 3), jnp.float32)
    w2_oihw = 0.1 * jax.random.normal(ks[2], (planes, planes, 3, 3), jnp.float32)

    # BatchNorm params (eval mode / running stats)
    bn1_g = 1.0 + 0.1 * jax.random.normal(ks[3], (planes,), jnp.float32)
    bn1_b = 0.1 * jax.random.normal(ks[4], (planes,), jnp.float32)
    bn1_m = 0.05 * jax.random.normal(ks[5], (planes,), jnp.float32)
    bn1_v = jnp.abs(1.0 + 0.1 * jax.random.normal(ks[6], (planes,), jnp.float32))
    bn2_g = 1.0 + 0.1 * jax.random.normal(ks[7], (planes,), jnp.float32)
    bn2_b = jnp.zeros((planes,), jnp.float32)
    bn2_m = jnp.zeros((planes,), jnp.float32)
    bn2_v = jnp.ones((planes,), jnp.float32)

    params = dict(
        w1_oihw=w1_oihw, w2_oihw=w2_oihw,
        w1_hwio=jnp.transpose(w1_oihw, (2, 3, 1, 0)),  # (3,3,Cin,Cout)
        w2_hwio=jnp.transpose(w2_oihw, (2, 3, 1, 0)),
        bn1_g=bn1_g, bn1_b=bn1_b, bn1_m=bn1_m, bn1_v=bn1_v,
        bn2_g=bn2_g, bn2_b=bn2_b, bn2_m=bn2_m, bn2_v=bn2_v,
    )

    out = basic_block_forward(x, params)
    out = jax.block_until_ready(out)
    out_f32 = out.astype(jnp.float32)

    ref = _reference_forward(x, params)
    assert out.shape == (N, C, H, W), out.shape
    max_err = float(jnp.max(jnp.abs(out_f32 - ref)))
    # bf16 output: both sides rounded to bf16, so tolerance covers 1 bf16 ULP.
    assert jnp.allclose(out_f32, ref, rtol=5e-3, atol=5e-3), max_err

    print("KERNEL_OK")
</pallas_src>

<mosaic_0001>
module attributes {stable_mosaic.version = 11 : i64} {
  func.func @kernel(%arg0: i32, %arg1: i32, %arg2: memref<1x20x18x128xbf16, #tpu.memory_space<vmem>>, %arg3: memref<1152x128xbf16, #tpu.memory_space<vmem>>, %arg4: memref<1x128xf32, #tpu.memory_space<vmem>>, %arg5: memref<1x128xf32, #tpu.memory_space<vmem>>, %arg6: memref<1152x128xbf16, #tpu.memory_space<vmem>>, %arg7: memref<1x128xf32, #tpu.memory_space<vmem>>, %arg8: memref<1x128xf32, #tpu.memory_space<vmem>>, %arg9: memref<1x8x16x128xbf16, #tpu.memory_space<vmem>>, %arg10: memref<10x18x128xbf16, #tpu.memory_space<vmem>>) attributes {dimension_semantics = [#tpu.dimension_semantics<parallel>, #tpu.dimension_semantics<parallel>], iteration_bounds = array<i64: 2, 2>, scalar_prefetch = 0 : i64, scratch_operands = 1 : i64, tpu.core_type = #tpu.core_type<tc>, window_params = [{transform_indices = @transform_0, window_bounds = array<i64: 1, 20, 18, 128>}, {pipeline_mode = #tpu.pipeline_mode<synchronous>, transform_indices = @transform_1, window_bounds = array<i64: 1152, 128>}, {pipeline_mode = #tpu.pipeline_mode<synchronous>, transform_indices = @transform_2, window_bounds = array<i64: 1, 128>}, {pipeline_mode = #tpu.pipeline_mode<synchronous>, transform_indices = @transform_3, window_bounds = array<i64: 1, 128>}, {pipeline_mode = #tpu.pipeline_mode<synchronous>, transform_indices = @transform_4, window_bounds = array<i64: 1152, 128>}, {pipeline_mode = #tpu.pipeline_mode<synchronous>, transform_indices = @transform_5, window_bounds = array<i64: 1, 128>}, {pipeline_mode = #tpu.pipeline_mode<synchronous>, transform_indices = @transform_6, window_bounds = array<i64: 1, 128>}, {transform_indices = @transform_7, window_bounds = array<i64: 1, 8, 16, 128>}]} {
    %c8_i32 = arith.constant 8 : i32
    %0 = arith.muli %arg1, %c8_i32 : i32
    %1 = tpu.assume_multiple %0, 8 : i32
    %c0_i32 = arith.constant 0 : i32
    %2 = arith.addi %1, %c0_i32 : i32
    %c0 = arith.constant 0 : index
    %3 = arith.index_cast %2 : i32 to index
    %c0_0 = arith.constant 0 : index
    %c0_1 = arith.constant 0 : index
    %4 = vector.load %arg2[%c0, %3, %c0_0, %c0_1] : memref<1x20x18x128xbf16, #tpu.memory_space<vmem>>, vector<1x10x18x128xbf16>
    %5 = vector.shape_cast %4 : vector<1x10x18x128xbf16> to vector<10x18x128xbf16>
    %6 = vector.extract_strided_slice %5 {offsets = [0, 0, 0], sizes = [10, 16, 128], strides = [1, 1, 1]} : vector<10x18x128xbf16> to vector<10x16x128xbf16>
    %7 = vector.shape_cast %6 : vector<10x16x128xbf16> to vector<160x128xbf16>
    %8 = vector.extract_strided_slice %5 {offsets = [0, 1, 0], sizes = [10, 16, 128], strides = [1, 1, 1]} : vector<10x18x128xbf16> to vector<10x16x128xbf16>
    %9 = vector.shape_cast %8 : vector<10x16x128xbf16> to vector<160x128xbf16>
    %10 = vector.extract_strided_slice %5 {offsets = [0, 2, 0], sizes = [10, 16, 128], strides = [1, 1, 1]} : vector<10x18x128xbf16> to vector<10x16x128xbf16>
    %11 = vector.shape_cast %10 : vector<10x16x128xbf16> to vector<160x128xbf16>
    %12 = tpu.concatenate %7, %9, %11 in 1 : vector<160x128xbf16>, vector<160x128xbf16>, vector<160x128xbf16> -> vector<160x384xbf16>
    %c0_2 = arith.constant 0 : index
    %c0_3 = arith.constant 0 : index
    %13 = vector.load %arg3[%c0_2, %c0_3] : memref<1152x128xbf16, #tpu.memory_space<vmem>>, vector<384x128xbf16>
    %cst = arith.constant dense<0.000000e+00> : vector<160x128xf32>
    %14 = tpu.matmul %12, %13, %cst {dimension_numbers = #tpu.dot_dimension_numbers<[1], [0], [0], [1], [0, 0, 1, 1], [], []>} : vector<160x384xbf16>, vector<384x128xbf16>, vector<160x128xf32> -> vector<160x128xf32>
    %c1_i32 = arith.constant 1 : i32
    %15 = arith.addi %1, %c1_i32 : i32
    %c0_4 = arith.constant 0 : index
    %16 = arith.index_cast %15 : i32 to index
    %c0_5 = arith.constant 0 : index
    %c0_6 = arith.constant 0 : index
    %17 = vector.load %arg2[%c0_4, %16, %c0_5, %c0_6] : memref<1x20x18x128xbf16, #tpu.memory_space<vmem>>, vector<1x10x18x128xbf16>
    %18 = vector.shape_cast %17 : vector<1x10x18x128xbf16> to vector<10x18x128xbf16>
    %19 = vector.extract_strided_slice %18 {offsets = [0, 0, 0], sizes = [10, 16, 128], strides = [1, 1, 1]} : vector<10x18x128xbf16> to vector<10x16x128xbf16>
    %20 = vector.shape_cast %19 : vector<10x16x128xbf16> to vector<160x128xbf16>
    %21 = vector.extract_strided_slice %18 {offsets = [0, 1, 0], sizes = [10, 16, 128], strides = [1, 1, 1]} : vector<10x18x128xbf16> to vector<10x16x128xbf16>
    %22 = vector.shape_cast %21 : vector<10x16x128xbf16> to vector<160x128xbf16>
    %23 = vector.extract_strided_slice %18 {offsets = [0, 2, 0], sizes = [10, 16, 128], strides = [1, 1, 1]} : vector<10x18x128xbf16> to vector<10x16x128xbf16>
    %24 = vector.shape_cast %23 : vector<10x16x128xbf16> to vector<160x128xbf16>
    %25 = tpu.concatenate %20, %22, %24 in 1 : vector<160x128xbf16>, vector<160x128xbf16>, vector<160x128xbf16> -> vector<160x384xbf16>
    %c384 = arith.constant 384 : index
    %c0_7 = arith.constant 0 : index
    %26 = vector.load %arg3[%c384, %c0_7] : memref<1152x128xbf16, #tpu.memory_space<vmem>>, vector<384x128xbf16>
    %cst_8 = arith.constant dense<0.000000e+00> : vector<160x128xf32>
    %27 = tpu.matmul %25, %26, %cst_8 {dimension_numbers = #tpu.dot_dimension_numbers<[1], [0], [0], [1], [0, 0, 1, 1], [], []>} : vector<160x384xbf16>, vector<384x128xbf16>, vector<160x128xf32> -> vector<160x128xf32>
    %28 = arith.addf %14, %27 : vector<160x128xf32>
    %c2_i32 = arith.constant 2 : i32
    %29 = arith.addi %1, %c2_i32 : i32
    %c0_9 = arith.constant 0 : index
    %30 = arith.index_cast %29 : i32 to index
    %c0_10 = arith.constant 0 : index
    %c0_11 = arith.constant 0 : index
    %31 = vector.load %arg2[%c0_9, %30, %c0_10, %c0_11] : memref<1x20x18x128xbf16, #tpu.memory_space<vmem>>, vector<1x10x18x128xbf16>
    %32 = vector.shape_cast %31 : vector<1x10x18x128xbf16> to vector<10x18x128xbf16>
    %33 = vector.extract_strided_slice %32 {offsets = [0, 0, 0], sizes = [10, 16, 128], strides = [1, 1, 1]} : vector<10x18x128xbf16> to vector<10x16x128xbf16>
    %34 = vector.shape_cast %33 : vector<10x16x128xbf16> to vector<160x128xbf16>
    %35 = vector.extract_strided_slice %32 {offsets = [0, 1, 0], sizes = [10, 16, 128], strides = [1, 1, 1]} : vector<10x18x128xbf16> to vector<10x16x128xbf16>
    %36 = vector.shape_cast %35 : vector<10x16x128xbf16> to vector<160x128xbf16>
    %37 = vector.extract_strided_slice %32 {offsets = [0, 2, 0], sizes = [10, 16, 128], strides = [1, 1, 1]} : vector<10x18x128xbf16> to vector<10x16x128xbf16>
    %38 = vector.shape_cast %37 : vector<10x16x128xbf16> to vector<160x128xbf16>
    %39 = tpu.concatenate %34, %36, %38 in 1 : vector<160x128xbf16>, vector<160x128xbf16>, vector<160x128xbf16> -> vector<160x384xbf16>
    %c768 = arith.constant 768 : index
    %c0_12 = arith.constant 0 : index
    %40 = vector.load %arg3[%c768, %c0_12] : memref<1152x128xbf16, #tpu.memory_space<vmem>>, vector<384x128xbf16>
    %cst_13 = arith.constant dense<0.000000e+00> : vector<160x128xf32>
    %41 = tpu.matmul %39, %40, %cst_13 {dimension_numbers = #tpu.dot_dimension_numbers<[1], [0], [0], [1], [0, 0, 1, 1], [], []>} : vector<160x384xbf16>, vector<384x128xbf16>, vector<160x128xf32> -> vector<160x128xf32>
    %42 = arith.addf %28, %41 : vector<160x128xf32>
    %c0_14 = arith.constant 0 : index
    %c0_15 = arith.constant 0 : index
    %43 = vector.load %arg4[%c0_14, %c0_15] : memref<1x128xf32, #tpu.memory_space<vmem>>, vector<1x128xf32>
    %44 = vector.shape_cast %43 : vector<1x128xf32> to vector<128xf32>
    %45 = vector.shape_cast %44 : vector<128xf32> to vector<1x128xf32>
    %46 = vector.broadcast %45 : vector<1x128xf32> to vector<160x128xf32>
    %47 = arith.mulf %42, %46 : vector<160x128xf32>
    %c0_16 = arith.constant 0 : index
    %c0_17 = arith.constant 0 : index
    %48 = vector.load %arg5[%c0_16, %c0_17] : memref<1x128xf32, #tpu.memory_space<vmem>>, vector<1x128xf32>
    %49 = vector.shape_cast %48 : vector<1x128xf32> to vector<128xf32>
    %50 = vector.shape_cast %49 : vector<128xf32> to vector<1x128xf32>
    %51 = vector.broadcast %50 : vector<1x128xf32> to vector<160x128xf32>
    %52 = arith.addf %47, %51 : vector<160x128xf32>
    %cst_18 = arith.constant 0.000000e+00 : f32
    %53 = vector.broadcast %cst_18 : f32 to vector<160x128xf32>
    %54 = arith.maximumf %52, %53 : vector<160x128xf32>
    %55 = vector.shape_cast %54 : vector<160x128xf32> to vector<10x16x128xf32>
    %56 = arith.truncf %55 : vector<10x16x128xf32> to vector<10x16x128xbf16>
    %c0_19 = arith.constant 0 : index
    %c1 = arith.constant 1 : index
    %c0_20 = arith.constant 0 : index
    %57 = vector.load %arg10[%c0_19, %c1, %c0_20] : memref<10x18x128xbf16, #tpu.memory_space<vmem>>, vector<10x16x128xbf16>
    tpu.vector_store %arg10[%c0_19, %c1, %c0_20], %56 {strides = array<i32>} : memref<10x18x128xbf16, #tpu.memory_space<vmem>>, vector<10x16x128xbf16>,
    %cst_21 = arith.constant 0.000000e+00 : bf16
    %58 = vector.broadcast %cst_21 : bf16 to vector<10x1x128xbf16>
    %c0_22 = arith.constant 0 : index
    %c0_23 = arith.constant 0 : index
    %c0_24 = arith.constant 0 : index
    %59 = vector.load %arg10[%c0_22, %c0_23, %c0_24] : memref<10x18x128xbf16, #tpu.memory_space<vmem>>, vector<10x1x128xbf16>
    tpu.vector_store %arg10[%c0_22, %c0_23, %c0_24], %58 {strides = array<i32>} : memref<10x18x128xbf16, #tpu.memory_space<vmem>>, vector<10x1x128xbf16>,
    %c0_25 = arith.constant 0 : index
    %c17 = arith.constant 17 : index
    %c0_26 = arith.constant 0 : index
    %60 = vector.load %arg10[%c0_25, %c17, %c0_26] : memref<10x18x128xbf16, #tpu.memory_space<vmem>>, vector<10x1x128xbf16>
    tpu.vector_store %arg10[%c0_25, %c17, %c0_26], %58 {strides = array<i32>} : memref<10x18x128xbf16, #tpu.memory_space<vmem>>, vector<10x1x128xbf16>,
    %cst_27 = arith.constant 0.000000e+00 : bf16
    %61 = vector.broadcast %cst_27 : bf16 to vector<1x18x128xbf16>
    %c0_i32_28 = arith.constant 0 : i32
    %62 = arith.cmpi eq, %arg1, %c0_i32_28 : i32
    %63 = arith.extui %62 : i1 to i32
    %c0_i32_29 = arith.constant 0 : i32
    %64 = arith.cmpi ne, %63, %c0_i32_29 : i32
    scf.if %64 {
      %c0_62 = arith.constant 0 : index
      %c0_63 = arith.constant 0 : index
      %c0_64 = arith.constant 0 : index
      %124 = vector.load %arg10[%c0_62, %c0_63, %c0_64] : memref<10x18x128xbf16, #tpu.memory_space<vmem>>, vector<1x18x128xbf16>
      tpu.vector_store %arg10[%c0_62, %c0_63, %c0_64], %61 {strides = array<i32>} : memref<10x18x128xbf16, #tpu.memory_space<vmem>>, vector<1x18x128xbf16>,
    } else {
    }
    %c1_i32_30 = arith.constant 1 : i32
    %65 = arith.cmpi eq, %arg1, %c1_i32_30 : i32
    %66 = arith.extui %65 : i1 to i32
    %c0_i32_31 = arith.constant 0 : i32
    %67 = arith.cmpi ne, %66, %c0_i32_31 : i32
    scf.if %67 {
      %c9 = arith.constant 9 : index
      %c0_62 = arith.constant 0 : index
      %c0_63 = arith.constant 0 : index
      %124 = vector.load %arg10[%c9, %c0_62, %c0_63] : memref<10x18x128xbf16, #tpu.memory_space<vmem>>, vector<1x18x128xbf16>
      tpu.vector_store %arg10[%c9, %c0_62, %c0_63], %61 {strides = array<i32>} : memref<10x18x128xbf16, #tpu.memory_space<vmem>>, vector<1x18x128xbf16>,
    } else {
    }
    %c0_32 = arith.constant 0 : index
    %c0_33 = arith.constant 0 : index
    %c0_34 = arith.constant 0 : index
    %68 = vector.load %arg10[%c0_32, %c0_33, %c0_34] : memref<10x18x128xbf16, #tpu.memory_space<vmem>>, vector<8x18x128xbf16>
    %69 = vector.extract_strided_slice %68 {offsets = [0, 0, 0], sizes = [8, 16, 128], strides = [1, 1, 1]} : vector<8x18x128xbf16> to vector<8x16x128xbf16>
    %70 = vector.shape_cast %69 : vector<8x16x128xbf16> to vector<128x128xbf16>
    %71 = vector.extract_strided_slice %68 {offsets = [0, 1, 0], sizes = [8, 16, 128], strides = [1, 1, 1]} : vector<8x18x128xbf16> to vector<8x16x128xbf16>
    %72 = vector.shape_cast %71 : vector<8x16x128xbf16> to vector<128x128xbf16>
    %73 = vector.extract_strided_slice %68 {offsets = [0, 2, 0], sizes = [8, 16, 128], strides = [1, 1, 1]} : vector<8x18x128xbf16> to vector<8x16x128xbf16>
    %74 = vector.shape_cast %73 : vector<8x16x128xbf16> to vector<128x128xbf16>
    %75 = tpu.concatenate %70, %72, %74 in 1 : vector<128x128xbf16>, vector<128x128xbf16>, vector<128x128xbf16> -> vector<128x384xbf16>
    %c0_35 = arith.constant 0 : index
    %c0_36 = arith.constant 0 : index
    %76 = vector.load %arg6[%c0_35, %c0_36] : memref<1152x128xbf16, #tpu.memory_space<vmem>>, vector<384x128xbf16>
    %cst_37 = arith.constant dense<0.000000e+00> : vector<128x128xf32>
    %77 = tpu.matmul %75, %76, %cst_37 {dimension_numbers = #tpu.dot_dimension_numbers<[1], [0], [0], [1], [0, 0, 1, 1], [], []>} : vector<128x384xbf16>, vector<384x128xbf16>, vector<128x128xf32> -> vector<128x128xf32>
    %c1_38 = arith.constant 1 : index
    %c0_39 = arith.constant 0 : index
    %c0_40 = arith.constant 0 : index
    %78 = vector.load %arg10[%c1_38, %c0_39, %c0_40] : memref<10x18x128xbf16, #tpu.memory_space<vmem>>, vector<8x18x128xbf16>
    %79 = vector.extract_strided_slice %78 {offsets = [0, 0, 0], sizes = [8, 16, 128], strides = [1, 1, 1]} : vector<8x18x128xbf16> to vector<8x16x128xbf16>
    %80 = vector.shape_cast %79 : vector<8x16x128xbf16> to vector<128x128xbf16>
    %81 = vector.extract_strided_slice %78 {offsets = [0, 1, 0], sizes = [8, 16, 128], strides = [1, 1, 1]} : vector<8x18x128xbf16> to vector<8x16x128xbf16>
    %82 = vector.shape_cast %81 : vector<8x16x128xbf16> to vector<128x128xbf16>
    %83 = vector.extract_strided_slice %78 {offsets = [0, 2, 0], sizes = [8, 16, 128], strides = [1, 1, 1]} : vector<8x18x128xbf16> to vector<8x16x128xbf16>
    %84 = vector.shape_cast %83 : vector<8x16x128xbf16> to vector<128x128xbf16>
    %85 = tpu.concatenate %80, %82, %84 in 1 : vector<128x128xbf16>, vector<128x128xbf16>, vector<128x128xbf16> -> vector<128x384xbf16>
    %c384_41 = arith.constant 384 : index
    %c0_42 = arith.constant 0 : index
    %86 = vector.load %arg6[%c384_41, %c0_42] : memref<1152x128xbf16, #tpu.memory_space<vmem>>, vector<384x128xbf16>
    %cst_43 = arith.constant dense<0.000000e+00> : vector<128x128xf32>
    %87 = tpu.matmul %85, %86, %cst_43 {dimension_numbers = #tpu.dot_dimension_numbers<[1], [0], [0], [1], [0, 0, 1, 1], [], []>} : vector<128x384xbf16>, vector<384x128xbf16>, vector<128x128xf32> -> vector<128x128xf32>
    %88 = arith.addf %77, %87 : vector<128x128xf32>
    %c2 = arith.constant 2 : index
    %c0_44 = arith.constant 0 : index
    %c0_45 = arith.constant 0 : index
    %89 = vector.load %arg10[%c2, %c0_44, %c0_45] : memref<10x18x128xbf16, #tpu.memory_space<vmem>>, vector<8x18x128xbf16>
    %90 = vector.extract_strided_slice %89 {offsets = [0, 0, 0], sizes = [8, 16, 128], strides = [1, 1, 1]} : vector<8x18x128xbf16> to vector<8x16x128xbf16>
    %91 = vector.shape_cast %90 : vector<8x16x128xbf16> to vector<128x128xbf16>
    %92 = vector.extract_strided_slice %89 {offsets = [0, 1, 0], sizes = [8, 16, 128], strides = [1, 1, 1]} : vector<8x18x128xbf16> to vector<8x16x128xbf16>
    %93 = vector.shape_cast %92 : vector<8x16x128xbf16> to vector<128x128xbf16>
    %94 = vector.extract_strided_slice %89 {offsets = [0, 2, 0], sizes = [8, 16, 128], strides = [1, 1, 1]} : vector<8x18x128xbf16> to vector<8x16x128xbf16>
    %95 = vector.shape_cast %94 : vector<8x16x128xbf16> to vector<128x128xbf16>
    %96 = tpu.concatenate %91, %93, %95 in 1 : vector<128x128xbf16>, vector<128x128xbf16>, vector<128x128xbf16> -> vector<128x384xbf16>
    %c768_46 = arith.constant 768 : index
    %c0_47 = arith.constant 0 : index
    %97 = vector.load %arg6[%c768_46, %c0_47] : memref<1152x128xbf16, #tpu.memory_space<vmem>>, vector<384x128xbf16>
    %cst_48 = arith.constant dense<0.000000e+00> : vector<128x128xf32>
    %98 = tpu.matmul %96, %97, %cst_48 {dimension_numbers = #tpu.dot_dimension_numbers<[1], [0], [0], [1], [0, 0, 1, 1], [], []>} : vector<128x384xbf16>, vector<384x128xbf16>, vector<128x128xf32> -> vector<128x128xf32>
    %99 = arith.addf %88, %98 : vector<128x128xf32>
    %c2_i32_49 = arith.constant 2 : i32
    %100 = arith.addi %1, %c2_i32_49 : i32
    %c0_50 = arith.constant 0 : index
    %101 = arith.index_cast %100 : i32 to index
    %c1_51 = arith.constant 1 : index
    %c0_52 = arith.constant 0 : index
    %102 = vector.load %arg2[%c0_50, %101, %c1_51, %c0_52] : memref<1x20x18x128xbf16, #tpu.memory_space<vmem>>, vector<1x8x16x128xbf16>
    %103 = vector.shape_cast %102 : vector<1x8x16x128xbf16> to vector<8x16x128xbf16>
    %104 = vector.shape_cast %103 : vector<8x16x128xbf16> to vector<128x128xbf16>
    %c0_53 = arith.constant 0 : index
    %c0_54 = arith.constant 0 : index
    %105 = vector.load %arg7[%c0_53, %c0_54] : memref<1x128xf32, #tpu.memory_space<vmem>>, vector<1x128xf32>
    %106 = vector.shape_cast %105 : vector<1x128xf32> to vector<128xf32>
    %107 = vector.shape_cast %106 : vector<128xf32> to vector<1x128xf32>
    %108 = vector.broadcast %107 : vector<1x128xf32> to vector<128x128xf32>
    %109 = arith.mulf %99, %108 : vector<128x128xf32>
    %c0_55 = arith.constant 0 : index
    %c0_56 = arith.constant 0 : index
    %110 = vector.load %arg8[%c0_55, %c0_56] : memref<1x128xf32, #tpu.memory_space<vmem>>, vector<1x128xf32>
    %111 = vector.shape_cast %110 : vector<1x128xf32> to vector<128xf32>
    %112 = vector.shape_cast %111 : vector<128xf32> to vector<1x128xf32>
    %113 = vector.broadcast %112 : vector<1x128xf32> to vector<128x128xf32>
    %114 = arith.addf %109, %113 : vector<128x128xf32>
    %115 = arith.extf %104 : vector<128x128xbf16> to vector<128x128xf32>
    %116 = arith.addf %114, %115 : vector<128x128xf32>
    %cst_57 = arith.constant 0.000000e+00 : f32
    %117 = vector.broadcast %cst_57 : f32 to vector<128x128xf32>
    %118 = arith.maximumf %116, %117 : vector<128x128xf32>
    %119 = vector.shape_cast %118 : vector<128x128xf32> to vector<8x16x128xf32>
    %120 = arith.truncf %119 : vector<8x16x128xf32> to vector<8x16x128xbf16>
    %c0_58 = arith.constant 0 : index
    %c0_59 = arith.constant 0 : index
    %c0_60 = arith.constant 0 : index
    %c0_61 = arith.constant 0 : index
    %121 = vector.load %arg9[%c0_58, %c0_59, %c0_60, %c0_61] : memref<1x8x16x128xbf16, #tpu.memory_space<vmem>>, vector<1x8x16x128xbf16>
    %122 = vector.shape_cast %121 : vector<1x8x16x128xbf16> to vector<8x16x128xbf16>
    %123 = vector.shape_cast %120 : vector<8x16x128xbf16> to vector<1x8x16x128xbf16>
    tpu.vector_store %arg9[%c0_58, %c0_59, %c0_60, %c0_61], %123 {strides = array<i32>} : memref<1x8x16x128xbf16, #tpu.memory_space<vmem>>, vector<1x8x16x128xbf16>,
    return
  }
  func.func @transform_0(%arg0: i32, %arg1: i32) -> (i32, i32, i32, i32) {
    %c0_i32 = arith.constant 0 : i32
    %c0_i32_0 = arith.constant 0 : i32
    %c0_i32_1 = arith.constant 0 : i32
    %c0_i32_2 = arith.constant 0 : i32
    return %arg0, %c0_i32, %c0_i32_0, %c0_i32_1 : i32, i32, i32, i32
  }
  func.func @transform_1(%arg0: i32, %arg1: i32) -> (i32, i32) {
    %c0_i32 = arith.constant 0 : i32
    %c0_i32_0 = arith.constant 0 : i32
    %c0_i32_1 = arith.constant 0 : i32
    return %c0_i32, %c0_i32_0 : i32, i32
  }
  func.func @transform_2(%arg0: i32, %arg1: i32) -> (i32, i32) {
    %c0_i32 = arith.constant 0 : i32
    %c0_i32_0 = arith.constant 0 : i32
    %c0_i32_1 = arith.constant 0 : i32
    return %c0_i32, %c0_i32_0 : i32, i32
  }
  func.func @transform_3(%arg0: i32, %arg1: i32) -> (i32, i32) {
    %c0_i32 = arith.constant 0 : i32
    %c0_i32_0 = arith.constant 0 : i32
    %c0_i32_1 = arith.constant 0 : i32
    return %c0_i32, %c0_i32_0 : i32, i32
  }
  func.func @transform_4(%arg0: i32, %arg1: i32) -> (i32, i32) {
    %c0_i32 = arith.constant 0 : i32
    %c0_i32_0 = arith.constant 0 : i32
    %c0_i32_1 = arith.constant 0 : i32
    return %c0_i32, %c0_i32_0 : i32, i32
  }
  func.func @transform_5(%arg0: i32, %arg1: i32) -> (i32, i32) {
    %c0_i32 = arith.constant 0 : i32
    %c0_i32_0 = arith.constant 0 : i32
    %c0_i32_1 = arith.constant 0 : i32
    return %c0_i32, %c0_i32_0 : i32, i32
  }
  func.func @transform_6(%arg0: i32, %arg1: i32) -> (i32, i32) {
    %c0_i32 = arith.constant 0 : i32
    %c0_i32_0 = arith.constant 0 : i32
    %c0_i32_1 = arith.constant 0 : i32
    return %c0_i32, %c0_i32_0 : i32, i32
  }
  func.func @transform_7(%arg0: i32, %arg1: i32) -> (i32, i32, i32, i32) {
    %c0_i32 = arith.constant 0 : i32
    %c0_i32_0 = arith.constant 0 : i32
    %c0_i32_1 = arith.constant 0 : i32
    return %arg0, %arg1, %c0_i32, %c0_i32_0 : i32, i32, i32, i32
  }
}

</mosaic_0001>

<bundles_post_ra>
// kernel: basic_block_forward.1
= control target key start
LH: loop header
LB: loop body
LE: loop exit
PB: predicated region body
PF: predicated region fallthrough
CT: control target
= control target key end

     0   :  { %s8245_s24 = smov 0   ;;  %s8247_s25 = smov 0   ;;  %s10868_s0 = inlined_call_operand.vmem [shape: bf16[2,20,18,128], index: 0, kind: input, shape index: {}]   ;;  %s10869_s1 = inlined_call_operand.vmem [shape: bf16[1152,128], index: 1, kind: input, shape index: {}]   ;;  %s10870_s2 = inlined_call_operand.vmem [shape: f32[1,128], index: 2, kind: input, shape index: {}]   ;;  %s10871_s3 = inlined_call_operand.vmem [shape: f32[1,128], index: 3, kind: input, shape index: {}]   ;;  %s10872_s4 = inlined_call_operand.vmem [shape: bf16[1152,128], index: 4, kind: input, shape index: {}]   ;;  %s10873_s5 = inlined_call_operand.vmem [shape: f32[1,128], index: 5, kind: input, shape index: {}]   ;;  %s10874_s6 = inlined_call_operand.vmem [shape: f32[1,128], index: 6, kind: input, shape index: {}]   ;;  %s10875_s7 = inlined_call_operand.vmem [shape: bf16[2,16,16,128], index: 7, kind: output, shape index: {}]  }
   0x1   :  { %s8249_s26 = smov 0   ;;  %s8251_s27 = smov 0  }
   0x2   :  { %s8253_s28 = smov 0  }
   0x3 LB: > { %s26_s29 = sadd.s32 1, %s8193_s26  ;;  %s29_s30 = sadd.s32 1, %s8197_s27  ;;  %s8201_s28 = sphi %s8253_s28, %s17_s28   ;;  %s8197_s27 = sphi %s8251_s27, %s10925_s27   ;;  %s8193_s26 = sphi %s8249_s26, %s10924_s26   ;;  %s8189_s25 = sphi %s8247_s25, %s10923_s25   ;;  %s8185_s24 = sphi %s8245_s24, %s10922_s24  }
   0x4   : > { %p27_p0 = scmp.ge.s32.totalorder %s26_s29, 2  ;;  %p6417_p1 = scmp.ge.s32.totalorder %s8201_s28, 1 }
   0x5   : > { %p251_p2 = scmp.lt.s32.totalorder %s8201_s28, 5 }
   0x6   : > { %s10927_s29 = smov (%p27_p0, %s26_s29), 0  ;;  %s10929_s30 = smov (!%p27_p0, %s29_s30), %s8197_s27 }
   0x7   : > { %p252_p3 = pnand %p6417_p1, %p251_p2  ;;  %p31_p4 = scmp.ge.s32.totalorder %s10929_s30, 2 }
   0x9   : > { %s10931_s30 = smov (%p31_p4, %s10929_s30), 0  ;;  %255 = sbr.rel (%p252_p3) target bundleno = 924 (0x39c), region = 48 }
  0x10   : > { %v7951_v0 = vld [vmem:[%s10869_s1 + $0x100] sm:$0xff]   ;;  %p288_p5 = scmp.lt.s32.totalorder %s8189_s25, 1  ;;  %s6419_s12 = sshll.u32 %s8185_s24, 3  ;;  %v7955_v4 = vld [vmem:[%s10869_s1 + $0x108] sm:$0xff]   ;;  %v7959_v8 = vld [vmem:[%s10869_s1 + $0x110] sm:$0xff]   ;;  %vm612_vm3 = vcmask 1042432  }
  0x11   : > { %v7952_v1 = vld [vmem:[%s10869_s1 + $0xc0] sm:$0xff]   ;;  %7002 = vmatprep.subr.bf16.mxu0 %v7951_v0  ;;  %p296_p6 = scmp.lt.s32.totalorder %s6419_s12, 15  ;;  %v7956_v5 = vld [vmem:[%s10869_s1 + $0xc8] sm:$0xff]   ;;  %v7960_v9 = vld [vmem:[%s10869_s1 + $0xd0] sm:$0xff]   ;;  %s6918_s21 = smul.u32 96, %s8185_s24  ;;  %vm613_vm4 = vcmask 1046532  }
  0x12   : > { %v7953_v2 = vld [vmem:[%s10869_s1 + $0x40] sm:$0xff]   ;;  %7003 = vmatpush3.bf16.msra.mxu0 %v7952_v1  ;;  %s10933_s25 = smov (!%p288_p5, %s8189_s25), 1  ;;  %v7957_v6 = vld [vmem:[%s10869_s1 + $0x48] sm:$0xff]   ;;  %v7961_v10 = vld [vmem:[%s10869_s1 + $0x50] sm:$0xff]   ;;  %vm339_vm0 = vsmask.f32 3328 }
  0x13   : > { %v7954_v3 = vld [vmem:[%s10869_s1] sm:$0xff]   ;;  %7096 = vmatprep.subr.bf16.mxu1 %v7953_v2  ;;  %s10935_s12 = smov (!%p296_p6, %s6419_s12), 15  ;;  %7004 = vmatprep.subr.bf16.mxu0 %v7955_v4  ;;  %s6421_s23 = sshll.u32 %s10933_s25, 5  ;;  %v7958_v7 = vld [vmem:[%s10869_s1 + $0x8] sm:$0xff]   ;;  %v7962_v11 = vld [vmem:[%s10869_s1 + $0x10] sm:$0xff]   ;;  %vm3404_vm6 = vcmask 1043456  }
  0x14   : > { %7097 = vmatpush3.bf16.msra.mxu1 %v7954_v3  ;;  %s6420_s10 = sshll.u32 %s10935_s12, 1  ;;  %v7963_v12 = vld [vmem:[%s10869_s1 + $0x118] sm:$0xff]   ;;  %v7967_v16 = vld [vmem:[%s10869_s1 + $0x120] sm:$0xff]   ;;  %v7971_v20 = vld [vmem:[%s10869_s1 + $0x128] sm:$0xff]   ;;  %vm340_vm1 = vsmask.f32 7440 }
  0x15   : > { %7098 = vmatprep.subr.bf16.mxu1 %v7957_v6  ;;  %s300_s14 = sadd.s32 %s6421_s23, %s6420_s10  ;;  %v7964_v13 = vld [vmem:[%s10869_s1 + $0xd8] sm:$0xff]   ;;  %v7968_v17 = vld [vmem:[%s10869_s1 + $0xe0] sm:$0xff]   ;;  %v7972_v21 = vld [vmem:[%s10869_s1 + $0xe8] sm:$0xff]   ;;  %vm3405_vm7 = vsmask.f32 7938  ;;  %vm3411_vm9 = vcmask 1040384  }
  0x16   : > { %7005 = vmatpush3.bf16.msra.mxu0 %v7956_v5  ;;  %s6422_s17 = sshll.u32 %s300_s14, 2  ;;  %v7965_v14 = vld [vmem:[%s10869_s1 + $0x58] sm:$0xff]   ;;  %v7969_v18 = vld [vmem:[%s10869_s1 + $0x60] sm:$0xff]   ;;  %s7908_s14 = smul.u32 240, %s10933_s25  ;;  %v7973_v22 = vld [vmem:[%s10869_s1 + $0x68] sm:$0xff]  }
  0x17   : > { %7006 = vmatprep.subr.bf16.mxu0 %v7959_v8  ;;  %s8317_s12 = scalar_lea.vmem %s10875_s7, %s6422_s17  ;;  %v7966_v15 = vld [vmem:[%s10869_s1 + $0x18] sm:$0xff]   ;;  %v7970_v19 = vld [vmem:[%s10869_s1 + $0x20] sm:$0xff]   ;;  %v7974_v23 = vld [vmem:[%s10869_s1 + $0x28] sm:$0xff]   ;;  %vm3201_vm8 = vsmask.f32 256  ;;  %p6704_p7 = scmp.ne.s32.totalorder %s8185_s24, 0 }
  0x18   : > { %7099 = vmatpush3.bf16.msra.mxu1 %v7958_v7  ;;  %v7975_v24 = vld [vmem:[%s10869_s1 + $0x130] sm:$0xff]   ;;  %s292_s9 = scalar_lea.vmem %s10868_s0, %s7908_s14  ;;  %v7979_v28 = vld [vmem:[%s10869_s1 + $0x138] sm:$0xff]   ;;  %v7984_v42 = vld [vmem:[%s10869_s1 + $0x140] sm:$0xff]   ;;  %vm3202_vm10 = vsmask.f32 4368 }
  0x19   : > { %7100 = vmatprep.subr.bf16.mxu1 %v7961_v10  ;;  %v7976_v25 = vld [vmem:[%s10869_s1 + $0xf0] sm:$0xff]   ;;  %s8378_s18 = scalar_lea.vmem %s292_s9, %s6918_s21  ;;  %v7980_v29 = vld [vmem:[%s10869_s1 + $0xf8] sm:$0xff]   ;;  %vm8412_vm2 = vmor %vm339_vm0, %vm340_vm1 }
  0x1a   : > { %7007 = vmatpush3.bf16.msra.mxu0 %v7960_v9  ;;  %v7977_v26 = vld [vmem:[%s10869_s1 + $0x70] sm:$0xff]   ;;  %v7981_v30 = vld [vmem:[%s10869_s1 + $0x78] sm:$0xff]   ;;  %v8387_v31 = vld [vmem:[%s8378_s18 + $0xc] sm:$0xf] }
  0x1b   : > { %7008 = vmatprep.subr.bf16.mxu0 %v7963_v12  ;;  %v7978_v27 = vld [vmem:[%s10869_s1 + $0x30] sm:$0xff]   ;;  %v888_v34 = vshrl.u32 %v8387_v31, 16  ;;  %v891_v35 = vshll.u32 %v8387_v31, 16  ;;  %v7982_v41 = vld [vmem:[%s10869_s1 + $0x38] sm:$0xff]   ;;  %v8405_v49 = vld [vmem:[%s8378_s18] sm:$0xf] }
  0x1c   : > { %7101 = vmatpush3.bf16.msra.mxu1 %v7962_v11  ;;  %v6469_v32 = vld [vmem:[%s8378_s18 + $0x10] sm:$0xf]  ;;  %v8391_v33 = vld [vmem:[%s8378_s18 + $0x14] sm:$0x1]  ;;  %v8408_v50 = vld [vmem:[%s8378_s18 + $0x4] sm:$0xf] }
  0x1d   : > { %7102 = vmatprep.subr.bf16.mxu1 %v7965_v14  ;;  %v897_v36 = vshll.u32 %v6469_v32, 16  ;;  %v901_v37 = vshrl.u32 %v6469_v32, 16  ;;  %v907_v38 = vshll.u32 %v8391_v33, 16  ;;  %v890_v39 = vrot.slane %v888_v34, 4  ;;  %v8417_v53 = vld [vmem:[%s8378_s18 + $0x8] sm:$0x1]  ;;  %vm8851_vm5 = vmor %vm612_vm3, %vm613_vm4 }
  0x1e   : > { %7009 = vmatpush3.bf16.msra.mxu0 %v7964_v13  ;;  %v893_v40 = vrot.slane %v891_v35, 5  ;;  %v6508_v48 = vcombine.low %v8387_v31, %v6469_v32  ;;  %v343_v54 = vshrl.u32 %v8405_v49, 16  ;;  %v346_v55 = vshll.u32 %v8405_v49, 16  ;;  %v8426_v61 = vld [vmem:[%s8378_s18 + $0x18] sm:$0xf]  ;;  %v7987_v12 = vld [vmem:[%s10869_s1 + $0x148] sm:$0xff]   ;;  %vm9555_vm11 = vmand %vm3404_vm6, %vm3405_vm7 }
  0x1f   : > { %7010 = vmatprep.subr.bf16.mxu0 %v7967_v16  ;;  %v899_v43 = vrot.slane %v897_v36, 5  ;;  %v903_v44 = vrot.slane %v901_v37, 4  ;;  %v909_v45 = vrot.slane %v907_v38, 5  ;;  %v352_v56 = vshll.u32 %v8408_v50, 16  ;;  %v8429_v2 = vld [vmem:[%s8378_s18 + $0x1c] sm:$0xf]  ;;  %vm9562_vm12 = vmand %vm3411_vm9, %vm3201_vm8 }
  0x20   : > { %7103 = vmatpush3.bf16.msra.mxu1 %v7966_v15  ;;  %v894_v47 = vor.u32 %v893_v40, %v890_v39  ;;  %v356_v58 = vshrl.u32 %v8408_v50, 16  ;;  %v362_v59 = vshll.u32 %v8417_v53, 16  ;;  %v345_v63 = vrot.slane %v343_v54, 4  ;;  %v8436_v7 = vld [vmem:[%s8378_s18 + $0x20] sm:$0x1]  ;;  %vm9570_vm13 = vmor %vm3201_vm8, %vm3202_vm10 }
  0x21   : > { %7104 = vmatprep.subr.bf16.mxu1 %v7969_v18  ;;  %v904_v52 = vor.u32 %v903_v44, %v899_v43  ;;  %v348_v0 = vrot.slane %v346_v55, 5  ;;  %v354_v1 = vrot.slane %v352_v56, 5  ;;  %v6436_v6 = vcombine.low %v8405_v49, %v8408_v50  ;;  %v8460_v31 = vld [vmem:[%s8378_s18 + $0x14] sm:$0x1]  ;;  %v8467_v37 = vld [vmem:[%s8378_s18 + $0x24] sm:$0xf]  ;;  %vm9600_vm14 = vmand %vm3411_vm9, %vm3405_vm7 }
  0x22   : > { %7011 = vmatpush3.bf16.msra.mxu0 %v7968_v17  ;;  %v895_v57 = vrot.slane %v894_v47, 4  ;;  %v358_v4 = vrot.slane %v356_v58, 4  ;;  %v364_v5 = vrot.slane %v362_v59, 5  ;;  %v912_v10 = vshrl.u32 %v8426_v61, 16  ;;  %v6476_v55 = vld [vmem:[%s8378_s18 + $0x2c] sm:$0x1] }
  0x23   : > { %7012 = vmatprep.subr.bf16.mxu0 %v7971_v20  ;;  %v905_v62 = vrot.slane %v904_v52, 4  ;;  %v349_v9 = vor.u32 %v348_v0, %v345_v63  ;;  %v915_v11 = vshll.u32 %v8426_v61, 16  ;;  %v921_v15 = vshll.u32 %v8429_v2, 16  ;;  %v8000_v56 = vld [vmem:[%s10869_s1 + $0x80] sm:$0xff]  }
  0x24   : > { %7105 = vmatpush3.bf16.msra.mxu1 %v7970_v19  ;;  %v900_v3 = vsel %vm8412_vm2, %v895_v57, %v899_v43  ;;  %v359_v14 = vor.u32 %v358_v4, %v354_v1  ;;  %v925_v16 = vshrl.u32 %v8429_v2, 16  ;;  %v914_v18 = vrot.slane %v912_v10, 4  ;;  %v8472_v43 = vld [vmem:[%s8378_s18 + $0x28] sm:$0xf]  ;;  %v7994_v4 = vld [vmem:[%s10869_s1 + $0x158] sm:$0xff]  }
  0x25   : > { %7106 = vmatprep.subr.bf16.mxu1 %v7973_v22  ;;  %v910_v8 = vsel %vm8412_vm2, %v905_v62, %v909_v45  ;;  %v350_v17 = vrot.slane %v349_v9, 4  ;;  %v917_v19 = vrot.slane %v915_v11, 5  ;;  %v931_v20 = vshll.u32 %v8436_v7, 16  ;;  %v8490_v62 = vld [vmem:[%s8378_s18 + $0x18] sm:$0xf] }
  0x26   : > { %7013 = vmatpush3.bf16.msra.mxu0 %v7972_v21  ;;  %v6518_v13 = vcombine.low %v900_v3, %v910_v8  ;;  %v8449_v21 = vld [vmem:[%s8378_s18 + $0xc] sm:$0xf]  ;;  %v360_v22 = vrot.slane %v359_v14, 4  ;;  %v8495_v3 = vld [vmem:[%s8378_s18 + $0x1c] sm:$0xf]  ;;  %v949_v8 = vshrl.u32 %v8472_v43, 16  ;;  %v6510_v14 = vcombine.low %v8467_v37, %v8472_v43 }
  0x27   : > { %7014 = vmatprep.subr.bf16.mxu0 %v7975_v24  ;;  %v927_v24 = vrot.slane %v925_v16, 4  ;;  %v367_v35 = vshrl.u32 %v8449_v21, 16  ;;  %v370_v36 = vshll.u32 %v8449_v21, 16  ;;  %v955_v9 = vshll.u32 %v6476_v55, 16  ;;  %v317_v10 = vld [vmem:[%s8378_s18 + $0x20] sm:$0x1] }
  0x28   : > { %7107 = vmatpush3.bf16.msra.mxu1 %v7974_v23  ;;  %1571 = vmatprep.mubr.bf16.mxu0 %v6518_v13  ;;  %v923_v23 = vrot.slane %v921_v15, 5  ;;  %v365_v32 = vsel %vm8412_vm2, %v360_v22, %v364_v5  ;;  %v8004_v15 = vld [vmem:[%s10869_s1 + $0x88] sm:$0xff]  }
  0x29   : > { %7108 = vmatprep.subr.bf16.mxu1 %v7977_v26  ;;  %v8453_v26 = vld [vmem:[%s8378_s18 + $0x10] sm:$0xf]  ;;  %v369_v45 = vrot.slane %v367_v35, 4  ;;  %v372_v47 = vrot.slane %v370_v36, 5  ;;  %v8002_v55 = vld [vmem:[%s10869_s1 + $0x168] sm:$0xff]  }
  0x2a   : > { %7015 = vmatpush3.bf16.msra.mxu0 %v7976_v25  ;;  %v928_v34 = vor.u32 %v927_v24, %v923_v23  ;;  %v376_v40 = vshll.u32 %v8453_v26, 16  ;;  %v394_v24 = vshll.u32 %v8490_v62, 16 }
  0x2b   : > { %7016 = vmatprep.subr.bf16.mxu0 %v7979_v28  ;;  %v918_v28 = vor.u32 %v917_v19, %v914_v18  ;;  %v373_v58 = vor.u32 %v372_v47, %v369_v45  ;;  %v951_v18 = vrot.slane %v949_v8, 4  ;;  %v957_v19 = vrot.slane %v955_v9, 5  ;;  %v8531_v45 = vld [vmem:[%s8378_s18 + $0x38] sm:$0x1]  ;;  %v8555_v8 = vld [vmem:[%s8378_s18 + $0x2c] sm:$0x1] }
  0x2c   : > { %7109 = vmatpush3.bf16.msra.mxu1 %v7978_v27  ;;  %v355_v27 = vsel %vm8412_vm2, %v350_v17, %v354_v1  ;;  %v929_v44 = vrot.slane %v928_v34, 4  ;;  %v378_v50 = vrot.slane %v376_v40, 5  ;;  %v936_v1 = vshrl.u32 %v8467_v37, 16 }
  0x2d   : > { %7110 = vmatprep.subr.bf16.mxu1 %v7981_v30  ;;  %v6509_v30 = vcombine.low %v8426_v61, %v8429_v2  ;;  %v6446_v38 = vcombine.low %v355_v27, %v365_v32  ;;  %v919_v39 = vrot.slane %v918_v28, 4  ;;  %v6437_v61 = vcombine.low %v8449_v21, %v8453_v26  ;;  %v7998_v32 = vld [vmem:[%s10869_s1 + $0x160] sm:$0xff]  }
  0x2e   : > { %7017 = vmatpush3.bf16.msra.mxu0 %v7980_v29  ;;  %v933_v29 = vrot.slane %v931_v20, 5  ;;  %v939_v2 = vshll.u32 %v8467_v37, 16  ;;  %v374_v5 = vrot.slane %v373_v58, 4  ;;  %v8007_v20 = vld [vmem:[%s10869_s1 + $0x90] sm:$0xff]   ;;  %v400_v28 = vshll.u32 %v8495_v3, 16 }
  0x2f   : > { %7524 = vmatprep.subr.bf16.mxu0 %v7984_v42  ;;  %1941 = vmatprep.mubr.bf16.mxu1 %v6446_v38  ;;  %v924_v49 = vsel %vm8412_vm2, %v919_v39, %v923_v23  ;;  %v391_v23 = vshrl.u32 %v8490_v62, 16  ;;  %v396_v36 = vrot.slane %v394_v24, 5  ;;  %v410_v38 = vshll.u32 %v317_v10, 16  ;;  %v8526_v39 = vld [vmem:[%s8378_s18 + $0x34] sm:$0xf] }
  0x30   : > { %7111 = vmatpush3.bf16.msra.mxu1 %v7982_v41  ;;  %v380_v41 = vshrl.u32 %v8453_v26, 16  ;;  %v934_v57 = vsel %vm8412_vm2, %v929_v44, %v933_v29  ;;  %v941_v13 = vrot.slane %v939_v2, 5  ;;  %v379_v16 = vsel %vm8412_vm2, %v374_v5, %v378_v50  ;;  %v8009_v2 = vld [vmem:[%s10869_s1 + $0x98] sm:$0xff]  }
  0x31   : > { %1572 = vmatmul.mubr.bf16.vlgmr.msra.gmra.mrb[0].mxu0 %v6508_v48  ;;  %v386_v48 = vshll.u32 %v8460_v31, 16  ;;  %v6519_v63 = vcombine.low %v924_v49, %v934_v57  ;;  %7560 = vmatprep.subr.bf16.mxu1 %v8000_v56  ;;  %v404_v29 = vshrl.u32 %v8495_v3, 16  ;;  %v393_v35 = vrot.slane %v391_v23, 4 }
  0x32   : > { %7525 = vmatpush3.bf16.msra.mxu0 %v7984_v42  ;;  %v7991_v42 = vld [vmem:[%s10869_s1 + $0x150] sm:$0xff]   ;;  %v382_v52 = vrot.slane %v380_v41, 4  ;;  %v402_v41 = vrot.slane %v400_v28, 5  ;;  %v6438_v44 = vcombine.low %v8490_v62, %v8495_v3  ;;  %v412_v49 = vrot.slane %v410_v38, 5 }
  0x33   : > { %7526 = vmatprep.subr.bf16.mxu0 %v7987_v12  ;;  %1942 = vmatmul.mubr.bf16.vlgmr.msra.gmra.mrb[0].mxu1 %v6436_v6  ;;  %v388_v59 = vrot.slane %v386_v48, 5  ;;  %v945_v6 = vshll.u32 %v8472_v43, 16  ;;  %v397_v48 = vor.u32 %v396_v36, %v393_v35  ;;  %v434_v43 = vshll.u32 %v8555_v8, 16  ;;  %v8012_v35 = vld [vmem:[%s10869_s1 + $0xa0] sm:$0xff]  }
  0x34   : > { %v383_v0 = vor.u32 %v382_v52, %v378_v50  ;;  %7561 = vmatpush3.bf16.msra.mxu1 %v8000_v56  ;;  %1579 = vmatprep.mubr.bf16.mxu0 %v6519_v63  ;;  %v8537_v52 = vld [vmem:[%s8378_s18 + $0x24] sm:$0xf] }
  0x35   : > { %v947_v17 = vrot.slane %v945_v6, 5  ;;  %7562 = vmatprep.subr.bf16.mxu1 %v8004_v15  ;;  %v398_v63 = vrot.slane %v397_v48, 4  ;;  %v979_v6 = vshll.u32 %v8531_v45, 16 }
  0x36   : > { %7527 = vmatpush3.bf16.msra.mxu0 %v7987_v12  ;;  %v384_v11 = vrot.slane %v383_v0, 4  ;;  %v938_v12 = vrot.slane %v936_v1, 4  ;;  %v973_v1 = vshrl.u32 %v8526_v39, 16 }
  0x37   : > { %7528 = vmatprep.subr.bf16.mxu0 %v7991_v42  ;;  %v952_v27 = vor.u32 %v951_v18, %v947_v17  ;;  %v403_v9 = vsel %vm8412_vm2, %v398_v63, %v402_v41  ;;  %v981_v18 = vrot.slane %v979_v6, 5 }
  0x38   : > { %v389_v21 = vsel %vm8412_vm2, %v384_v11, %v388_v59  ;;  %v942_v22 = vor.u32 %v941_v13, %v938_v12  ;;  %7563 = vmatpush3.bf16.msra.mxu1 %v8004_v15  ;;  %v969_v59 = vshll.u32 %v8526_v39, 16  ;;  %v975_v10 = vrot.slane %v973_v1, 4  ;;  %v8563_v13 = vld [vmem:[%s8378_s18 + $0x3c] sm:$0xf]  ;;  %v8008_v15 = vld [vmem:[%s10869_s1 + $0x170] sm:$0xff]  }
  0x39   : > { %1580 = vmatmul.mubr.bf16.gmra.mrb[4].mxu0 %v6509_v30  ;;  %v6447_v26 = vcombine.low %v379_v16, %v389_v21  ;;  %v8520_v30 = vld [vmem:[%s8378_s18 + $0x30] sm:$0xf]  ;;  %7564 = vmatprep.subr.bf16.mxu1 %v8007_v20  ;;  %v953_v40 = vrot.slane %v952_v27, 4  ;;  %v415_v12 = vshrl.u32 %v8537_v52, 16 }
  0x3a   : > { %7529 = vmatpush3.bf16.msra.mxu0 %v7991_v42  ;;  %v943_v34 = vrot.slane %v942_v22, 4  ;;  %v406_v42 = vrot.slane %v404_v29, 4  ;;  %v960_v50 = vshrl.u32 %v8520_v30, 16  ;;  %v963_v58 = vshll.u32 %v8520_v30, 16 }
  0x3b   : > { %7530 = vmatprep.subr.bf16.mxu0 %v7994_v4  ;;  %1949 = vmatprep.mubr.bf16.mxu1 %v6447_v26  ;;  %v958_v56 = vsel %vm8412_vm2, %v953_v40, %v957_v19  ;;  %v971_v5 = vrot.slane %v969_v59, 5  ;;  %v6511_v11 = vcombine.low %v8520_v30, %v8526_v39  ;;  %v418_v19 = vshll.u32 %v8537_v52, 16 }
  0x3c   : > { %1950 = vmatmul.mubr.bf16.gmra.mrb[4].mxu1 %v6437_v61  ;;  %v948_v47 = vsel %vm8412_vm2, %v943_v34, %v947_v17  ;;  %v407_v57 = vor.u32 %v406_v42, %v402_v41  ;;  %v8547_v61 = vld [vmem:[%s8378_s18 + $0x28] sm:$0xf]  ;;  %v962_v0 = vrot.slane %v960_v50, 4  ;;  %v417_v22 = vrot.slane %v415_v12, 4  ;;  %v8592_v42 = vld [vmem:[%s8378_s18 + $0x30] sm:$0xf] }
  0x3d   : > { %7565 = vmatpush3.bf16.msra.mxu1 %v8007_v20  ;;  %v6520_v62 = vcombine.low %v948_v47, %v958_v56  ;;  %v976_v21 = vor.u32 %v975_v10, %v971_v5  ;;  %v424_v23 = vshll.u32 %v8547_v61, 16  ;;  %v420_v26 = vrot.slane %v418_v19, 5  ;;  %v8595_v47 = vld [vmem:[%s8378_s18 + $0x34] sm:$0xf] }
  0x3e   : > { %7531 = vmatpush3.bf16.msra.mxu0 %v7994_v4  ;;  %v408_v3 = vrot.slane %v407_v57, 4  ;;  %v965_v4 = vrot.slane %v963_v58, 5  ;;  %7566 = vmatprep.subr.bf16.mxu1 %v8009_v2  ;;  %v428_v37 = vshrl.u32 %v8547_v61, 16  ;;  %v6439_v29 = vcombine.low %v8537_v52, %v8547_v61 }
  0x3f   : > { %7532 = vmatprep.subr.bf16.mxu0 %v7998_v32  ;;  %1587 = vmatprep.mubr.bf16.mxu0 %v6520_v62  ;;  %v977_v27 = vrot.slane %v976_v21, 4  ;;  %v426_v28 = vrot.slane %v424_v23, 5  ;;  %v984_v34 = vshrl.u32 %v8563_v13, 16  ;;  %v421_v38 = vor.u32 %v420_v26, %v417_v22  ;;  %v8626_v22 = vld [vmem:[%s8378_s18 + $0x48] sm:$0xf] }
  0x40   : > { %v413_v16 = vsel %vm8412_vm2, %v408_v3, %v412_v49  ;;  %v966_v17 = vor.u32 %v965_v4, %v962_v0  ;;  %v430_v40 = vrot.slane %v428_v37, 4  ;;  %v436_v41 = vrot.slane %v434_v43, 5  ;;  %v8632_v43 = vld [vmem:[%s8378_s18 + $0x50] sm:$0x1] }
  0x41   : > { %1588 = vmatmul.mubr.bf16.gmra.mrb[8].mxu0 %v6510_v14  ;;  %v6448_v20 = vcombine.low %v403_v9, %v413_v16  ;;  %v8578_v14 = vld [vmem:[%s8378_s18 + $0x40] sm:$0xf]  ;;  %7567 = vmatpush3.bf16.msra.mxu1 %v8009_v2  ;;  %v982_v48 = vsel %vm8412_vm2, %v977_v27, %v981_v18  ;;  %v986_v49 = vrot.slane %v984_v34, 4  ;;  %v987_v50 = vshll.u32 %v8563_v13, 16  ;;  %v8014_v2 = vld [vmem:[%s10869_s1 + $0xa8] sm:$0xff]   ;;  %v8017_v9 = vld [vmem:[%s10869_s1 + $0xb0] sm:$0xff]  }
  0x42   : > { %7533 = vmatpush3.bf16.msra.mxu0 %v7998_v32  ;;  %v967_v24 = vrot.slane %v966_v17, 4  ;;  %v8583_v32 = vld [vmem:[%s8378_s18 + $0x44] sm:$0x1]  ;;  %7568 = vmatprep.subr.bf16.mxu1 %v8012_v35  ;;  %v422_v57 = vrot.slane %v421_v38, 4  ;;  %v431_v58 = vor.u32 %v430_v40, %v426_v28  ;;  %v997_v59 = vshrl.u32 %v8578_v14, 16  ;;  %v8018_v40 = vld [vmem:[%s10869_s1 + $0xb8] sm:$0xff]  }
  0x43   : > { %7534 = vmatprep.subr.bf16.mxu0 %v8002_v55  ;;  %1957 = vmatprep.mubr.bf16.mxu1 %v6448_v20  ;;  %v989_v62 = vrot.slane %v987_v50, 5  ;;  %v1003_v0 = vshll.u32 %v8583_v32, 16  ;;  %v6512_v1 = vcombine.low %v8563_v13, %v8578_v14  ;;  %v439_v6 = vshrl.u32 %v8592_v42, 16  ;;  %v8019_v27 = vld [vmem:[%s10869_s1 + $0x1c0] sm:$0xff]   ;;  %v8641_v38 = vld [vmem:[%s8378_s18 + $0x3c] sm:$0xf] }
  0x44   : > { %1958 = vmatmul.mubr.bf16.gmra.mrb[8].mxu1 %v6438_v44  ;;  %v972_v36 = vsel %vm8412_vm2, %v967_v24, %v971_v5  ;;  %v8013_v44 = vld [vmem:[%s10869_s1 + $0x178] sm:$0xff]   ;;  %v427_v3 = vsel %vm8412_vm2, %v422_v57, %v426_v28  ;;  %v432_v4 = vrot.slane %v431_v58, 4  ;;  %v999_v5 = vrot.slane %v997_v59, 4  ;;  %v8657_v58 = vld [vmem:[%s8378_s18 + $0x40] sm:$0xf] }
  0x45   : > { %v6521_v56 = vcombine.low %v972_v36, %v982_v48  ;;  %7569 = vmatpush3.bf16.msra.mxu1 %v8012_v35  ;;  %v990_v10 = vor.u32 %v989_v62, %v986_v49  ;;  %v1005_v12 = vrot.slane %v1003_v0, 5  ;;  %v442_v16 = vshll.u32 %v8592_v42, 16 }
  0x46   : > { %7535 = vmatpush3.bf16.msra.mxu0 %v8002_v55  ;;  %v993_v55 = vshll.u32 %v8578_v14, 16  ;;  %v448_v17 = vshll.u32 %v8595_v47, 16  ;;  %7570 = vmatprep.subr.bf16.mxu1 %v8014_v2  ;;  %v437_v18 = vsel %vm8412_vm2, %v432_v4, %v436_v41  ;;  %v441_v20 = vrot.slane %v439_v6, 4 }
  0x47   : > { %7536 = vmatprep.subr.bf16.mxu0 %v8008_v15  ;;  %1595 = vmatprep.mubr.bf16.mxu0 %v6521_v56  ;;  %v452_v21 = vshrl.u32 %v8595_v47, 16  ;;  %v6449_v23 = vcombine.low %v427_v3, %v437_v18  ;;  %v991_v24 = vrot.slane %v990_v10, 4  ;;  %v444_v26 = vrot.slane %v442_v16, 5 }
  0x48   : > { %v995_v63 = vrot.slane %v993_v55, 5  ;;  %v450_v37 = vrot.slane %v448_v17, 5  ;;  %v6440_v36 = vcombine.low %v8592_v42, %v8595_v47  ;;  %v1008_v49 = vshrl.u32 %v8626_v22, 16 }
  0x49   : > { %1596 = vmatmul.mubr.bf16.gmra.mrb[12].mxu0 %v6511_v11  ;;  %v8629_v11 = vld [vmem:[%s8378_s18 + $0x4c] sm:$0xf]  ;;  %7571 = vmatpush3.bf16.msra.mxu1 %v8014_v2  ;;  %v454_v34 = vrot.slane %v452_v21, 4  ;;  %v445_v48 = vor.u32 %v444_v26, %v441_v20  ;;  %v1011_v50 = vshll.u32 %v8626_v22, 16  ;;  %v1027_v4 = vshll.u32 %v8632_v43, 16 }
  0x4a   : > { %7537 = vmatpush3.bf16.msra.mxu0 %v8008_v15  ;;  %v8618_v15 = vld [vmem:[%s8378_s18 + $0x38] sm:$0x1]  ;;  %v1000_v19 = vor.u32 %v999_v5, %v995_v63  ;;  %7572 = vmatprep.subr.bf16.mxu1 %v8017_v9  ;;  %v996_v41 = vsel %vm8412_vm2, %v991_v24, %v995_v63  ;;  %v1017_v57 = vshll.u32 %v8629_v11, 16  ;;  %v1010_v63 = vrot.slane %v1008_v49, 4  ;;  %v8676_v20 = vld [vmem:[%s8378_s18 + $0x54] sm:$0xf] }
  0x4b   : > { %7538 = vmatprep.subr.bf16.mxu0 %v8013_v44  ;;  %v458_v35 = vshll.u32 %v8618_v15, 16  ;;  %1965 = vmatprep.mubr.bf16.mxu1 %v6449_v23  ;;  %v446_v62 = vrot.slane %v445_v48, 4  ;;  %v1013_v0 = vrot.slane %v1011_v50, 5  ;;  %v6513_v10 = vcombine.low %v8626_v22, %v8629_v11  ;;  %v8694_v49 = vld [vmem:[%s8378_s18 + $0x5c] sm:$0x1] }
  0x4c   : > { %v1001_v28 = vrot.slane %v1000_v19, 4  ;;  %1966 = vmatmul.mubr.bf16.gmra.mrb[12].mxu1 %v6439_v29  ;;  %v1019_v3 = vrot.slane %v1017_v57, 5  ;;  %v1021_v29 = vshrl.u32 %v8629_v11, 16  ;;  %v1029_v18 = vrot.slane %v1027_v4, 5 }
  0x4d   : > { %v460_v56 = vrot.slane %v458_v35, 5  ;;  %7573 = vmatpush3.bf16.msra.mxu1 %v8017_v9  ;;  %v451_v5 = vsel %vm8412_vm2, %v446_v62, %v450_v37  ;;  %v1014_v6 = vor.u32 %v1013_v0, %v1010_v63  ;;  %v463_v9 = vshrl.u32 %v8641_v38, 16  ;;  %v8687_v35 = vld [vmem:[%s8378_s18 + $0x58] sm:$0xf] }
  0x4e   : > { %7539 = vmatpush3.bf16.msra.mxu0 %v8013_v44  ;;  %v1006_v55 = vsel %vm8412_vm2, %v1001_v28, %v1005_v12  ;;  %v455_v44 = vor.u32 %v454_v34, %v450_v37  ;;  %7574 = vmatprep.subr.bf16.mxu1 %v8018_v40  ;;  %v8666_v12 = vld [vmem:[%s8378_s18 + $0x44] sm:$0x1]  ;;  %v1023_v17 = vrot.slane %v1021_v29, 4  ;;  %v466_v19 = vshll.u32 %v8641_v38, 16  ;;  %v8708_v29 = vld [vmem:[%s8378_s18 + $0x50] sm:$0x1] }
  0x4f   : > { %7190 = vmatprep.subr.bf16.mxu0 %v8019_v27  ;;  %v6522_v59 = vcombine.low %v996_v41, %v1006_v55  ;;  %v1015_v23 = vrot.slane %v1014_v6, 4  ;;  %v465_v24 = vrot.slane %v463_v9, 4  ;;  %v472_v26 = vshll.u32 %v8657_v58, 16 }
  0x50   : > { %v456_v2 = vrot.slane %v455_v44, 4  ;;  %v1024_v37 = vor.u32 %v1023_v17, %v1019_v3  ;;  %v468_v27 = vrot.slane %v466_v19, 5  ;;  %v476_v28 = vshrl.u32 %v8657_v58, 16 }
  0x51   : > { %1603 = vmatprep.mubr.bf16.mxu0 %v6522_v59  ;;  %7575 = vmatpush3.bf16.msra.mxu1 %v8018_v40  ;;  %v482_v34 = vshll.u32 %v8666_v12, 16  ;;  %v1020_v41 = vsel %vm8412_vm2, %v1015_v23, %v1019_v3  ;;  %v474_v40 = vrot.slane %v472_v26, 5  ;;  %v6441_v48 = vcombine.low %v8641_v38, %v8657_v58  ;;  %v8699_v59 = vld [vmem:[%s8378_s18 + $0x48] sm:$0xf]  ;;  %v8705_v3 = vld [vmem:[%s8378_s18 + $0x4c] sm:$0xf] }
  0x52   : > { %1604 = vmatmul.mubr.bf16.gmra.mrb[16].mxu0 %v6512_v1  ;;  %v461_v16 = vsel %vm8412_vm2, %v456_v2, %v460_v56  ;;  %v8682_v1 = vld [vmem:[%s10869_s1 + $0x200] sm:$0xff]   ;;  %v1032_v50 = vshrl.u32 %v8676_v20, 16  ;;  %v1025_v55 = vrot.slane %v1024_v37, 4  ;;  %v469_v44 = vor.u32 %v468_v27, %v465_v24 }
  0x53   : > { %v6450_v21 = vcombine.low %v451_v5, %v461_v16  ;;  %7596 = vmatprep.subr.bf16.mxu1 %v8682_v1  ;;  %v478_v56 = vrot.slane %v476_v28, 4  ;;  %v484_v57 = vrot.slane %v482_v34, 5  ;;  %v1035_v63 = vshll.u32 %v8676_v20, 16  ;;  %v8720_v34 = vld [vmem:[%s8378_s18 + $0x60] sm:$0xf] }
  0x54   : > { %v1034_v62 = vrot.slane %v1032_v50, 4  ;;  %v1041_v0 = vshll.u32 %v8687_v35, 16  ;;  %v1045_v2 = vshrl.u32 %v8687_v35, 16  ;;  %v470_v4 = vrot.slane %v469_v44, 4  ;;  %v8728_v44 = vld [vmem:[%s8378_s18 + $0x64] sm:$0xf] }
  0x55   : > { %1973 = vmatprep.mubr.bf16.mxu1 %v6450_v21  ;;  %v479_v5 = vor.u32 %v478_v56, %v474_v40  ;;  %v1051_v6 = vshll.u32 %v8694_v49, 16  ;;  %v1037_v16 = vrot.slane %v1035_v63, 5  ;;  %v6514_v26 = vcombine.low %v8676_v20, %v8687_v35 }
  0x56   : > { %1974 = vmatmul.mubr.bf16.gmra.mrb[16].mxu1 %v6440_v36  ;;  %v1030_v36 = vsel %vm8412_vm2, %v1025_v55, %v1029_v18  ;;  %v1043_v17 = vrot.slane %v1041_v0, 5  ;;  %v1047_v19 = vrot.slane %v1045_v2, 4  ;;  %v475_v21 = vsel %vm8412_vm2, %v470_v4, %v474_v40  ;;  %v8731_v2 = vld [vmem:[%s8378_s18 + $0x68] sm:$0x1] }
  0x57   : > { %v6523_v9 = vcombine.low %v1020_v41, %v1030_v36  ;;  %v480_v23 = vrot.slane %v479_v5, 4  ;;  %v1053_v24 = vrot.slane %v1051_v6, 5  ;;  %v1038_v18 = vor.u32 %v1037_v16, %v1034_v62 }
  0x58   : > { %v1048_v37 = vor.u32 %v1047_v19, %v1043_v17  ;;  %v487_v27 = vshrl.u32 %v8699_v59, 16  ;;  %v490_v28 = vshll.u32 %v8699_v59, 16  ;;  %v496_v40 = vshll.u32 %v8705_v3, 16 }
  0x59   : > { %1611 = vmatprep.mubr.bf16.mxu0 %v6523_v9  ;;  %v485_v41 = vsel %vm8412_vm2, %v480_v23, %v484_v57  ;;  %v500_v50 = vshrl.u32 %v8705_v3, 16  ;;  %v506_v55 = vshll.u32 %v8708_v29, 16  ;;  %v1039_v62 = vrot.slane %v1038_v18, 4  ;;  %v8734_v57 = vld [vmem:[%s8378_s18 + $0x54] sm:$0xf] }
  0x5a   : > { %1612 = vmatmul.mubr.bf16.gmra.mrb[20].mxu0 %v6513_v10  ;;  %v6451_v56 = vcombine.low %v475_v21, %v485_v41  ;;  %v1049_v63 = vrot.slane %v1048_v37, 4  ;;  %v489_v0 = vrot.slane %v487_v27, 4  ;;  %v492_v36 = vrot.slane %v490_v28, 5  ;;  %v8745_v27 = vld [vmem:[%s8378_s18 + $0x58] sm:$0xf] }
  0x5b   : > { %v498_v10 = vrot.slane %v496_v40, 5  ;;  %v502_v4 = vrot.slane %v500_v50, 4  ;;  %v508_v5 = vrot.slane %v506_v55, 5  ;;  %v1044_v6 = vsel %vm8412_vm2, %v1039_v62, %v1043_v17  ;;  %v8751_v40 = vld [vmem:[%s8378_s18 + $0x5c] sm:$0x1] }
  0x5c   : > { %1981 = vmatprep.mubr.bf16.mxu1 %v6451_v56  ;;  %v1054_v9 = vsel %vm8412_vm2, %v1049_v63, %v1053_v24  ;;  %v6442_v16 = vcombine.low %v8699_v59, %v8705_v3  ;;  %v1056_v19 = vshrl.u32 %v8720_v34, 16  ;;  %v493_v23 = vor.u32 %v492_v36, %v489_v0  ;;  %10888 = vst [vmem:[#allocation3_spill] sm:$0xff] %v8751_v40  ;;  %v8756_v62 = vld [vmem:[%s8378_s18 + $0x6c] sm:$0xf] }
  0x5d   : > { %v6524_v21 = vcombine.low %v1044_v6, %v1054_v9  ;;  %v503_v18 = vor.u32 %v502_v4, %v498_v10  ;;  %v1059_v37 = vshll.u32 %v8720_v34, 16  ;;  %v1065_v17 = vshll.u32 %v8728_v44, 16  ;;  %10889 = vst [vmem:[#allocation4_spill] sm:$0xff] %v8756_v62 }
  0x5e   : > { %1982 = vmatmul.mubr.bf16.gmra.mrb[20].mxu1 %v6441_v48  ;;  %v1058_v28 = vrot.slane %v1056_v19, 4  ;;  %v1069_v41 = vshrl.u32 %v8728_v44, 16  ;;  %v1075_v24 = vshll.u32 %v8731_v2, 16  ;;  %v494_v48 = vrot.slane %v493_v23, 4  ;;  %v8765_v23 = vld [vmem:[%s8378_s18 + $0x70] sm:$0xf] }
  0x5f   : > { %1619 = vmatprep.mubr.bf16.mxu0 %v6524_v21  ;;  %v504_v50 = vrot.slane %v503_v18, 4  ;;  %v1061_v55 = vrot.slane %v1059_v37, 5  ;;  %v6515_v56 = vcombine.low %v8720_v34, %v8728_v44  ;;  %v1067_v63 = vrot.slane %v1065_v17, 5  ;;  %10890 = vst [vmem:[#allocation5_spill] sm:$0xff] %v8765_v23 }
  0x60   : > { %v1071_v0 = vrot.slane %v1069_v41, 4  ;;  %v1077_v36 = vrot.slane %v1075_v24, 5  ;;  %v511_v4 = vshrl.u32 %v8734_v57, 16  ;;  %v499_v6 = vsel %vm8412_vm2, %v494_v48, %v498_v10  ;;  %v8771_v48 = vld [vmem:[%s8378_s18 + $0x74] sm:$0x1] }
  0x61   : > { %v509_v9 = vsel %vm8412_vm2, %v504_v50, %v508_v5  ;;  %v1062_v19 = vor.u32 %v1061_v55, %v1058_v28  ;;  %v514_v21 = vshll.u32 %v8734_v57, 16  ;;  %v520_v41 = vshll.u32 %v8745_v27, 16  ;;  %10891 = vst [vmem:[#allocation6_spill] sm:$0xff] %v8771_v48 }
  0x62   : > { %1620 = vmatmul.mubr.bf16.gmra.mrb[24].mxu0 %v6514_v26  ;;  %v6452_v18 = vcombine.low %v499_v6, %v509_v9  ;;  %v1072_v37 = vor.u32 %v1071_v0, %v1067_v63  ;;  %v513_v17 = vrot.slane %v511_v4, 4  ;;  %v524_v54 = vshrl.u32 %v8745_v27, 16  ;;  %v8777_v0 = vld [vmem:[%s8378_s18 + $0x60] sm:$0xf] }
  0x63   : > { %v1063_v24 = vrot.slane %v1062_v19, 4  ;;  %v516_v26 = vrot.slane %v514_v21, 5  ;;  %v530_v10 = vshll.u32 %v8751_v40, 16  ;;  %v522_v28 = vrot.slane %v520_v41, 5  ;;  %10892 = vst [vmem:[#allocation7_spill] sm:$0xff] %v8777_v0 }
  0x64   : > { %1989 = vmatprep.mubr.bf16.mxu1 %v6452_v18  ;;  %v1073_v5 = vrot.slane %v1072_v37, 4  ;;  %v6443_v50 = vcombine.low %v8734_v57, %v8745_v27  ;;  %v1080_v55 = vshrl.u32 %v8756_v62, 16  ;;  %v526_v9 = vrot.slane %v524_v54, 4  ;;  %v8782_v21 = vld [vmem:[%s8378_s18 + $0x64] sm:$0xf] }
  0x65   : > { %v1068_v4 = vsel %vm8412_vm2, %v1063_v24, %v1067_v63  ;;  %v517_v6 = vor.u32 %v516_v26, %v513_v17  ;;  %v532_v19 = vrot.slane %v530_v10, 5  ;;  %10893 = vst [vmem:[#allocation8_spill] sm:$0xff] %v8782_v21  ;;  %v1083_v41 = vshll.u32 %v8756_v62, 16 }
  0x66   : > { %1990 = vmatmul.mubr.bf16.gmra.mrb[24].mxu1 %v6442_v16  ;;  %v1078_v18 = vsel %vm8412_vm2, %v1073_v5, %v1077_v36  ;;  %v1082_v37 = vrot.slane %v1080_v55, 4  ;;  %v1089_v60 = vshll.u32 %v8765_v23, 16  ;;  %v527_v46 = vor.u32 %v526_v9, %v522_v28  ;;  %v8793_v36 = vld [vmem:[%s8378_s18 + $0x68] sm:$0x1] }
  0x67   : > { %v6525_v25 = vcombine.low %v1068_v4, %v1078_v18  ;;  %v518_v16 = vrot.slane %v517_v6, 4  ;;  %v1093_v63 = vshrl.u32 %v8765_v23, 16  ;;  %v1085_v17 = vrot.slane %v1083_v41, 5  ;;  %10894 = vst [vmem:[#allocation9_spill] sm:$0xff] %v8793_v36  ;;  %v8799_v6 = vld [vmem:[%s8378_s18 + $0x78] sm:$0xf] }
  0x68   : > { %v1091_v54 = vrot.slane %v1089_v60, 5  ;;  %v1099_v24 = vshll.u32 %v8771_v48, 16  ;;  %v6516_v26 = vcombine.low %v8756_v62, %v8765_v23  ;;  %v528_v5 = vrot.slane %v527_v46, 4  ;;  %v8804_v48 = vld [vmem:[%s8378_s18 + $0x7c] sm:$0xf] }
  0x69   : > { %1627 = vmatprep.mubr.bf16.mxu0 %v6525_v25  ;;  %v523_v10 = vsel %vm8412_vm2, %v518_v16, %v522_v28  ;;  %v1095_v55 = vrot.slane %v1093_v63, 4  ;;  %v535_v4 = vshrl.u32 %v8777_v0, 16  ;;  %v1086_v60 = vor.u32 %v1085_v17, %v1082_v37  ;;  %v8810_v37 = vld [vmem:[%s8378_s18 + $0x80] sm:$0x1] }
  0x6a   : > { %1628 = vmatmul.mubr.bf16.gmra.mrb[28].mxu0 %v6515_v56  ;;  %v1101_v9 = vrot.slane %v1099_v24, 5  ;;  %v538_v18 = vshll.u32 %v8777_v0, 16  ;;  %v544_v41 = vshll.u32 %v8782_v21, 16  ;;  %v533_v25 = vsel %vm8412_vm2, %v528_v5, %v532_v19  ;;  %v8816_v5 = vld [vmem:[%s8378_s18 + $0x6c] sm:$0xf] }
  0x6b   : > { %v1096_v46 = vor.u32 %v1095_v55, %v1091_v54  ;;  %v537_v28 = vrot.slane %v535_v4, 4  ;;  %v548_v16 = vshrl.u32 %v8782_v21, 16  ;;  %v6453_v63 = vcombine.low %v523_v10, %v533_v25  ;;  %10895 = vst [vmem:[#allocation10_spill] sm:$0xff] %v8816_v5 }
  0x6c   : > { %v1087_v23 = vrot.slane %v1086_v60, 4  ;;  %v540_v62 = vrot.slane %v538_v18, 5  ;;  %v546_v56 = vrot.slane %v544_v41, 5  ;;  %v554_v40 = vshll.u32 %v8793_v36, 16 }
  0x6d   : > { %v1097_v17 = vrot.slane %v1096_v46, 4  ;;  %v550_v24 = vrot.slane %v548_v16, 4  ;;  %v6444_v19 = vcombine.low %v8777_v0, %v8782_v21  ;;  %1997 = vmatprep.mubr.bf16.mxu1 %v6453_v63  ;;  %v1104_v4 = vshrl.u32 %v8799_v6, 16  ;;  %v8826_v16 = vld [vmem:[%s8378_s18 + $0x70] sm:$0xf] }
  0x6e   : > { %v1092_v10 = vsel %vm8412_vm2, %v1087_v23, %v1091_v54  ;;  %v541_v55 = vor.u32 %v540_v62, %v537_v28  ;;  %v1107_v60 = vshll.u32 %v8799_v6, 16  ;;  %1998 = vmatmul.mubr.bf16.gmra.mrb[28].mxu1 %v6443_v50  ;;  %v556_v25 = vrot.slane %v554_v40, 5  ;;  %10896 = vst [vmem:[#allocation11_spill] sm:$0xff] %v8826_v16  ;;  %v8829_v23 = vld [vmem:[%s8378_s18 + $0x74] sm:$0x1] }
  0x6f   : > { %v1102_v18 = vsel %vm8412_vm2, %v1097_v17, %v1101_v9  ;;  %v551_v41 = vor.u32 %v550_v24, %v546_v56  ;;  %v1113_v46 = vshll.u32 %v8804_v48, 16  ;;  %v1106_v21 = vrot.slane %v1104_v4, 4  ;;  %10897 = vst [vmem:[#allocation12_spill] sm:$0xff] %v8829_v23 }
  0x70   : > { %v6526_v36 = vcombine.low %v1092_v10, %v1102_v18  ;;  %v542_v63 = vrot.slane %v541_v55, 4  ;;  %v1109_v0 = vrot.slane %v1107_v60, 5  ;;  %v1117_v28 = vshrl.u32 %v8804_v48, 16 }
  0x71   : > { %v552_v62 = vrot.slane %v551_v41, 4  ;;  %v1115_v54 = vrot.slane %v1113_v46, 5  ;;  %v1123_v50 = vshll.u32 %v8810_v37, 16  ;;  %v6517_v17 = vcombine.low %v8799_v6, %v8804_v48 }
  0x72   : > { %1635 = vmatprep.mubr.bf16.mxu0 %v6526_v36  ;;  %v547_v40 = vsel %vm8412_vm2, %v542_v63, %v546_v56  ;;  %v1110_v9 = vor.u32 %v1109_v0, %v1106_v21  ;;  %v559_v24 = vshrl.u32 %v8816_v5, 16  ;;  %v1119_v55 = vrot.slane %v1117_v28, 4  ;;  %v8053_v28 = vld [vmem:[%s8378_s18 + $0xc] sm:$0xf] }
  0x73   : > { %1636 = vmatmul.mubr.bf16.gmra.mrb[32].mxu0 %v6516_v26  ;;  %v557_v10 = vsel %vm8412_vm2, %v552_v62, %v556_v25  ;;  %v1125_v4 = vrot.slane %v1123_v50, 5  ;;  %v562_v60 = vshll.u32 %v8816_v5, 16  ;;  %v568_v56 = vshll.u32 %v8826_v16, 16 }
  0x74   : > { %v6454_v18 = vcombine.low %v547_v40, %v557_v10  ;;  %v1111_v36 = vrot.slane %v1110_v9, 4  ;;  %v561_v41 = vrot.slane %v559_v24, 4  ;;  %v1120_v0 = vor.u32 %v1119_v55, %v1115_v54 }
  0x75   : > { %v564_v21 = vrot.slane %v562_v60, 5  ;;  %v572_v46 = vshrl.u32 %v8826_v16, 16  ;;  %v578_v26 = vshll.u32 %v8829_v23, 16  ;;  %v570_v63 = vrot.slane %v568_v56, 5  ;;  %v8056_v56 = vld [vmem:[%s8378_s18 + $0x1c] sm:$0xf] }
  0x76   : > { %2005 = vmatprep.mubr.bf16.mxu1 %v6454_v18  ;;  %v1116_v25 = vsel %vm8412_vm2, %v1111_v36, %v1115_v54  ;;  %v6445_v62 = vcombine.low %v8816_v5, %v8826_v16  ;;  %v6498_v50 = vrot.slane %v8053_v28, 9  ;;  %v1121_v40 = vrot.slane %v1120_v0, 4  ;;  %v8054_v54 = vld [vmem:[%s8378_s18 + $0x10] sm:$0xf]  ;;  %v8055_v18 = vld [vmem:[%s8378_s18 + $0x18] sm:$0xf] }
  0x77   : > { %2006 = vmatmul.mubr.bf16.gmra.mrb[32].mxu1 %v6444_v19  ;;  %v565_v9 = vor.u32 %v564_v21, %v561_v41  ;;  %v574_v24 = vrot.slane %v572_v46, 4  ;;  %v580_v10 = vrot.slane %v578_v26, 5  ;;  %v1159_v60 = vrot.slane %v8054_v54, 5  ;;  %v8057_v16 = vld [vmem:[%s8378_s18] sm:$0xf] }
  0x78   : > { %v6499_v36 = vrot.slane %v8055_v18, 9  ;;  %v1166_v23 = vrot.slane %v8056_v56, 5  ;;  %v6426_v28 = vrot.slane %v8057_v16, 9  ;;  %v1126_v19 = vsel %vm8412_vm2, %v1121_v40, %v1125_v4  ;;  %v8058_v21 = vld [vmem:[%s8378_s18 + $0x4] sm:$0xf] }
  0x79   : > { %v566_v41 = vrot.slane %v565_v9, 4  ;;  %v575_v0 = vor.u32 %v574_v24, %v570_v63  ;;  %v617_v46 = vrot.slane %v8058_v21, 5  ;;  %v6527_v26 = vcombine.low %v1116_v25, %v1126_v19  ;;  %v8059_v24 = vld [vmem:[%s8378_s18 + $0xc] sm:$0xf] }
  0x7a   : > { %v1160_v5 = vsel %vm8851_vm5, %v6498_v50, %v1159_v60  ;;  %v1161_v54 = vrot.slane %v1159_v60, 4  ;;  %v1167_v18 = vsel %vm8851_vm5, %v6499_v36, %v1166_v23  ;;  %v1168_v4 = vrot.slane %v1166_v23, 4  ;;  %v8060_v36 = vld [vmem:[%s8378_s18 + $0x10] sm:$0xf] }
  0x7b   : > { %v571_v16 = vsel %vm8412_vm2, %v566_v41, %v570_v63  ;;  %v576_v56 = vrot.slane %v575_v0, 4  ;;  %v618_v40 = vsel %vm8851_vm5, %v6426_v28, %v617_v46  ;;  %1643 = vmatprep.mubr.bf16.mxu0 %v6527_v26  ;;  %v10900_v9 = vrot.slane %v8391_v33, 5  ;;  %v8061_v41 = vld [vmem:[%s8378_s18 + $0x24] sm:$0xf] }
  0x7c   : > { %v619_v50 = vrot.slane %v617_v46, 4  ;;  %v6427_v60 = vrot.slane %v8059_v24, 9  ;;  %v624_v19 = vrot.slane %v8060_v36, 5  ;;  %1644 = vmatmul.mubr.bf16.gmra.mrb[36].mxu0 %v6517_v17  ;;  %v10901_v28 = vrot.slane %v8436_v7, 5 }
  0x7d   : > { %v1163_v25 = vsel %vm8851_vm5, %v1161_v54, %v10900_v9  ;;  %v581_v23 = vsel %vm8412_vm2, %v576_v56, %v580_v10  ;;  %v6500_v0 = vrot.slane %v8061_v41, 9  ;;  %v10902_v26 = vrot.slane %v8417_v53, 5  ;;  %v8062_v10 = vld [vmem:[%s8378_s18 + $0x28] sm:$0xf] }
  0x7e   : > { %v6528_v63 = vcombine.low %v1160_v5, %v1163_v25  ;;  %v1170_v33 = vsel %vm8851_vm5, %v1168_v4, %v10901_v28  ;;  %v6455_v21 = vcombine.low %v571_v16, %v581_v23  ;;  %v625_v17 = vsel %vm8851_vm5, %v6427_v60, %v624_v19  ;;  %v8063_v4 = vld [vmem:[%s8378_s18 + $0x2c] sm:$0x1]  ;;  %v8064_v25 = vld [vmem:[%s8378_s18 + $0x18] sm:$0xf] }
  0x7f   : > { %v6529_v46 = vcombine.low %v1167_v18, %v1170_v33  ;;  %v621_v54 = vsel %vm8851_vm5, %v619_v50, %v10902_v26  ;;  %v626_v7 = vrot.slane %v624_v19, 4  ;;  %v1173_v56 = vrot.slane %v8062_v10, 5  ;;  %v8065_v19 = vld [vmem:[%s8378_s18 + $0x1c] sm:$0xf]  ;;  %v8021_v28 = vld [vmem:[%s10869_s1 + $0x1c8] sm:$0xff]  }
  0x80   : > { %7540 = vmatprep.mubr.bf16.mxu0 %v6528_v63  ;;  %v6456_v5 = vcombine.low %v618_v40, %v621_v54  ;;  %v1176_v9 = vrot.slane %v8063_v4, 5  ;;  %2013 = vmatprep.mubr.bf16.mxu1 %v6455_v21  ;;  %v6501_v16 = vrot.slane %v8520_v30, 9  ;;  %v1180_v53 = vrot.slane %v8526_v39, 5  ;;  %v8020_v30 = vld [vmem:[%s10869_s1 + $0x180] sm:$0xff]  }
  0x81   : > { %v1183_v18 = vrot.slane %v8531_v45, 5  ;;  %v6428_v50 = vrot.slane %v8064_v25, 9  ;;  %2014 = vmatmul.mubr.bf16.gmra.mrb[36].mxu1 %v6445_v62  ;;  %v10903_v24 = vrot.slane %v8460_v31, 5  ;;  %v1174_v60 = vsel %vm8851_vm5, %v6500_v0, %v1173_v56  ;;  %v8066_v31 = vld [vmem:[%s8378_s18 + $0x20] sm:$0x1] }
  0x82   : > { %v1175_v36 = vrot.slane %v1173_v56, 4  ;;  %v631_v23 = vrot.slane %v8065_v19, 5  ;;  %7576 = vmatprep.mubr.bf16.mxu1 %v6456_v5  ;;  %v1181_v45 = vsel %vm8851_vm5, %v6501_v16, %v1180_v53  ;;  %v1182_v62 = vrot.slane %v1180_v53, 4 }
  0x83   : > { %v628_v40 = vsel %vm8851_vm5, %v626_v7, %v10903_v24  ;;  %v634_v63 = vrot.slane %v8066_v31, 5  ;;  %v6429_v21 = vrot.slane %v8537_v52, 9  ;;  %v641_v5 = vrot.slane %v8555_v8, 5  ;;  %v8022_v52 = vld [vmem:[%s10869_s1 + $0x188] sm:$0xff]  }
  0x84   : > { %v6457_v39 = vcombine.low %v625_v17, %v628_v40  ;;  %v1177_v33 = vsel %vm8851_vm5, %v1175_v36, %v1176_v9  ;;  %v632_v41 = vsel %vm8851_vm5, %v6428_v50, %v631_v23  ;;  %v633_v0 = vrot.slane %v631_v23, 4  ;;  %7541 = vmatmul.mubr.bf16.vlgmr.msra.gmra.mrb[40].mxu0 %v6529_v46 }
  0x85   : > { %v6530_v26 = vcombine.low %v1174_v60, %v1177_v33  ;;  %v1184_v54 = vsel %vm8851_vm5, %v1182_v62, %v1183_v18  ;;  %v638_v17 = vrot.slane %v8547_v61, 5  ;;  %v6502_v56 = vrot.slane %v8563_v13, 9  ;;  %7191 = vmatpush3.bf16.msra.mxu0 %v8020_v30  ;;  %v8023_v13 = vld [vmem:[%s10869_s1 + $0x1d0] sm:$0xff]   ;;  %v8027_v30 = vld [vmem:[%s10869_s1 + $0x1d8] sm:$0xff]  }
  0x86   : > { %v6531_v7 = vcombine.low %v1181_v45, %v1184_v54  ;;  %v635_v10 = vsel %vm8851_vm5, %v633_v0, %v634_v63  ;;  %v1187_v4 = vrot.slane %v8578_v14, 5  ;;  %v1190_v46 = vrot.slane %v8583_v32, 5  ;;  %7192 = vmatprep.subr.bf16.mxu0 %v8021_v28  ;;  %v8026_v32 = vld [vmem:[%s10869_s1 + $0x208] sm:$0xff]   ;;  %v8028_v0 = vld [vmem:[%s10869_s1 + $0x198] sm:$0xff]  }
  0x87   : > { %7544 = vmatprep.mubr.bf16.mxu0 %v6530_v26  ;;  %v6458_v9 = vcombine.low %v632_v41, %v635_v10  ;;  %v8929_v61 = vsel %vm8851_vm5, %v6429_v21, %v638_v17  ;;  %v640_v8 = vrot.slane %v638_v17, 4  ;;  %v6503_v53 = vrot.slane %v8626_v22, 9 }
  0x88   : > { %v1188_v14 = vsel %vm8851_vm5, %v6502_v56, %v1187_v4  ;;  %v1189_v16 = vrot.slane %v1187_v4, 4  ;;  %v1194_v18 = vrot.slane %v8629_v11, 5  ;;  %v1197_v50 = vrot.slane %v8632_v43, 5  ;;  %v8025_v43 = vld [vmem:[%s10869_s1 + $0x190] sm:$0xff]  }
  0x89   : > { %v642_v25 = vsel %vm8851_vm5, %v640_v8, %v641_v5  ;;  %v6430_v24 = vrot.slane %v8592_v42, 9  ;;  %v645_v40 = vrot.slane %v8595_v47, 5  ;;  %7577 = vmatmul.mubr.bf16.vlgmr.msra.gmra.mrb[40].mxu1 %v6457_v39  ;;  %7193 = vmatpush3.bf16.msra.mxu0 %v8022_v52  ;;  %v648_v23 = vrot.slane %v8618_v15, 5  ;;  %v8031_v52 = vld [vmem:[%s10869_s1 + $0x1a0] sm:$0xff]  }
  0x8a   : > { %v6459_v60 = vcombine.low %v8929_v61, %v642_v25  ;;  %v1191_v22 = vsel %vm8851_vm5, %v1189_v16, %v1190_v46  ;;  %v8952_v11 = vsel %vm8851_vm5, %v6503_v53, %v1194_v18  ;;  %v1196_v36 = vrot.slane %v1194_v18, 4  ;;  %7580 = vmatprep.mubr.bf16.mxu1 %v6458_v9  ;;  %7194 = vmatprep.subr.bf16.mxu0 %v8023_v13  ;;  %v8033_v13 = vld [vmem:[%s10869_s1 + $0x1e8] sm:$0xff]   ;;  %v10905_v53 = vld [vmem:[#allocation4_spill] sm:$0xff] }
  0x8b   : > { %v6532_v42 = vcombine.low %v1188_v14, %v1191_v22  ;;  %v646_v47 = vsel %vm8851_vm5, %v6430_v24, %v645_v40  ;;  %v647_v19 = vrot.slane %v645_v40, 4  ;;  %7597 = vmatpush3.bf16.msra.mxu1 %v8682_v1  ;;  %v6431_v45 = vrot.slane %v8641_v38, 9  ;;  %v8029_v1 = vld [vmem:[%s10869_s1 + $0x210] sm:$0xff]   ;;  %v10904_v14 = vld [vmem:[#allocation3_spill] sm:$0xff]  ;;  %v10906_v25 = vld [vmem:[#allocation5_spill] sm:$0xff] }
  0x8c   : > { %v1198_v39 = vsel %vm8851_vm5, %v1196_v36, %v1197_v50  ;;  %v652_v62 = vrot.slane %v8657_v58, 5  ;;  %v655_v31 = vrot.slane %v8666_v12, 5  ;;  %7598 = vmatprep.subr.bf16.mxu1 %v8026_v32  ;;  %v6504_v28 = vrot.slane %v8676_v20, 9  ;;  %7545 = vmatmul.mubr.bf16.gmra.mrb[44].mxu0 %v6531_v7  ;;  %v8035_v50 = vld [vmem:[%s10869_s1 + $0x220] sm:$0xff]   ;;  %v10907_v24 = vld [vmem:[#allocation6_spill] sm:$0xff] }
  0x8d   : > { %v6533_v63 = vcombine.low %v8952_v11, %v1198_v39  ;;  %v649_v15 = vsel %vm8851_vm5, %v647_v19, %v648_v23  ;;  %v1201_v33 = vrot.slane %v8687_v35, 5  ;;  %v1204_v41 = vrot.slane %v8694_v49, 5  ;;  %7195 = vmatpush3.bf16.msra.mxu0 %v8025_v43  ;;  %7548 = vmatprep.mubr.bf16.mxu0 %v6532_v42  ;;  %v8030_v49 = vld [vmem:[%s10869_s1 + $0x1e0] sm:$0xff]   ;;  %v8034_v42 = vld [vmem:[%s10869_s1 + $0x1a8] sm:$0xff]   ;;  %v10908_v19 = vld [vmem:[#allocation7_spill] sm:$0xff] }
  0x8e   : > { %v6460_v38 = vcombine.low %v646_v47, %v649_v15  ;;  %v8979_v58 = vsel %vm8851_vm5, %v6431_v45, %v652_v62  ;;  %v654_v12 = vrot.slane %v652_v62, 4  ;;  %v6505_v35 = vrot.slane %v8720_v34, 9  ;;  %7196 = vmatprep.subr.bf16.mxu0 %v8027_v30  ;;  %v8032_v34 = vld [vmem:[%s10869_s1 + $0x218] sm:$0xff]   ;;  %v10909_v30 = vld [vmem:[#allocation8_spill] sm:$0xff]  ;;  %v8036_v45 = vld [vmem:[%s10869_s1 + $0x1f0] sm:$0xff]  }
  0x8f   : > { %v1202_v20 = vsel %vm8851_vm5, %v6504_v28, %v1201_v33  ;;  %v1203_v21 = vrot.slane %v1201_v33, 4  ;;  %v1208_v26 = vrot.slane %v8728_v44, 5  ;;  %7599 = vmatpush3.bf16.msra.mxu1 %v8026_v32  ;;  %v1211_v17 = vrot.slane %v8731_v2, 5  ;;  %v10910_v33 = vld [vmem:[#allocation9_spill] sm:$0xff] }
  0x90   : > { %v656_v54 = vsel %vm8851_vm5, %v654_v12, %v655_v31  ;;  %v6432_v5 = vrot.slane %v8699_v59, 9  ;;  %v659_v7 = vrot.slane %v8705_v3, 5  ;;  %7600 = vmatprep.subr.bf16.mxu1 %v8029_v1  ;;  %v662_v3 = vrot.slane %v8708_v29, 5  ;;  %v9057_v31 = vld [vmem:[%s8378_s18 + $0x18] sm:$0xf] }
  0x91   : > { %v6461_v10 = vcombine.low %v8979_v58, %v656_v54  ;;  %v1205_v44 = vsel %vm8851_vm5, %v1203_v21, %v1204_v41  ;;  %v1210_v56 = vrot.slane %v1208_v26, 4  ;;  %7581 = vmatmul.mubr.bf16.gmra.mrb[44].mxu1 %v6459_v60  ;;  %v9005_v2 = vsel %vm8851_vm5, %v6505_v35, %v1208_v26  ;;  %7197 = vmatpush3.bf16.msra.mxu0 %v8028_v0  ;;  %v9068_v58 = vld [vmem:[%s8378_s18 + $0x1c] sm:$0xf]  ;;  %v10911_v41 = vld [vmem:[#allocation10_spill] sm:$0xff]  ;;  %v10913_v35 = vld [vmem:[#allocation12_spill] sm:$0xff] }
  0x92   : > { %v6534_v4 = vcombine.low %v1202_v20, %v1205_v44  ;;  %v661_v59 = vrot.slane %v659_v7, 4  ;;  %7584 = vmatprep.mubr.bf16.mxu1 %v6460_v38  ;;  %v660_v61 = vsel %vm8851_vm5, %v6432_v5, %v659_v7  ;;  %v6433_v8 = vrot.slane %v8734_v57, 9  ;;  %7198 = vmatprep.subr.bf16.mxu0 %v8030_v49  ;;  %v10912_v20 = vld [vmem:[#allocation11_spill] sm:$0xff]  ;;  %v9078_v54 = vld [vmem:[%s8378_s18 + $0x20] sm:$0x1]  ;;  %v8038_v49 = vld [vmem:[%s10869_s1 + $0x1b0] sm:$0xff]  }
  0x93   : > { %v9013_v9 = vsel %vm8851_vm5, %v1210_v56, %v1211_v17  ;;  %v666_v46 = vrot.slane %v8745_v27, 5  ;;  %7601 = vmatpush3.bf16.msra.mxu1 %v8029_v1  ;;  %v669_v16 = vrot.slane %v10904_v14, 5  ;;  %v6506_v18 = vrot.slane %v10905_v53, 9  ;;  %v6593_v53 = vld [vmem:[%s8378_s18 + $0x2c] sm:$0x1] }
  0x94   : > { %v663_v29 = vsel %vm8851_vm5, %v661_v59, %v662_v3  ;;  %v1215_v32 = vrot.slane %v10906_v25, 5  ;;  %7602 = vmatprep.subr.bf16.mxu1 %v8032_v34  ;;  %v6535_v57 = vcombine.low %v9005_v2, %v9013_v9  ;;  %v1218_v40 = vrot.slane %v10907_v24, 5  ;;  %7549 = vmatmul.mubr.bf16.gmra.mrb[48].mxu0 %v6533_v63  ;;  %v8037_v63 = vld [vmem:[%s10869_s1 + $0x228] sm:$0xff]   ;;  %v8040_v2 = vld [vmem:[%s10869_s1 + $0x1f8] sm:$0xff]   ;;  %v9101_v3 = vld [vmem:[%s8378_s18 + $0x24] sm:$0xf] }
  0x95   : > { %v668_v27 = vrot.slane %v666_v46, 4  ;;  %v6507_v11 = vrot.slane %v8799_v6, 9  ;;  %v1222_v36 = vrot.slane %v8804_v48, 5  ;;  %7199 = vmatpush3.bf16.msra.mxu0 %v8031_v52  ;;  %7552 = vmatprep.mubr.bf16.mxu0 %v6534_v4  ;;  %v6462_v43 = vcombine.low %v660_v61, %v663_v29  ;;  %v8039_v4 = vld [vmem:[%s10869_s1 + $0x230] sm:$0xff]  }
  0x96   : > { %v1216_v60 = vsel %vm8851_vm5, %v6506_v18, %v1215_v32  ;;  %v1217_v22 = vrot.slane %v1215_v32, 4  ;;  %v1225_v47 = vrot.slane %v8810_v37, 5  ;;  %v6434_v23 = vrot.slane %v10908_v19, 9  ;;  %7200 = vmatprep.subr.bf16.mxu0 %v8033_v13  ;;  %v8041_v18 = vld [vmem:[%s10869_s1 + $0x1b8] sm:$0xff]  }
  0x97   : > { %v673_v39 = vrot.slane %v10909_v30, 5  ;;  %7603 = vmatpush3.bf16.msra.mxu1 %v8032_v34  ;;  %v9045_v6 = vsel %vm8851_vm5, %v6433_v8, %v666_v46  ;;  %v9049_v48 = vsel %vm8851_vm5, %v668_v27, %v669_v16  ;;  %v1224_v62 = vrot.slane %v1222_v36, 4  ;;  %v9106_v46 = vld [vmem:[%s8378_s18 + $0x28] sm:$0xf] }
  0x98   : > { %v1219_v37 = vsel %vm8851_vm5, %v1217_v22, %v1218_v40  ;;  %7604 = vmatprep.subr.bf16.mxu1 %v8035_v50  ;;  %v9064_v1 = vsel %vm8851_vm5, %v6507_v11, %v1222_v36  ;;  %v676_v38 = vrot.slane %v10910_v33, 5  ;;  %v6435_v0 = vrot.slane %v10911_v41, 9  ;;  %v8042_v22 = vld [vmem:[%s10869_s1 + $0x238] sm:$0xff]  }
  0x99   : > { %v6536_v15 = vcombine.low %v1216_v60, %v1219_v37  ;;  %v675_v28 = vrot.slane %v673_v39, 4  ;;  %7585 = vmatmul.mubr.bf16.gmra.mrb[48].mxu1 %v6461_v10  ;;  %v9072_v12 = vsel %vm8851_vm5, %v1224_v62, %v1225_v47  ;;  %v680_v21 = vrot.slane %v10912_v20, 5  ;;  %7201 = vmatpush3.bf16.msra.mxu0 %v8034_v42  ;;  %v9160_v20 = vld [vmem:[%s8378_s18 + $0x3c] sm:$0xf] }
  0x9a   : > { %v683_v26 = vrot.slane %v10913_v35, 5  ;;  %7588 = vmatprep.mubr.bf16.mxu1 %v6462_v43  ;;  %v674_v17 = vsel %vm8851_vm5, %v6434_v23, %v673_v39  ;;  %v2170_v7 = vshrl.u32 %v9057_v31, 16  ;;  %v2173_v10 = vshll.u32 %v9057_v31, 16  ;;  %7202 = vmatprep.subr.bf16.mxu0 %v8036_v45 }
  0x9b   : > { %v677_v5 = vsel %vm8851_vm5, %v675_v28, %v676_v38  ;;  %v6463_v34 = vcombine.low %v9045_v6, %v9049_v48  ;;  %7605 = vmatpush3.bf16.msra.mxu1 %v8035_v50  ;;  %v6537_v44 = vcombine.low %v9064_v1, %v9072_v12  ;;  %v682_v56 = vrot.slane %v680_v21, 4  ;;  %v9143_v1 = vld [vmem:[%s8378_s18 + $0x30] sm:$0xf]  ;;  %v9146_v28 = vld [vmem:[%s8378_s18 + $0x34] sm:$0xf] }
  0x9c   : > { %v2179_v59 = vshll.u32 %v9068_v58, 16  ;;  %7606 = vmatprep.subr.bf16.mxu1 %v8037_v63  ;;  %v2172_v52 = vrot.slane %v2170_v7, 4  ;;  %v2175_v9 = vrot.slane %v2173_v10, 5  ;;  %v2183_v61 = vshrl.u32 %v9068_v58, 16  ;;  %7553 = vmatmul.mubr.bf16.gmra.mrb[52].mxu0 %v6535_v57 }
  0x9d   : > { %v2189_v8 = vshll.u32 %v9078_v54, 16  ;;  %v6464_v29 = vcombine.low %v674_v17, %v677_v5  ;;  %v9110_v13 = vsel %vm8851_vm5, %v6435_v0, %v680_v21  ;;  %v9114_v14 = vsel %vm8851_vm5, %v682_v56, %v683_v26  ;;  %7556 = vmatprep.mubr.bf16.mxu0 %v6536_v15  ;;  %7203 = vmatpush3.bf16.msra.mxu0 %v8038_v49  ;;  %v6596_v0 = vld [vmem:[%s8378_s18 + $0x38] sm:$0x1]  ;;  %v9163_v49 = vld [vmem:[%s8378_s18 + $0x40] sm:$0xf] }
  0x9e   : > { %v2181_v16 = vrot.slane %v2179_v59, 5  ;;  %v2176_v25 = vor.u32 %v2175_v9, %v2172_v52  ;;  %v2185_v32 = vrot.slane %v2183_v61, 4  ;;  %v6618_v27 = vrot.slane %v9057_v31, 9  ;;  %7204 = vmatprep.subr.bf16.mxu0 %v8040_v2 }
  0x9f   : > { %v2191_v57 = vrot.slane %v2189_v8, 5  ;;  %7607 = vmatpush3.bf16.msra.mxu1 %v8037_v63  ;;  %v2441_v50 = vrot.slane %v9068_v58, 5  ;;  %v2444_v24 = vrot.slane %v9078_v54, 5  ;;  %v6619_v40 = vrot.slane %v9101_v3, 9 }
  0xa0   : > { %v2448_v60 = vrot.slane %v9106_v46, 5  ;;  %7608 = vmatprep.subr.bf16.mxu1 %v8039_v4  ;;  %v2177_v11 = vrot.slane %v2176_v25, 4  ;;  %v2186_v36 = vor.u32 %v2185_v32, %v2181_v16  ;;  %v2451_v43 = vrot.slane %v6593_v53, 5 }
  0xa1   : > { %v2194_v42 = vshrl.u32 %v9101_v3, 16  ;;  %7589 = vmatmul.mubr.bf16.gmra.mrb[52].mxu1 %v6463_v34  ;;  %v6465_v47 = vcombine.low %v9110_v13, %v9114_v14  ;;  %v6628_v19 = vcombine.low %v9057_v31, %v9068_v58  ;;  %v2443_v23 = vrot.slane %v2441_v50, 4  ;;  %7205 = vmatpush3.bf16.msra.mxu0 %v8041_v18  ;;  %v9168_v34 = vld [vmem:[%s8378_s18 + $0x44] sm:$0x1] }
  0xa2   : > { %v2450_v30 = vrot.slane %v2448_v60, 4  ;;  %7592 = vmatprep.mubr.bf16.mxu1 %v6464_v29  ;;  %v2182_v39 = vsel %vm8412_vm2, %v2177_v11, %v2181_v16  ;;  %v2187_v6 = vrot.slane %v2186_v36, 4  ;;  %v2197_v45 = vshll.u32 %v9101_v3, 16 }
  0xa3   : > { %v2196_v48 = vrot.slane %v2194_v42, 4  ;;  %7609 = vmatpush3.bf16.msra.mxu1 %v8039_v4  ;;  %v2442_v37 = vsel %vm8851_vm5, %v6618_v27, %v2441_v50  ;;  %v2445_v62 = vsel %vm8851_vm5, %v2443_v23, %v2444_v24  ;;  %v2203_v63 = vshll.u32 %v9106_v46, 16  ;;  %v9190_v24 = vld [vmem:[%s8378_s18 + $0x48] sm:$0xf]  ;;  %v9205_v42 = vld [vmem:[%s8378_s18 + $0x54] sm:$0xf] }
  0xa4   : > { %v2207_v15 = vshrl.u32 %v9106_v46, 16  ;;  %7610 = vmatprep.subr.bf16.mxu1 %v8042_v22  ;;  %v2192_v33 = vsel %vm8412_vm2, %v2187_v6, %v2191_v57  ;;  %v9152_v38 = vsel %vm8851_vm5, %v6619_v40, %v2448_v60  ;;  %v9156_v12 = vsel %vm8851_vm5, %v2450_v30, %v2451_v43  ;;  %7557 = vmatmul.mubr.bf16.gmra.mrb[56].mxu0 %v6537_v44  ;;  %v9193_v40 = vld [vmem:[%s8378_s18 + $0x4c] sm:$0xf]  ;;  %v9202_v43 = vld [vmem:[%s8378_s18 + $0x50] sm:$0x1] }
  0xa5   : > { %v2199_v41 = vrot.slane %v2197_v45, 5  ;;  %v6638_v21 = vcombine.low %v2182_v39, %v2192_v33  ;;  %v2205_v35 = vrot.slane %v2203_v63, 5  ;;  %v2213_v54 = vshll.u32 %v6593_v53, 16  ;;  %v9213_v6 = vld [vmem:[%s8378_s18 + $0x58] sm:$0xf] }
  0xa6   : > { %v2209_v26 = vrot.slane %v2207_v15, 4  ;;  %v6648_v17 = vcombine.low %v2442_v37, %v2445_v62  ;;  %v6620_v7 = vrot.slane %v9143_v1, 9  ;;  %v2455_v10 = vrot.slane %v9146_v28, 5  ;;  %v9218_v63 = vld [vmem:[%s8378_s18 + $0x5c] sm:$0x1] }
  0xa7   : > { %v2200_v5 = vor.u32 %v2199_v41, %v2196_v48  ;;  %2853 = vmatprep.mubr.bf16.mxu0 %v6638_v21  ;;  %7611 = vmatpush3.bf16.msra.mxu1 %v8042_v22  ;;  %v2215_v4 = vrot.slane %v2213_v54, 5  ;;  %v2458_v2 = vrot.slane %v6596_v0, 5  ;;  %v6621_v44 = vrot.slane %v9160_v20, 9 }
  0xa8   : > { %v2210_v56 = vor.u32 %v2209_v26, %v2205_v35  ;;  %v6649_v59 = vcombine.low %v9152_v38, %v9156_v12  ;;  %v2457_v9 = vrot.slane %v2455_v10, 4  ;;  %v2462_v61 = vrot.slane %v9163_v49, 5 }
  0xa9   : > { %v2201_v52 = vrot.slane %v2200_v5, 4  ;;  %7593 = vmatmul.mubr.bf16.gmra.mrb[56].mxu1 %v6465_v47  ;;  %v2465_v29 = vrot.slane %v9168_v34, 5  ;;  %v2218_v13 = vshrl.u32 %v9143_v1, 16  ;;  %v2221_v14 = vshll.u32 %v9143_v1, 16 }
  0xaa   : > { %v2211_v8 = vrot.slane %v2210_v56, 4  ;;  %7612 = vmatprep.mubr.bf16.mxu1 %v6648_v17  ;;  %v2456_v53 = vsel %vm8851_vm5, %v6620_v7, %v2455_v10  ;;  %v2459_v18 = vsel %vm8851_vm5, %v2457_v9, %v2458_v2  ;;  %v2464_v25 = vrot.slane %v2462_v61, 4  ;;  %v9251_v9 = vld [vmem:[%s8378_s18 + $0x64] sm:$0xf] }
  0xab   : > { %v2206_v16 = vsel %vm8412_vm2, %v2201_v52, %v2205_v35  ;;  %v9187_v57 = vsel %vm8851_vm5, %v6621_v44, %v2462_v61  ;;  %v2220_v27 = vrot.slane %v2218_v13, 4  ;;  %v2223_v50 = vrot.slane %v2221_v14, 5  ;;  %v9254_v61 = vld [vmem:[%s8378_s18 + $0x68] sm:$0x1] }
  0xac   : > { %v2216_v32 = vsel %vm8412_vm2, %v2211_v8, %v2215_v4  ;;  %v9197_v22 = vsel %vm8851_vm5, %v2464_v25, %v2465_v29  ;;  %v2227_v11 = vshll.u32 %v9146_v28, 16  ;;  %v2231_v36 = vshrl.u32 %v9146_v28, 16  ;;  %2854 = vmatmul.mubr.bf16.vlgmr.msra.gmra.mrb[60].mxu0 %v6628_v19  ;;  %v9240_v4 = vld [vmem:[%s8378_s18 + $0x60] sm:$0xf] }
  0xad   : > { %v6639_v60 = vcombine.low %v2206_v16, %v2216_v32  ;;  %v6629_v47 = vcombine.low %v9101_v3, %v9106_v46  ;;  %v6650_v23 = vcombine.low %v2456_v53, %v2459_v18  ;;  %v2224_v30 = vor.u32 %v2223_v50, %v2220_v27  ;;  %v9259_v16 = vld [vmem:[%s8378_s18 + $0x6c] sm:$0xf]  ;;  %v9262_v53 = vld [vmem:[%s8378_s18 + $0x70] sm:$0xf] }
  0xae   : > { %v2237_v39 = vshll.u32 %v6596_v0, 16  ;;  %v2229_v48 = vrot.slane %v2227_v11, 5  ;;  %v2233_v45 = vrot.slane %v2231_v36, 4  ;;  %v6622_v37 = vrot.slane %v9190_v24, 9 }
  0xaf   : > { %2861 = vmatprep.mubr.bf16.mxu0 %v6639_v60  ;;  %v2469_v62 = vrot.slane %v9193_v40, 5  ;;  %v6651_v31 = vcombine.low %v9187_v57, %v9197_v22  ;;  %v2225_v58 = vrot.slane %v2224_v30, 4  ;;  %v2472_v3 = vrot.slane %v9202_v43, 5  ;;  %v9268_v57 = vld [vmem:[%s8378_s18 + $0x74] sm:$0x1] }
  0xb0   : > { %v6623_v46 = vrot.slane %v9205_v42, 9  ;;  %v2234_v19 = vor.u32 %v2233_v45, %v2229_v48  ;;  %v2239_v15 = vrot.slane %v2237_v39, 5  ;;  %v2476_v38 = vrot.slane %v9213_v6, 5 }
  0xb1   : > { %v2471_v33 = vrot.slane %v2469_v62, 4  ;;  %7613 = vmatmul.mubr.bf16.vlgmr.msra.gmra.mrb[40].mxu1 %v6649_v59  ;;  %v2470_v12 = vsel %vm8851_vm5, %v6622_v37, %v2469_v62  ;;  %v2479_v41 = vrot.slane %v9218_v63, 5  ;;  %v2242_v0 = vshrl.u32 %v9160_v20, 16 }
  0xb2   : > { %v2245_v21 = vshll.u32 %v9160_v20, 16  ;;  %7616 = vmatprep.mubr.bf16.mxu1 %v6650_v23  ;;  %v2230_v35 = vsel %vm8412_vm2, %v2225_v58, %v2229_v48  ;;  %v2235_v26 = vrot.slane %v2234_v19, 4  ;;  %v2478_v17 = vrot.slane %v2476_v38, 4  ;;  %v9282_v58 = vld [vmem:[%s8378_s18 + $0x78] sm:$0xf] }
  0xb3   : > { %v2473_v54 = vsel %vm8851_vm5, %v2471_v33, %v2472_v3  ;;  %v9236_v5 = vsel %vm8851_vm5, %v6623_v46, %v2476_v38  ;;  %v2244_v7 = vrot.slane %v2242_v0, 4  ;;  %v2251_v56 = vshll.u32 %v9163_v49, 16  ;;  %v9299_v0 = vld [vmem:[%s8378_s18 + $0x80] sm:$0x1] }
  0xb4   : > { %v2247_v10 = vrot.slane %v2245_v21, 5  ;;  %v2240_v2 = vsel %vm8412_vm2, %v2235_v26, %v2239_v15  ;;  %v9246_v44 = vsel %vm8851_vm5, %v2478_v17, %v2479_v41  ;;  %v2255_v59 = vshrl.u32 %v9163_v49, 16  ;;  %2862 = vmatmul.mubr.bf16.gmra.mrb[64].mxu0 %v6629_v47  ;;  %v9289_v15 = vld [vmem:[%s8378_s18 + $0x7c] sm:$0xf]  ;;  %v9302_v21 = vld [vmem:[%s8378_s18 + $0x84] sm:$0xf] }
  0xb5   : > { %v2261_v52 = vshll.u32 %v9168_v34, 16  ;;  %v6640_v8 = vcombine.low %v2230_v35, %v2240_v2  ;;  %v6630_v29 = vcombine.low %v9143_v1, %v9146_v28  ;;  %v2253_v14 = vrot.slane %v2251_v56, 5 }
  0xb6   : > { %v2248_v13 = vor.u32 %v2247_v10, %v2244_v7  ;;  %v6652_v18 = vcombine.low %v2470_v12, %v2473_v54  ;;  %v6653_v25 = vcombine.low %v9236_v5, %v9246_v44  ;;  %v2257_v34 = vrot.slane %v2255_v59, 4  ;;  %v9305_v5 = vld [vmem:[%s8378_s18 + $0x88] sm:$0xf]  ;;  %v9308_v7 = vld [vmem:[%s8378_s18 + $0x8c] sm:$0x1] }
  0xb7   : > { %v6624_v32 = vrot.slane %v9240_v4, 9  ;;  %2869 = vmatprep.mubr.bf16.mxu0 %v6640_v8  ;;  %v2263_v50 = vrot.slane %v2261_v52, 5  ;;  %v2483_v1 = vrot.slane %v9251_v9, 5  ;;  %v2486_v28 = vrot.slane %v9254_v61, 5 }
  0xb8   : > { %v2249_v27 = vrot.slane %v2248_v13, 4  ;;  %v2258_v60 = vor.u32 %v2257_v34, %v2253_v14  ;;  %v6625_v22 = vrot.slane %v9259_v16, 9  ;;  %v2490_v11 = vrot.slane %v9262_v53, 5 }
  0xb9   : > { %v2266_v36 = vshrl.u32 %v9190_v24, 16  ;;  %7617 = vmatmul.mubr.bf16.gmra.mrb[44].mxu1 %v6651_v31  ;;  %v2485_v23 = vrot.slane %v2483_v1, 4  ;;  %v2493_v30 = vrot.slane %v9268_v57, 5  ;;  %v2269_v39 = vshll.u32 %v9190_v24, 16 }
  0xba   : > { %v2254_v47 = vsel %vm8412_vm2, %v2249_v27, %v2253_v14  ;;  %7620 = vmatprep.mubr.bf16.mxu1 %v6652_v18  ;;  %v2259_v48 = vrot.slane %v2258_v60, 4  ;;  %v2484_v45 = vsel %vm8851_vm5, %v6624_v32, %v2483_v1  ;;  %v2492_v37 = vrot.slane %v2490_v11, 4 }
  0xbb   : > { %v2268_v62 = vrot.slane %v2266_v36, 4  ;;  %v2487_v31 = vsel %vm8851_vm5, %v2485_v23, %v2486_v28  ;;  %v2271_v3 = vrot.slane %v2269_v39, 5  ;;  %v2275_v46 = vshll.u32 %v9193_v40, 16 }
  0xbc   : > { %v2279_v19 = vshrl.u32 %v9193_v40, 16  ;;  %v2264_v33 = vsel %vm8412_vm2, %v2259_v48, %v2263_v50  ;;  %v6631_v38 = vcombine.low %v9160_v20, %v9163_v49  ;;  %v2491_v12 = vsel %vm8851_vm5, %v6625_v22, %v2490_v11  ;;  %2870 = vmatmul.mubr.bf16.gmra.mrb[68].mxu0 %v6630_v29 }
  0xbd   : > { %v2285_v41 = vshll.u32 %v9202_v43, 16  ;;  %v6641_v35 = vcombine.low %v2254_v47, %v2264_v33  ;;  %v6654_v26 = vcombine.low %v2484_v45, %v2487_v31  ;;  %v2272_v54 = vor.u32 %v2271_v3, %v2268_v62 }
  0xbe   : > { %v2277_v17 = vrot.slane %v2275_v46, 5  ;;  %v2494_v20 = vsel %vm8851_vm5, %v2492_v37, %v2493_v30  ;;  %v2281_v49 = vrot.slane %v2279_v19, 4  ;;  %v6626_v43 = vrot.slane %v9282_v58, 9 }
  0xbf   : > { %v2287_v10 = vrot.slane %v2285_v41, 5  ;;  %2877 = vmatprep.mubr.bf16.mxu0 %v6641_v35  ;;  %v2273_v56 = vrot.slane %v2272_v54, 4  ;;  %v2497_v2 = vrot.slane %v9289_v15, 5  ;;  %v2500_v44 = vrot.slane %v9299_v0, 5 }
  0xc0   : > { %v6627_v59 = vrot.slane %v9302_v21, 9  ;;  %v2282_v52 = vor.u32 %v2281_v49, %v2277_v17  ;;  %v2504_v8 = vrot.slane %v9305_v5, 5  ;;  %v2507_v29 = vrot.slane %v9308_v7, 5 }
  0xc1   : > { %v2290_v13 = vshrl.u32 %v9205_v42, 16  ;;  %7621 = vmatmul.mubr.bf16.gmra.mrb[48].mxu1 %v6653_v25  ;;  %v2278_v14 = vsel %vm8412_vm2, %v2273_v56, %v2277_v17  ;;  %v2498_v18 = vsel %vm8851_vm5, %v6626_v43, %v2497_v2  ;;  %v2499_v34 = vrot.slane %v2497_v2, 4 }
  0xc2   : > { %v2293_v32 = vshll.u32 %v9205_v42, 16  ;;  %7624 = vmatprep.mubr.bf16.mxu1 %v6654_v26  ;;  %v2283_v27 = vrot.slane %v2282_v52, 4  ;;  %v2505_v50 = vsel %vm8851_vm5, %v6627_v59, %v2504_v8  ;;  %v2506_v1 = vrot.slane %v2504_v8, 4 }
  0xc3   : > { %v2292_v28 = vrot.slane %v2290_v13, 4  ;;  %v2501_v60 = vsel %vm8851_vm5, %v2499_v34, %v2500_v44  ;;  %v2299_v22 = vshll.u32 %v9213_v6, 16  ;;  %v2303_v11 = vshrl.u32 %v9213_v6, 16 }
  0xc4   : > { %v2295_v25 = vrot.slane %v2293_v32, 5  ;;  %v6655_v36 = vcombine.low %v2491_v12, %v2494_v20  ;;  %v2288_v47 = vsel %vm8412_vm2, %v2283_v27, %v2287_v10  ;;  %v2508_v23 = vsel %vm8851_vm5, %v2506_v1, %v2507_v29  ;;  %2878 = vmatmul.mubr.bf16.gmra.mrb[72].mxu0 %v6631_v38 }
  0xc5   : > { %v2309_v30 = vshll.u32 %v9218_v63, 16  ;;  %v6642_v39 = vcombine.low %v2278_v14, %v2288_v47  ;;  %v6632_v48 = vcombine.low %v9190_v24, %v9193_v40  ;;  %v2301_v37 = vrot.slane %v2299_v22, 5 }
  0xc6   : > { %v2296_v45 = vor.u32 %v2295_v25, %v2292_v28  ;;  %v6656_v62 = vcombine.low %v2498_v18, %v2501_v60  ;;  %v6657_v31 = vcombine.low %v2505_v50, %v2508_v23  ;;  %v2305_v3 = vrot.slane %v2303_v11, 4 }
  0xc7   : > { %v2314_v46 = vshrl.u32 %v9240_v4, 16  ;;  %2885 = vmatprep.mubr.bf16.mxu0 %v6642_v39  ;;  %v2317_v33 = vshll.u32 %v9240_v4, 16  ;;  %v2323_v12 = vshll.u32 %v9251_v9, 16  ;;  %v2327_v63 = vshrl.u32 %v9251_v9, 16 }
  0xc8   : > { %v2297_v19 = vrot.slane %v2296_v45, 4  ;;  %v2306_v38 = vor.u32 %v2305_v3, %v2301_v37  ;;  %v2311_v41 = vrot.slane %v2309_v30, 5  ;;  %v2333_v24 = vshll.u32 %v9254_v61, 16 }
  0xc9   : > { %v2316_v35 = vrot.slane %v2314_v46, 4  ;;  %7625 = vmatmul.mubr.bf16.gmra.mrb[52].mxu1 %v6655_v36  ;;  %v2319_v26 = vrot.slane %v2317_v33, 5  ;;  %v2325_v54 = vrot.slane %v2323_v12, 5  ;;  %v2329_v17 = vrot.slane %v2327_v63, 4 }
  0xca   : > { %v2302_v40 = vsel %vm8412_vm2, %v2297_v19, %v2301_v37  ;;  %7628 = vmatprep.mubr.bf16.mxu1 %v6656_v62  ;;  %v2307_v20 = vrot.slane %v2306_v38, 4  ;;  %v2335_v49 = vrot.slane %v2333_v24, 5  ;;  %v2338_v10 = vshrl.u32 %v9259_v16, 16 }
  0xcb   : > { %v2341_v43 = vshll.u32 %v9259_v16, 16  ;;  %v2320_v56 = vor.u32 %v2319_v26, %v2316_v35  ;;  %v2330_v2 = vor.u32 %v2329_v17, %v2325_v54  ;;  %v2347_v44 = vshll.u32 %v9262_v53, 16 }
  0xcc   : > { %v2351_v61 = vshrl.u32 %v9262_v53, 16  ;;  %v2312_v59 = vsel %vm8412_vm2, %v2307_v20, %v2311_v41  ;;  %v2340_v52 = vrot.slane %v2338_v10, 4  ;;  %v2357_v29 = vshll.u32 %v9268_v57, 16  ;;  %2886 = vmatmul.mubr.bf16.gmra.mrb[76].mxu0 %v6632_v48 }
  0xcd   : > { %v2343_v8 = vrot.slane %v2341_v43, 5  ;;  %v6643_v13 = vcombine.low %v2302_v40, %v2312_v59  ;;  %v2321_v14 = vrot.slane %v2320_v56, 4  ;;  %v2331_v18 = vrot.slane %v2330_v2, 4 }
  0xce   : > { %v2349_v34 = vrot.slane %v2347_v44, 5  ;;  %v2353_v27 = vrot.slane %v2351_v61, 4  ;;  %v2362_v28 = vshrl.u32 %v9282_v58, 16  ;;  %v2365_v60 = vshll.u32 %v9282_v58, 16 }
  0xcf   : > { %v2344_v32 = vor.u32 %v2343_v8, %v2340_v52  ;;  %2893 = vmatprep.mubr.bf16.mxu0 %v6643_v13  ;;  %v2326_v50 = vsel %vm8412_vm2, %v2321_v14, %v2325_v54  ;;  %v2336_v1 = vsel %vm8412_vm2, %v2331_v18, %v2335_v49  ;;  %v2371_v57 = vshll.u32 %v9289_v15, 16 }
  0xd0   : > { %v2354_v25 = vor.u32 %v2353_v27, %v2349_v34  ;;  %v6633_v22 = vcombine.low %v9205_v42, %v9213_v6  ;;  %v6644_v11 = vcombine.low %v2326_v50, %v2336_v1  ;;  %v2359_v36 = vrot.slane %v2357_v29, 5 }
  0xd1   : > { %7629 = vmatmul.mubr.bf16.gmra.mrb[56].mxu1 %v6657_v31  ;;  %v2375_v47 = vshrl.u32 %v9289_v15, 16  ;;  %v2345_v23 = vrot.slane %v2344_v32, 4  ;;  %v2364_v39 = vrot.slane %v2362_v28, 4  ;;  %v2367_v48 = vrot.slane %v2365_v60, 5 }
  0xd2   : > { %v2355_v30 = vrot.slane %v2354_v25, 4  ;;  %v2373_v45 = vrot.slane %v2371_v57, 5  ;;  %v2381_v62 = vshll.u32 %v9299_v0, 16  ;;  %v2386_v3 = vshrl.u32 %v9302_v21, 16 }
  0xd3   : > { %v2377_v37 = vrot.slane %v2375_v47, 4  ;;  %v2350_v31 = vsel %vm8412_vm2, %v2345_v23, %v2349_v34  ;;  %v2368_v6 = vor.u32 %v2367_v48, %v2364_v39  ;;  %v2389_v19 = vshll.u32 %v9302_v21, 16 }
  0xd4   : > { %2894 = vmatmul.mubr.bf16.gmra.mrb[80].mxu0 %v6633_v22  ;;  %v2360_v42 = vsel %vm8412_vm2, %v2355_v30, %v2359_v36  ;;  %v2395_v33 = vshll.u32 %v9305_v5, 16  ;;  %v2399_v12 = vshrl.u32 %v9305_v5, 16  ;;  %v6634_v0 = vcombine.low %v9240_v4, %v9251_v9 }
  0xd5   : > { %2901 = vmatprep.mubr.bf16.mxu0 %v6644_v11  ;;  %v2378_v46 = vor.u32 %v2377_v37, %v2373_v45  ;;  %v6645_v63 = vcombine.low %v2350_v31, %v2360_v42  ;;  %v2369_v38 = vrot.slane %v2368_v6, 4  ;;  %v2383_v41 = vrot.slane %v2381_v62, 5 }
  0xd6   : > { %v2388_v35 = vrot.slane %v2386_v3, 4  ;;  %v2391_v40 = vrot.slane %v2389_v19, 5  ;;  %v2397_v26 = vrot.slane %v2395_v33, 5  ;;  %v2401_v54 = vrot.slane %v2399_v12, 4 }
  0xd7   : > { %v2379_v24 = vrot.slane %v2378_v46, 4  ;;  %v2405_v17 = vshll.u32 %v9308_v7, 16  ;;  %v2374_v20 = vsel %vm8412_vm2, %v2369_v38, %v2373_v45  ;;  %v6635_v9 = vcombine.low %v9259_v16, %v9262_v53 }
  0xd8   : > { %v2392_v10 = vor.u32 %v2391_v40, %v2388_v35  ;;  %v2402_v4 = vor.u32 %v2401_v54, %v2397_v26  ;;  %v6636_v59 = vcombine.low %v9282_v58, %v9289_v15  ;;  %v6637_v16 = vcombine.low %v9302_v21, %v9305_v5 }
  0xd9   : > { %v2384_v49 = vsel %vm8412_vm2, %v2379_v24, %v2383_v41  ;;  %v2407_v44 = vrot.slane %v2405_v17, 5 }
  0xda   : > { %v6646_v43 = vcombine.low %v2374_v20, %v2384_v49  ;;  %v2393_v56 = vrot.slane %v2392_v10, 4  ;;  %v2403_v2 = vrot.slane %v2402_v4, 4 }
  0xdc   : > { %2902 = vmatmul.mubr.bf16.gmra.mrb[84].mxu0 %v6634_v0  ;;  %v2398_v7 = vsel %vm8412_vm2, %v2393_v56, %v2397_v26  ;;  %v2408_v61 = vsel %vm8412_vm2, %v2403_v2, %v2407_v44 }
  0xdd   : > { %2909 = vmatprep.mubr.bf16.mxu0 %v6645_v63  ;;  %v6647_v52 = vcombine.low %v2398_v7, %v2408_v61 }
  0xe4   : > { %2910 = vmatmul.mubr.bf16.gmra.mrb[88].mxu0 %v6635_v9 }
  0xe5   : > { %2917 = vmatprep.mubr.bf16.mxu0 %v6646_v43 }
  0xec   : > { %2918 = vmatmul.mubr.bf16.gmra.mrb[92].mxu0 %v6636_v59 }
  0xed   : > { %2925 = vmatprep.mubr.bf16.mxu0 %v6647_v52 }
  0xf4   : > { %2926 = vmatmul.mubr.bf16.gmra.mrb[96].mxu0 %v6637_v16 }
 0x104   : > { %v7018_v53 = vpop.f32.mrb[0].mxu0 }
 0x105   : > { %v7019_v8 = vpop.f32.mrb[1].mxu0 }
 0x106   : > { %v9387_v29 = vadd.f32 %v7019_v8, %v7018_v53  ;;  %v7021_v13 = vpop.f32.mrb[2].mxu0  ;;  %v7112_v34 = vpop.f32.mrb[0].mxu1 }
 0x107   : > { %v7022_v14 = vpop.f32.mrb[3].mxu0  ;;  %v7113_v32 = vpop.f32.mrb[1].mxu1 }
 0x108   : > { %v9389_v18 = vadd.f32 %v7022_v14, %v7021_v13  ;;  %v9391_v27 = vadd.f32 %v7113_v32, %v7112_v34  ;;  %v7115_v58 = vpop.f32.mrb[2].mxu1 }
 0x109   : > { %v7116_v15 = vpop.f32.mrb[3].mxu1 }
 0x10a   : > { %v9393_v1 = vadd.f32 %v7116_v15, %v7115_v58 }
 0x10c   : > { %v7024_v50 = vpop.f32.mrb[4].mxu0 }
 0x10d   : > { %v7025_v28 = vpop.f32.mrb[5].mxu0 }
 0x10e   : > { %v9395_v21 = vadd.f32 %v7025_v28, %v7024_v50  ;;  %v7027_v5 = vpop.f32.mrb[6].mxu0 }
 0x10f   : > { %v7028_v60 = vpop.f32.mrb[7].mxu0  ;;  %v7118_v57 = vpop.f32.mrb[4].mxu1 }
 0x110   : > { %v9397_v25 = vadd.f32 %v7028_v60, %v7027_v5  ;;  %v7119_v22 = vpop.f32.mrb[5].mxu1 }
 0x111   : > { %v9399_v11 = vadd.f32 %v7119_v22, %v7118_v57  ;;  %v7121_v36 = vpop.f32.mrb[6].mxu1 }
 0x112   : > { %v7122_v47 = vpop.f32.mrb[7].mxu1 }
 0x113   : > { %v9401_v23 = vadd.f32 %v7122_v47, %v7121_v36 }
 0x114   : > { %v7030_v30 = vpop.f32.mrb[8].mxu0 }
 0x115   : > { %v7031_v39 = vpop.f32.mrb[9].mxu0 }
 0x116   : > { %v9403_v48 = vadd.f32 %v7031_v39, %v7030_v30  ;;  %v7033_v45 = vpop.f32.mrb[10].mxu0 }
 0x117   : > { %v7034_v37 = vpop.f32.mrb[11].mxu0  ;;  %v7124_v31 = vpop.f32.mrb[8].mxu1 }
 0x118   : > { %v9405_v62 = vadd.f32 %v7034_v37, %v7033_v45  ;;  %v7125_v42 = vpop.f32.mrb[9].mxu1 }
 0x119   : > { %v9407_v6 = vadd.f32 %v7125_v42, %v7124_v31  ;;  %v7127_v3 = vpop.f32.mrb[10].mxu1 }
 0x11a   : > { %v7128_v46 = vpop.f32.mrb[11].mxu1 }
 0x11b   : > { %v9409_v19 = vadd.f32 %v7128_v46, %v7127_v3 }
 0x11c   : > { %v7036_v33 = vpop.f32.mrb[12].mxu0 }
 0x11d   : > { %v7037_v12 = vpop.f32.mrb[13].mxu0 }
 0x11e   : > { %v9411_v0 = vadd.f32 %v7037_v12, %v7036_v33  ;;  %v7039_v63 = vpop.f32.mrb[14].mxu0 }
 0x11f   : > { %v7040_v38 = vpop.f32.mrb[15].mxu0  ;;  %v7130_v35 = vpop.f32.mrb[12].mxu1 }
 0x120   : > { %v9413_v41 = vadd.f32 %v7040_v38, %v7039_v63  ;;  %v7131_v24 = vpop.f32.mrb[13].mxu1 }
 0x121   : > { %v9415_v40 = vadd.f32 %v7131_v24, %v7130_v35  ;;  %v7133_v26 = vpop.f32.mrb[14].mxu1 }
 0x122   : > { %v7134_v54 = vpop.f32.mrb[15].mxu1 }
 0x123   : > { %v9417_v20 = vadd.f32 %v7134_v54, %v7133_v26 }
 0x125   : > { %v7042_v17 = vpop.f32.mrb[16].mxu0 }
 0x126   : > { %v7043_v49 = vpop.f32.mrb[17].mxu0 }
 0x127   : > { %v9419_v10 = vadd.f32 %v7043_v49, %v7042_v17  ;;  %v7045_v4 = vpop.f32.mrb[18].mxu0 }
 0x128   : > { %v7046_v9 = vpop.f32.mrb[19].mxu0 }
 0x129   : > { %v9421_v43 = vadd.f32 %v7046_v9, %v7045_v4  ;;  %v7136_v56 = vpop.f32.mrb[16].mxu1 }
 0x12a   : > { %v7137_v2 = vpop.f32.mrb[17].mxu1 }
 0x12b   : > { %v9423_v44 = vadd.f32 %v7137_v2, %v7136_v56  ;;  %v7139_v7 = vpop.f32.mrb[18].mxu1 }
 0x12c   : > { %v7140_v61 = vpop.f32.mrb[19].mxu1 }
 0x12d   : > { %v9425_v59 = vadd.f32 %v7140_v61, %v7139_v7  ;;  %v7048_v52 = vpop.f32.mrb[20].mxu0 }
 0x12e   : > { %v7049_v16 = vpop.f32.mrb[21].mxu0 }
 0x12f   : > { %v9427_v53 = vadd.f32 %v7049_v16, %v7048_v52  ;;  %v7051_v8 = vpop.f32.mrb[22].mxu0 }
 0x130   : > { %v7052_v13 = vpop.f32.mrb[23].mxu0 }
 0x131   : > { %v9429_v14 = vadd.f32 %v7052_v13, %v7051_v8  ;;  %v7142_v34 = vpop.f32.mrb[20].mxu1 }
 0x132   : > { %v7143_v32 = vpop.f32.mrb[21].mxu1 }
 0x133   : > { %v9431_v58 = vadd.f32 %v7143_v32, %v7142_v34  ;;  %v7145_v15 = vpop.f32.mrb[22].mxu1 }
 0x134   : > { %v7146_v50 = vpop.f32.mrb[23].mxu1 }
 0x135   : > { %v7054_v28 = vpop.f32.mrb[24].mxu0  ;;  %v9433_v5 = vadd.f32 %v7146_v50, %v7145_v15 }
 0x136   : > { %v7055_v60 = vpop.f32.mrb[25].mxu0 }
 0x137   : > { %v9435_v57 = vadd.f32 %v7055_v60, %v7054_v28  ;;  %v7057_v22 = vpop.f32.mrb[26].mxu0 }
 0x138   : > { %v7058_v36 = vpop.f32.mrb[27].mxu0 }
 0x139   : > { %v9437_v47 = vadd.f32 %v7058_v36, %v7057_v22  ;;  %v7148_v30 = vpop.f32.mrb[24].mxu1 }
 0x13a   : > { %v7149_v39 = vpop.f32.mrb[25].mxu1 }
 0x13b   : > { %v9439_v45 = vadd.f32 %v7149_v39, %v7148_v30  ;;  %v7151_v37 = vpop.f32.mrb[26].mxu1 }
 0x13c   : > { %v7152_v31 = vpop.f32.mrb[27].mxu1 }
 0x13d   : > { %v9441_v42 = vadd.f32 %v7152_v31, %v7151_v37  ;;  %v7060_v3 = vpop.f32.mrb[28].mxu0 }
 0x13e   : > { %v7061_v46 = vpop.f32.mrb[29].mxu0 }
 0x13f   : > { %v9443_v33 = vadd.f32 %v7061_v46, %v7060_v3  ;;  %v7063_v12 = vpop.f32.mrb[30].mxu0 }
 0x140   : > { %v7064_v63 = vpop.f32.mrb[31].mxu0 }
 0x141   : > { %v9445_v38 = vadd.f32 %v7064_v63, %v7063_v12  ;;  %v7154_v35 = vpop.f32.mrb[28].mxu1 }
 0x142   : > { %v7155_v24 = vpop.f32.mrb[29].mxu1 }
 0x143   : > { %v9447_v26 = vadd.f32 %v7155_v24, %v7154_v35  ;;  %v7157_v54 = vpop.f32.mrb[30].mxu1 }
 0x144   : > { %v7158_v17 = vpop.f32.mrb[31].mxu1 }
 0x145   : > { %v9449_v4 = vadd.f32 %v7158_v17, %v7157_v54 }
 0x146   : > { %v7066_v49 = vpop.f32.mrb[32].mxu0 }
 0x147   : > { %v7067_v9 = vpop.f32.mrb[33].mxu0 }
 0x148   : > { %v9451_v56 = vadd.f32 %v7067_v9, %v7066_v49  ;;  %v7069_v2 = vpop.f32.mrb[34].mxu0 }
 0x149   : > { %v7070_v7 = vpop.f32.mrb[35].mxu0 }
 0x14a   : > { %v9453_v61 = vadd.f32 %v7070_v7, %v7069_v2  ;;  %v7160_v52 = vpop.f32.mrb[32].mxu1 }
 0x14b   : > { %v7161_v16 = vpop.f32.mrb[33].mxu1 }
 0x14c   : > { %v9455_v8 = vadd.f32 %v7161_v16, %v7160_v52  ;;  %v7163_v13 = vpop.f32.mrb[34].mxu1 }
 0x14d   : > { %v7164_v34 = vpop.f32.mrb[35].mxu1 }
 0x14e   : > { %v9457_v32 = vadd.f32 %v7164_v34, %v7163_v13 }
 0x14f   : > { %v7072_v15 = vpop.f32.mrb[36].mxu0 }
 0x150   : > { %v7073_v50 = vpop.f32.mrb[37].mxu0 }
 0x151   : > { %v7074_v28 = vadd.f32 %v7073_v50, %v7072_v15  ;;  %v7075_v60 = vpop.f32.mrb[38].mxu0 }
 0x152   : > { %v7076_v22 = vpop.f32.mrb[39].mxu0 }
 0x153   : > { %v7077_v36 = vadd.f32 %v7076_v22, %v7075_v60 }
 0x154   : > { %v7166_v30 = vpop.f32.mrb[36].mxu1 }
 0x155   : > { %v7167_v39 = vpop.f32.mrb[37].mxu1 }
 0x156   : > { %v7168_v37 = vadd.f32 %v7167_v39, %v7166_v30  ;;  %v7169_v31 = vpop.f32.mrb[38].mxu1 }
 0x157   : > { %v7170_v3 = vpop.f32.mrb[39].mxu1  ;;  %v7542_v46 = vpop.f32.mrb[40].mxu0 }
 0x158   : > { %v7171_v12 = vadd.f32 %v7170_v3, %v7169_v31  ;;  %v1695_v63 = vadd.f32 %v7542_v46, %v9395_v21  ;;  %v1686_v35 = vpop.f32.mrb[41].mxu0 }
 0x159   : > { %v1687_v24 = vadd.f32 %v9387_v29, %v1686_v35  ;;  %v7543_v54 = vpop.f32.mrb[42].mxu0 }
 0x15a   : > { %v9462_v17 = vadd.f32 %v9399_v11, %v1695_v63  ;;  %v1698_v49 = vadd.f32 %v7543_v54, %v9397_v25  ;;  %v1689_v9 = vpop.f32.mrb[43].mxu0 }
 0x15b   : > { %v1944_v2 = vadd.f32 %v9391_v27, %v1687_v24  ;;  %v1690_v7 = vadd.f32 %v9389_v18, %v1689_v9 }
 0x15c   : > { %v9468_v52 = vadd.f32 %v9401_v23, %v1698_v49 }
 0x15d   : > { %v1947_v16 = vadd.f32 %v9393_v1, %v1690_v7 }
 0x15f   : > { %v7546_v21 = vpop.f32.mrb[44].mxu0 }
 0x160   : > { %v1711_v13 = vadd.f32 %v7546_v21, %v9411_v0  ;;  %v1702_v29 = vpop.f32.mrb[45].mxu0 }
 0x161   : > { %v1703_v34 = vadd.f32 %v9403_v48, %v1702_v29  ;;  %v7547_v11 = vpop.f32.mrb[46].mxu0 }
 0x162   : > { %v9474_v15 = vadd.f32 %v9415_v40, %v1711_v13  ;;  %v1714_v25 = vadd.f32 %v7547_v11, %v9413_v41  ;;  %v1705_v27 = vpop.f32.mrb[47].mxu0 }
 0x163   : > { %v9478_v18 = vadd.f32 %v9407_v6, %v1703_v34  ;;  %v1706_v23 = vadd.f32 %v9405_v62, %v1705_v27 }
 0x164   : > { %v9482_v1 = vadd.f32 %v9417_v20, %v1714_v25 }
 0x165   : > { %v9485_v0 = vadd.f32 %v9409_v19, %v1706_v23 }
 0x167   : > { %v7550_v50 = vpop.f32.mrb[48].mxu0 }
 0x168   : > { %v1727_v48 = vadd.f32 %v7550_v50, %v9427_v53  ;;  %v1718_v60 = vpop.f32.mrb[49].mxu0 }
 0x169   : > { %v1719_v40 = vadd.f32 %v9419_v10, %v1718_v60  ;;  %v7551_v22 = vpop.f32.mrb[50].mxu0 }
 0x16a   : > { %v9490_v41 = vadd.f32 %v9431_v58, %v1727_v48  ;;  %v1730_v6 = vadd.f32 %v7551_v22, %v9429_v14  ;;  %v1721_v30 = vpop.f32.mrb[51].mxu0 }
 0x16b   : > { %v9494_v62 = vadd.f32 %v9423_v44, %v1719_v40  ;;  %v1722_v20 = vadd.f32 %v9421_v43, %v1721_v30 }
 0x16c   : > { %v9498_v19 = vadd.f32 %v9433_v5, %v1730_v6 }
 0x16d   : > { %v9501_v53 = vadd.f32 %v9425_v59, %v1722_v20 }
 0x16f   : > { %v7554_v39 = vpop.f32.mrb[52].mxu0 }
 0x170   : > { %v1743_v10 = vadd.f32 %v7554_v39, %v9443_v33  ;;  %v1734_v31 = vpop.f32.mrb[53].mxu0 }
 0x171   : > { %v1735_v58 = vadd.f32 %v9435_v57, %v1734_v31  ;;  %v7555_v3 = vpop.f32.mrb[54].mxu0 }
 0x172   : > { %v9506_v14 = vadd.f32 %v9447_v26, %v1743_v10  ;;  %v1746_v44 = vadd.f32 %v7555_v3, %v9445_v38  ;;  %v1737_v46 = vpop.f32.mrb[55].mxu0 }
 0x173   : > { %v9510_v43 = vadd.f32 %v9439_v45, %v1735_v58  ;;  %v1738_v5 = vadd.f32 %v9437_v47, %v1737_v46 }
 0x174   : > { %v9514_v59 = vadd.f32 %v9449_v4, %v1746_v44 }
 0x175   : > { %v9517_v33 = vadd.f32 %v9441_v42, %v1738_v5 }
 0x177   : > { %v7558_v63 = vpop.f32.mrb[56].mxu0 }
 0x178   : > { %v1759_v57 = vadd.f32 %v7558_v63, %v7074_v28  ;;  %v1750_v35 = vpop.f32.mrb[57].mxu0 }
 0x179   : > { %v1751_v26 = vadd.f32 %v9451_v56, %v1750_v35  ;;  %v7559_v24 = vpop.f32.mrb[58].mxu0 }
 0x17a   : > { %v9520_v54 = vadd.f32 %v7168_v37, %v1759_v57  ;;  %v1762_v38 = vadd.f32 %v7559_v24, %v7077_v36  ;;  %v1753_v49 = vpop.f32.mrb[59].mxu0 }
 0x17b   : > { %v9523_v45 = vadd.f32 %v9455_v8, %v1751_v26  ;;  %v1754_v47 = vadd.f32 %v9453_v61, %v1753_v49  ;;  %v9534_v8 = vld [vmem:[%s10870_s2] ss:$0 sm:$0xff] }
 0x17c   : > { %v9526_v4 = vadd.f32 %v7171_v12, %v1762_v38 }
 0x17d   : > { %v9529_v42 = vadd.f32 %v9457_v32, %v1754_v47  ;;  %v9539_v32 = vld [vmem:[%s10871_s3] ss:$0 sm:$0xff] }
 0x17f   : > { %v7206_v9 = vpop.f32.mrb[60].mxu0 }
 0x180   : > { %v7207_v28 = vpop.f32.mrb[61].mxu0 }
 0x181   : > { %v7208_v7 = vadd.f32 %v7207_v28, %v7206_v9  ;;  %v7209_v21 = vpop.f32.mrb[62].mxu0 }
 0x182   : > { %v7210_v56 = vpop.f32.mrb[63].mxu0 }
 0x183   : > { %v7211_v37 = vadd.f32 %v7210_v56, %v7209_v21  ;;  %v7734_v29 = vadd.f32 %v7208_v7, %v1944_v2  ;;  %v3407_v7 = vld [vmem:[#allocation2] sm:$0xf] }
 0x184   : > { %v7614_v13 = vpop.f32.mrb[40].mxu1 }
 0x185   : > { %v2968_v36 = vpop.f32.mrb[41].mxu1  ;;  %v7742_v34 = vadd.f32 %v7211_v37, %v1947_v16 }
 0x186   : > { %v7735_v61 = vadd.f32 %v7734_v29, %v2968_v36  ;;  %v7615_v12 = vpop.f32.mrb[42].mxu1 }
 0x187   : > { %v2971_v11 = vpop.f32.mrb[43].mxu1  ;;  %v7212_v23 = vpop.f32.mrb[64].mxu0 }
 0x188   : > { %v3074_v25 = vmul.f32 %v7735_v61, %v9534_v8  ;;  %v7743_v27 = vadd.f32 %v7742_v34, %v2971_v11  ;;  %v7213_v2 = vpop.f32.mrb[65].mxu0 }
 0x189   : > { %v7214_v60 = vadd.f32 %v7213_v2, %v7212_v23  ;;  %v7215_v40 = vpop.f32.mrb[66].mxu0 }
 0x18a   : > { %v3101_v50 = vadd.f32 %v9539_v32, %v3074_v25  ;;  %v3075_v48 = vmul.f32 %v7743_v27, %v9534_v8  ;;  %v7216_v22 = vpop.f32.mrb[67].mxu0  ;;  %v3413_v27 = vld [vmem:[#allocation2 + $0x8] sm:$0x1] }
 0x18b   : > { %v7730_v30 = vadd.f32 %v7214_v60, %v9462_v17  ;;  %v7217_v39 = vadd.f32 %v7216_v22, %v7215_v40 }
 0x18c   : > { %v3121_v6 = vmax.f32 %v3101_v50, 0.0  ;;  %v3102_v16 = vadd.f32 %v9539_v32, %v3075_v48  ;;  %v9546_v20 = vpop.f32.mrb[44].mxu1 }
 0x18d   : > { %v2984_v10 = vpop.f32.mrb[45].mxu1  ;;  %v7731_v3 = vadd.f32 %v7730_v30, %v7614_v13  ;;  %v7738_v44 = vadd.f32 %v7217_v39, %v9468_v52 }
 0x18e   : > { %v6919_v31 = vpack.c.bf16 %v3121_v6, %v3121_v6  ;;  %v3122_v58 = vmax.f32 %v3102_v16, 0.0  ;;  %v9549_v46 = vpop.f32.mrb[46].mxu1 }
 0x18f   : > { %v2987_v5 = vpop.f32.mrb[47].mxu1  ;;  %v3076_v35 = vmul.f32 %v7731_v3, %v9534_v8  ;;  %v7218_v26 = vpop.f32.mrb[68].mxu0  ;;  %v7739_v17 = vadd.f32 %v7738_v44, %v7615_v12 }
 0x190   : > { %v3205_v63 = vshrl.u32 %v6919_v31, 16  ;;  %v6920_v57 = vpack.c.bf16 %v3122_v58, %v3122_v58  ;;  %v7219_v24 = vpop.f32.mrb[69].mxu0  ;;  %v3208_v49 = vshll.u32 %v6919_v31, 16 }
 0x191   : > { %v3103_v52 = vadd.f32 %v9539_v32, %v3076_v35  ;;  %v7221_v9 = vpop.f32.mrb[70].mxu0  ;;  %v3077_v21 = vmul.f32 %v7739_v17, %v9534_v8  ;;  %v7220_v56 = vadd.f32 %v7219_v24, %v7218_v26 }
 0x192   : > { %v3207_v38 = vrot.slane %v3205_v63, 7  ;;  %v3213_v47 = vshrl.u32 %v6920_v57, 16  ;;  %v7222_v13 = vpop.f32.mrb[71].mxu0  ;;  %v3216_v61 = vshll.u32 %v6920_v57, 16 }
 0x193   : > { %v3123_v12 = vmax.f32 %v3103_v52, 0.0  ;;  %v3104_v23 = vadd.f32 %v9539_v32, %v3077_v21  ;;  %v7750_v2 = vadd.f32 %v7220_v56, %v9478_v18  ;;  %v7223_v50 = vadd.f32 %v7222_v13, %v7221_v9 }
 0x194   : > { %v3210_v37 = vor.u32 %v3208_v49, %v3207_v38  ;;  %v3215_v36 = vrot.slane %v3213_v47, 7  ;;  %v9566_v34 = vpop.f32.mrb[48].mxu1  ;;  %v3211_v11 = vrot.slane %v3207_v38, 4  ;;  %v3416_v49 = vld [vmem:[#allocation2 + $0xc] sm:$0xf] }
 0x195   : > { %v9576_v48 = vpop.f32.mrb[49].mxu1  ;;  %v6921_v6 = vpack.c.bf16 %v3123_v12, %v3123_v12  ;;  %v3124_v30 = vmax.f32 %v3104_v23, 0.0  ;;  %v7751_v39 = vadd.f32 %v7750_v2, %v2984_v10  ;;  %v7758_v31 = vadd.f32 %v7223_v50, %v9485_v0  ;;  %v3420_v50 = vld [vmem:[#allocation2 + $0x14] sm:$0x1] }
 0x196   : > { %v3408_v60 = vsel %vm9555_vm11, %v3210_v37, %v3407_v7  ;;  %v3218_v40 = vor.u32 %v3216_v61, %v3215_v36  ;;  %v3220_v22 = vrot.slane %v3215_v36, 4  ;;  %v9580_v16 = vpop.f32.mrb[50].mxu1 }
 0x197   : > { %3409 = vst [vmem:[#allocation2] sm:$0xf] %v3408_v60  ;;  %v9583_v58 = vpop.f32.mrb[51].mxu1  ;;  %v3222_v44 = vshrl.u32 %v6921_v6, 16  ;;  %v7224_v63 = vpop.f32.mrb[72].mxu0  ;;  %v6922_v57 = vpack.c.bf16 %v3124_v30, %v3124_v30  ;;  %v3078_v35 = vmul.f32 %v7751_v39, %v9534_v8  ;;  %v7759_v26 = vadd.f32 %v7758_v31, %v2987_v5 }
 0x198   : > { %v3219_v18 = vsel %vm9570_vm13, %v3211_v11, %v3218_v40  ;;  %v3414_v3 = vsel %vm9562_vm12, %v3220_v22, %v3413_v27  ;;  %v7225_v17 = vpop.f32.mrb[73].mxu0  ;;  %v3225_v24 = vshll.u32 %v6921_v6, 16 }
 0x199   : > { %3410 = vst [vmem:[#allocation2 + $0x4] sm:$0xf] %v3219_v18  ;;  %3415 = vst [vmem:[#allocation2 + $0x8] sm:$0x1] %v3414_v3  ;;  %v3224_v10 = vrot.slane %v3222_v44, 7  ;;  %v7226_v0 = vadd.f32 %v7225_v17, %v7224_v63  ;;  %v7227_v38 = vpop.f32.mrb[74].mxu0  ;;  %v3105_v52 = vadd.f32 %v9539_v32, %v3078_v35  ;;  %v3079_v9 = vmul.f32 %v7759_v26, %v9534_v8 }
 0x19a   : > { %v3230_v47 = vshrl.u32 %v6922_v57, 16  ;;  %v7228_v7 = vpop.f32.mrb[75].mxu0  ;;  %v3233_v5 = vshll.u32 %v6922_v57, 16 }
 0x19b   : > { %v3227_v21 = vor.u32 %v3225_v24, %v3224_v10  ;;  %v7746_v56 = vadd.f32 %v7226_v0, %v9474_v15  ;;  %v7229_v37 = vadd.f32 %v7228_v7, %v7227_v38  ;;  %v3125_v61 = vmax.f32 %v3105_v52, 0.0  ;;  %v3423_v7 = vld [vmem:[#allocation2 + $0x18] sm:$0xf] }
 0x19c   : > { %v9593_v13 = vpop.f32.mrb[52].mxu1  ;;  %v3232_v36 = vrot.slane %v3230_v47, 7  ;;  %v3106_v12 = vadd.f32 %v9539_v32, %v3079_v9  ;;  %v3228_v2 = vrot.slane %v3224_v10, 4 }
 0x19d   : > { %v9596_v11 = vpop.f32.mrb[53].mxu1  ;;  %v3417_v15 = vsel %vm9555_vm11, %v3227_v21, %v3416_v49  ;;  %v7747_v60 = vadd.f32 %v7746_v56, %v9546_v20  ;;  %v7754_v40 = vadd.f32 %v7229_v37, %v9482_v1  ;;  %v6923_v31 = vpack.c.bf16 %v3125_v61, %v3125_v61 }
 0x19e   : > { %v3479_v27 = vld [vmem:[#allocation2] sm:$0x1]  ;;  %v9608_v22 = vpop.f32.mrb[54].mxu1  ;;  %3418 = vst [vmem:[#allocation2 + $0xc] sm:$0xf] %v3417_v15  ;;  %v3235_v30 = vor.u32 %v3233_v5, %v3232_v36  ;;  %v3237_v39 = vrot.slane %v3232_v36, 4 }
 0x19f   : > { %v3480_v6 = vsel %vm9562_vm12, 0, %v3479_v27  ;;  %v9612_v18 = vpop.f32.mrb[55].mxu1  ;;  %v3126_v44 = vmax.f32 %v3106_v12, 0.0  ;;  %v3080_v63 = vmul.f32 %v7747_v60, %v9534_v8  ;;  %v7755_v20 = vadd.f32 %v7754_v40, %v9549_v46  ;;  %v7230_v57 = vpop.f32.mrb[76].mxu0 }
 0x1a0   : > { %3481 = vst [vmem:[#allocation2] sm:$0x1] %v3480_v6  ;;  %v3510_v3 = vld [vmem:[#allocation2 + $0x8] sm:$0x1]  ;;  %v3236_v35 = vsel %vm9570_vm13, %v3228_v2, %v3235_v30  ;;  %v3421_v26 = vsel %vm9562_vm12, %v3237_v39, %v3420_v50  ;;  %v3239_v17 = vshrl.u32 %v6923_v31, 16  ;;  %v7231_v10 = vpop.f32.mrb[77].mxu0 }
 0x1a1   : > { %v3511_v1 = vsel %vm9600_vm14, 0, %v3510_v3  ;;  %3419 = vst [vmem:[#allocation2 + $0x10] sm:$0xf] %v3236_v35  ;;  %3422 = vst [vmem:[#allocation2 + $0x14] sm:$0x1] %v3421_v26  ;;  %v6924_v24 = vpack.c.bf16 %v3126_v44, %v3126_v44  ;;  %v3107_v0 = vadd.f32 %v9539_v32, %v3080_v63  ;;  %v3081_v46 = vmul.f32 %v7755_v20, %v9534_v8  ;;  %v7233_v38 = vpop.f32.mrb[78].mxu0 }
 0x1a2   : > { %3512 = vst [vmem:[#allocation2 + $0x8] sm:$0x1] %v3511_v1  ;;  %v3241_v49 = vrot.slane %v3239_v17, 7  ;;  %v3242_v47 = vshll.u32 %v6923_v31, 16  ;;  %v7232_v52 = vadd.f32 %v7231_v10, %v7230_v57  ;;  %v7234_v9 = vpop.f32.mrb[79].mxu0 }
 0x1a3   : > { %v3247_v21 = vshrl.u32 %v6924_v24, 16  ;;  %v3127_v56 = vmax.f32 %v3107_v0, 0.0  ;;  %v3108_v37 = vadd.f32 %v9539_v32, %v3081_v46  ;;  %v7235_v12 = vadd.f32 %v7234_v9, %v7233_v38  ;;  %v3427_v31 = vld [vmem:[#allocation2 + $0x20] sm:$0x1] }
 0x1a4   : > { %v9625_v36 = vpop.f32.mrb[56].mxu1  ;;  %v3244_v5 = vor.u32 %v3242_v47, %v3241_v49  ;;  %v7766_v61 = vadd.f32 %v7232_v52, %v9494_v62  ;;  %v3250_v50 = vshll.u32 %v6924_v24, 16  ;;  %v3245_v63 = vrot.slane %v3241_v49, 4  ;;  %v3430_v52 = vld [vmem:[#allocation2 + $0x24] sm:$0xf] }
 0x1a5   : > { %v9628_v27 = vpop.f32.mrb[57].mxu1  ;;  %v3482_v2 = vld [vmem:[#allocation2 + $0xc] sm:$0x1]  ;;  %v3249_v15 = vrot.slane %v3247_v21, 7  ;;  %v6925_v60 = vpack.c.bf16 %v3127_v56, %v3127_v56  ;;  %v3128_v40 = vmax.f32 %v3108_v37, 0.0  ;;  %v7774_v62 = vadd.f32 %v7235_v12, %v9501_v53 }
 0x1a6   : > { %v9630_v6 = vpop.f32.mrb[58].mxu1  ;;  %v3483_v30 = vsel %vm9562_vm12, 0, %v3482_v2  ;;  %v3424_v39 = vsel %vm9555_vm11, %v3244_v5, %v3423_v7  ;;  %v7767_v3 = vadd.f32 %v7766_v61, %v9576_v48 }
 0x1a7   : > { %v9638_v44 = vpop.f32.mrb[59].mxu1  ;;  %3484 = vst [vmem:[#allocation2 + $0xc] sm:$0x1] %v3483_v30  ;;  %3425 = vst [vmem:[#allocation2 + $0x18] sm:$0xf] %v3424_v39  ;;  %v3252_v20 = vor.u32 %v3250_v50, %v3249_v15  ;;  %v3254_v57 = vrot.slane %v3249_v15, 4  ;;  %v6926_v10 = vpack.c.bf16 %v3128_v40, %v3128_v40  ;;  %v7775_v0 = vadd.f32 %v7774_v62, %v9583_v58 }
 0x1a8   : > { %v3256_v1 = vshrl.u32 %v6925_v60, 16  ;;  %v7236_v35 = vpop.f32.mrb[80].mxu0  ;;  %v3513_v26 = vld [vmem:[#allocation2 + $0x14] sm:$0x1]  ;;  %v3259_v17 = vshll.u32 %v6925_v60, 16  ;;  %v3082_v24 = vmul.f32 %v7767_v3, %v9534_v8 }
 0x1a9   : > { %v7237_v46 = vpop.f32.mrb[81].mxu0  ;;  %v3514_v53 = vsel %vm9600_vm14, 0, %v3513_v26  ;;  %v3253_v48 = vsel %vm9570_vm13, %v3245_v63, %v3252_v20  ;;  %v3428_v38 = vsel %vm9562_vm12, %v3254_v57, %v3427_v31  ;;  %v3264_v9 = vshrl.u32 %v6926_v10, 16  ;;  %v3434_v40 = vld [vmem:[#allocation2 + $0x2c] sm:$0x1] }
 0x1aa   : > { %v3258_v49 = vrot.slane %v3256_v1, 7  ;;  %v7239_v47 = vpop.f32.mrb[82].mxu0  ;;  %3515 = vst [vmem:[#allocation2 + $0x14] sm:$0x1] %v3514_v53  ;;  %3426 = vst [vmem:[#allocation2 + $0x1c] sm:$0xf] %v3253_v48  ;;  %v3109_v7 = vadd.f32 %v9539_v32, %v3082_v24  ;;  %v3083_v58 = vmul.f32 %v7775_v0, %v9534_v8  ;;  %v7238_v37 = vadd.f32 %v7237_v46, %v7236_v35 }
 0x1ab   : > { %3429 = vst [vmem:[#allocation2 + $0x20] sm:$0x1] %v3428_v38  ;;  %v7240_v21 = vpop.f32.mrb[83].mxu0  ;;  %v3266_v61 = vrot.slane %v3264_v9, 7  ;;  %v3267_v12 = vshll.u32 %v6926_v10, 16 }
 0x1ac   : > { %v3261_v56 = vor.u32 %v3259_v17, %v3258_v49  ;;  %v7241_v5 = vadd.f32 %v7240_v21, %v7239_v47  ;;  %v3129_v2 = vmax.f32 %v3109_v7, 0.0  ;;  %v3110_v15 = vadd.f32 %v9539_v32, %v3083_v58 }
 0x1ad   : > { %v3262_v50 = vrot.slane %v3258_v49, 4  ;;  %v7762_v30 = vadd.f32 %v7238_v37, %v9490_v41  ;;  %v3269_v3 = vor.u32 %v3267_v12, %v3266_v61  ;;  %v3271_v62 = vrot.slane %v3266_v61, 4 }
 0x1ae   : > { %v3431_v60 = vsel %vm9555_vm11, %v3261_v56, %v3430_v52  ;;  %v7770_v39 = vadd.f32 %v7241_v5, %v9498_v19  ;;  %v3485_v31 = vld [vmem:[#allocation2 + $0x18] sm:$0x1]  ;;  %v6927_v63 = vpack.c.bf16 %v3129_v2, %v3129_v2  ;;  %v3130_v20 = vmax.f32 %v3110_v15, 0.0  ;;  %v3437_v52 = vld [vmem:[#allocation2 + $0x30] sm:$0xf] }
 0x1af   : > { %3432 = vst [vmem:[#allocation2 + $0x24] sm:$0xf] %v3431_v60  ;;  %v3486_v57 = vsel %vm9562_vm12, 0, %v3485_v31  ;;  %v7763_v1 = vadd.f32 %v7762_v30, %v9566_v34  ;;  %v7242_v26 = vpop.f32.mrb[84].mxu0  ;;  %v3270_v41 = vsel %vm9570_vm13, %v3262_v50, %v3269_v3  ;;  %v3435_v19 = vsel %vm9562_vm12, %v3271_v62, %v3434_v40  ;;  %v3441_v30 = vld [vmem:[#allocation2 + $0x38] sm:$0x1] }
 0x1b0   : > { %v7771_v35 = vadd.f32 %v7770_v39, %v9580_v16  ;;  %3487 = vst [vmem:[#allocation2 + $0x18] sm:$0x1] %v3486_v57  ;;  %v3273_v17 = vshrl.u32 %v6927_v63, 16  ;;  %v7243_v10 = vpop.f32.mrb[85].mxu0  ;;  %3433 = vst [vmem:[#allocation2 + $0x28] sm:$0xf] %v3270_v41  ;;  %v6928_v0 = vpack.c.bf16 %v3130_v20, %v3130_v20 }
 0x1b1   : > { %3436 = vst [vmem:[#allocation2 + $0x2c] sm:$0x1] %v3435_v19  ;;  %v3084_v46 = vmul.f32 %v7763_v1, %v9534_v8  ;;  %v7244_v53 = vadd.f32 %v7243_v10, %v7242_v26  ;;  %v7245_v16 = vpop.f32.mrb[86].mxu0  ;;  %v3276_v49 = vshll.u32 %v6927_v63, 16 }
 0x1b2   : > { %v3516_v24 = vld [vmem:[#allocation2 + $0x20] sm:$0x1]  ;;  %v3085_v34 = vmul.f32 %v7771_v35, %v9534_v8  ;;  %v3275_v38 = vrot.slane %v3273_v17, 7  ;;  %v7246_v47 = vpop.f32.mrb[87].mxu0  ;;  %v3281_v9 = vshrl.u32 %v6928_v0, 16  ;;  %v3284_v56 = vshll.u32 %v6928_v0, 16 }
 0x1b3   : > { %v3517_v48 = vsel %vm9600_vm14, 0, %v3516_v24  ;;  %v3111_v7 = vadd.f32 %v9539_v32, %v3084_v46  ;;  %v7782_v37 = vadd.f32 %v7244_v53, %v9510_v43  ;;  %v7247_v5 = vadd.f32 %v7246_v47, %v7245_v16 }
 0x1b4   : > { %3518 = vst [vmem:[#allocation2 + $0x20] sm:$0x1] %v3517_v48  ;;  %v3112_v58 = vadd.f32 %v9539_v32, %v3085_v34  ;;  %v3278_v21 = vor.u32 %v3276_v49, %v3275_v38  ;;  %v3279_v12 = vrot.slane %v3275_v38, 4  ;;  %v3283_v2 = vrot.slane %v3281_v9, 7  ;;  %v3444_v48 = vld [vmem:[#allocation2 + $0x3c] sm:$0xf] }
 0x1b5   : > { %v3131_v15 = vmax.f32 %v3111_v7, 0.0  ;;  %v7783_v39 = vadd.f32 %v7782_v37, %v9596_v11  ;;  %v7790_v31 = vadd.f32 %v7247_v5, %v9517_v33  ;;  %v3448_v7 = vld [vmem:[#allocation2 + $0x44] sm:$0x1] }
 0x1b6   : > { %v3488_v61 = vld [vmem:[#allocation2 + $0x24] sm:$0x1]  ;;  %v3132_v50 = vmax.f32 %v3112_v58, 0.0  ;;  %v3438_v40 = vsel %vm9555_vm11, %v3278_v21, %v3437_v52  ;;  %v3286_v43 = vor.u32 %v3284_v56, %v3283_v2  ;;  %v3288_v3 = vrot.slane %v3283_v2, 4 }
 0x1b7   : > { %v3489_v60 = vsel %vm9562_vm12, 0, %v3488_v61  ;;  %3439 = vst [vmem:[#allocation2 + $0x30] sm:$0xf] %v3438_v40  ;;  %v6929_v62 = vpack.c.bf16 %v3131_v15, %v3131_v15  ;;  %v7248_v20 = vpop.f32.mrb[88].mxu0  ;;  %v3086_v1 = vmul.f32 %v7783_v39, %v9534_v8  ;;  %v7791_v35 = vadd.f32 %v7790_v31, %v9612_v18 }
 0x1b8   : > { %3490 = vst [vmem:[#allocation2 + $0x24] sm:$0x1] %v3489_v60  ;;  %v6930_v63 = vpack.c.bf16 %v3132_v50, %v3132_v50  ;;  %v3519_v57 = vld [vmem:[#allocation2 + $0x2c] sm:$0x1]  ;;  %v7249_v26 = vpop.f32.mrb[89].mxu0  ;;  %v3287_v11 = vsel %vm9570_vm13, %v3279_v12, %v3286_v43  ;;  %v3442_v33 = vsel %vm9562_vm12, %v3288_v3, %v3441_v30 }
 0x1b9   : > { %v3520_v41 = vsel %vm9600_vm14, 0, %v3519_v57  ;;  %v3290_v19 = vshrl.u32 %v6929_v62, 16  ;;  %v7251_v17 = vpop.f32.mrb[90].mxu0  ;;  %3440 = vst [vmem:[#allocation2 + $0x34] sm:$0xf] %v3287_v11  ;;  %v3293_v10 = vshll.u32 %v6929_v62, 16  ;;  %v3113_v0 = vadd.f32 %v9539_v32, %v3086_v1 }
 0x1ba   : > { %3521 = vst [vmem:[#allocation2 + $0x2c] sm:$0x1] %v3520_v41  ;;  %3443 = vst [vmem:[#allocation2 + $0x38] sm:$0x1] %v3442_v33  ;;  %v3298_v24 = vshrl.u32 %v6930_v63, 16  ;;  %v7252_v18 = vpop.f32.mrb[91].mxu0  ;;  %v3087_v34 = vmul.f32 %v7791_v35, %v9534_v8  ;;  %v7250_v53 = vadd.f32 %v7249_v26, %v7248_v20 }
 0x1bb   : > { %v3292_v46 = vrot.slane %v3290_v19, 7  ;;  %v7253_v16 = vadd.f32 %v7252_v18, %v7251_v17  ;;  %v3301_v49 = vshll.u32 %v6930_v63, 16  ;;  %v3133_v47 = vmax.f32 %v3113_v0, 0.0  ;;  %v3451_v26 = vld [vmem:[#allocation2 + $0x48] sm:$0xf] }
 0x1bc   : > { %v3300_v38 = vrot.slane %v3298_v24, 7  ;;  %v3114_v58 = vadd.f32 %v9539_v32, %v3087_v34  ;;  %v7778_v21 = vadd.f32 %v7250_v53, %v9506_v14  ;;  %v3455_v53 = vld [vmem:[#allocation2 + $0x50] sm:$0x1] }
 0x1bd   : > { %v3295_v52 = vor.u32 %v3293_v10, %v3292_v46  ;;  %v3296_v9 = vrot.slane %v3292_v46, 4  ;;  %v6931_v61 = vpack.c.bf16 %v3133_v47, %v3133_v47  ;;  %v7786_v12 = vadd.f32 %v7253_v16, %v9514_v59 }
 0x1be   : > { %v3491_v56 = vld [vmem:[#allocation2 + $0x30] sm:$0x1]  ;;  %v3303_v37 = vor.u32 %v3301_v49, %v3300_v38  ;;  %v3305_v5 = vrot.slane %v3300_v38, 4  ;;  %v3134_v50 = vmax.f32 %v3114_v58, 0.0  ;;  %v7779_v60 = vadd.f32 %v7778_v21, %v9593_v13 }
 0x1bf   : > { %v3492_v2 = vsel %vm9562_vm12, 0, %v3491_v56  ;;  %v3445_v15 = vsel %vm9555_vm11, %v3295_v52, %v3444_v48  ;;  %v7254_v40 = vpop.f32.mrb[92].mxu0  ;;  %v3307_v39 = vshrl.u32 %v6931_v61, 16  ;;  %v7787_v62 = vadd.f32 %v7786_v12, %v9608_v22 }
 0x1c0   : > { %3493 = vst [vmem:[#allocation2 + $0x30] sm:$0x1] %v3492_v2  ;;  %3446 = vst [vmem:[#allocation2 + $0x3c] sm:$0xf] %v3445_v15  ;;  %v3304_v14 = vsel %vm9570_vm13, %v3296_v9, %v3303_v37  ;;  %v3449_v30 = vsel %vm9562_vm12, %v3305_v5, %v3448_v7  ;;  %v7255_v59 = vpop.f32.mrb[93].mxu0  ;;  %v6932_v43 = vpack.c.bf16 %v3134_v50, %v3134_v50  ;;  %v3310_v1 = vshll.u32 %v6931_v61, 16 }
 0x1c1   : > { %v3522_v31 = vld [vmem:[#allocation2 + $0x38] sm:$0x1]  ;;  %3447 = vst [vmem:[#allocation2 + $0x40] sm:$0xf] %v3304_v14  ;;  %3450 = vst [vmem:[#allocation2 + $0x44] sm:$0x1] %v3449_v30  ;;  %v3088_v3 = vmul.f32 %v7779_v60, %v9534_v8  ;;  %v7256_v13 = vadd.f32 %v7255_v59, %v7254_v40  ;;  %v3089_v33 = vmul.f32 %v7787_v62, %v9534_v8 }
 0x1c2   : > { %v7257_v63 = vpop.f32.mrb[94].mxu0  ;;  %v3523_v20 = vsel %vm9600_vm14, 0, %v3522_v31  ;;  %v3309_v57 = vrot.slane %v3307_v39, 7  ;;  %v3315_v41 = vshrl.u32 %v6932_v43, 16  ;;  %v3318_v24 = vshll.u32 %v6932_v43, 16 }
 0x1c3   : > { %v7258_v35 = vpop.f32.mrb[95].mxu0  ;;  %3524 = vst [vmem:[#allocation2 + $0x38] sm:$0x1] %v3523_v20  ;;  %v3115_v11 = vadd.f32 %v9539_v32, %v3088_v3  ;;  %v7798_v17 = vadd.f32 %v7256_v13, %v9523_v45  ;;  %v3116_v18 = vadd.f32 %v9539_v32, %v3089_v33  ;;  %v3458_v39 = vld [vmem:[#allocation2 + $0x54] sm:$0xf] }
 0x1c4   : > { %v3312_v19 = vor.u32 %v3310_v1, %v3309_v57  ;;  %v7259_v10 = vadd.f32 %v7258_v35, %v7257_v63  ;;  %v3317_v22 = vrot.slane %v3315_v41, 7  ;;  %v3313_v46 = vrot.slane %v3309_v57, 4 }
 0x1c5   : > { %v3135_v0 = vmax.f32 %v3115_v11, 0.0  ;;  %v7799_v16 = vadd.f32 %v7798_v17, %v9628_v27  ;;  %v3136_v52 = vmax.f32 %v3116_v18, 0.0  ;;  %v3462_v11 = vld [vmem:[#allocation2 + $0x5c] sm:$0x1] }
 0x1c6   : > { %v3452_v34 = vsel %vm9555_vm11, %v3312_v19, %v3451_v26  ;;  %v7806_v48 = vadd.f32 %v7259_v10, %v9529_v42  ;;  %v3320_v49 = vor.u32 %v3318_v24, %v3317_v22  ;;  %v3322_v47 = vrot.slane %v3317_v22, 4 }
 0x1c7   : > { %v3494_v38 = vld [vmem:[#allocation2 + $0x3c] sm:$0x1]  ;;  %3453 = vst [vmem:[#allocation2 + $0x48] sm:$0xf] %v3452_v34  ;;  %v6933_v45 = vpack.c.bf16 %v3135_v0, %v3135_v0  ;;  %v7260_v9 = vpop.f32.mrb[96].mxu0  ;;  %v3090_v21 = vmul.f32 %v7799_v16, %v9534_v8  ;;  %v6934_v2 = vpack.c.bf16 %v3136_v52, %v3136_v52 }
 0x1c8   : > { %v3495_v7 = vsel %vm9562_vm12, 0, %v3494_v38  ;;  %v3525_v58 = vld [vmem:[#allocation2 + $0x44] sm:$0x1]  ;;  %v7807_v56 = vadd.f32 %v7806_v48, %v9638_v44  ;;  %v7261_v37 = vpop.f32.mrb[97].mxu0  ;;  %v3321_v27 = vsel %vm9570_vm13, %v3313_v46, %v3320_v49  ;;  %v3456_v5 = vsel %vm9562_vm12, %v3322_v47, %v3455_v53  ;;  %v3465_v16 = vld [vmem:[#allocation2 + $0x60] sm:$0xf] }
 0x1c9   : > { %3496 = vst [vmem:[#allocation2 + $0x3c] sm:$0x1] %v3495_v7  ;;  %v3526_v42 = vsel %vm9600_vm14, 0, %v3525_v58  ;;  %v3324_v61 = vshrl.u32 %v6933_v45, 16  ;;  %v7263_v12 = vpop.f32.mrb[98].mxu0  ;;  %v3117_v15 = vadd.f32 %v9539_v32, %v3090_v21  ;;  %v3327_v40 = vshll.u32 %v6933_v45, 16 }
 0x1ca   : > { %3527 = vst [vmem:[#allocation2 + $0x44] sm:$0x1] %v3526_v42  ;;  %3454 = vst [vmem:[#allocation2 + $0x4c] sm:$0xf] %v3321_v27  ;;  %v3091_v44 = vmul.f32 %v7807_v56, %v9534_v8  ;;  %v7264_v50 = vpop.f32.mrb[99].mxu0  ;;  %v7262_v14 = vadd.f32 %v7261_v37, %v7260_v9  ;;  %v3332_v59 = vshrl.u32 %v6934_v2, 16 }
 0x1cb   : > { %3457 = vst [vmem:[#allocation2 + $0x50] sm:$0x1] %v3456_v5  ;;  %v3326_v60 = vrot.slane %v3324_v61, 7  ;;  %v7265_v30 = vadd.f32 %v7264_v50, %v7263_v12  ;;  %v3137_v31 = vmax.f32 %v3117_v15, 0.0  ;;  %v3335_v57 = vshll.u32 %v6934_v2, 16 }
 0x1cc   : > { %v3118_v43 = vadd.f32 %v9539_v32, %v3091_v44  ;;  %v7794_v62 = vadd.f32 %v7262_v14, %v9520_v54  ;;  %v3334_v20 = vrot.slane %v3332_v59, 7  ;;  %v3469_v21 = vld [vmem:[#allocation2 + $0x68] sm:$0x1]  ;;  %v3472_v14 = vld [vmem:[#allocation2 + $0x6c] sm:$0xf] }
 0x1cd   : > { %v3329_v3 = vor.u32 %v3327_v40, %v3326_v60  ;;  %v7802_v13 = vadd.f32 %v7265_v30, %v9526_v4  ;;  %v6935_v1 = vpack.c.bf16 %v3137_v31, %v3137_v31  ;;  %v3330_v54 = vrot.slane %v3326_v60, 4  ;;  %v3476_v31 = vld [vmem:[#allocation2 + $0x74] sm:$0x1] }
 0x1ce   : > { %v3497_v63 = vld [vmem:[#allocation2 + $0x48] sm:$0x1]  ;;  %v3138_v35 = vmax.f32 %v3118_v43, 0.0  ;;  %v7795_v33 = vadd.f32 %v7794_v62, %v9625_v36  ;;  %v3337_v4 = vor.u32 %v3335_v57, %v3334_v20  ;;  %v3339_v17 = vrot.slane %v3334_v20, 4 }
 0x1cf   : > { %v3498_v26 = vsel %vm9562_vm12, 0, %v3497_v63  ;;  %v3459_v41 = vsel %vm9555_vm11, %v3329_v3, %v3458_v39  ;;  %v7803_v19 = vadd.f32 %v7802_v13, %v9630_v6  ;;  %v3341_v10 = vshrl.u32 %v6935_v1, 16 }
 0x1d0   : > { %3499 = vst [vmem:[#allocation2 + $0x48] sm:$0x1] %v3498_v26  ;;  %3460 = vst [vmem:[#allocation2 + $0x54] sm:$0xf] %v3459_v41  ;;  %v3344_v24 = vshll.u32 %v6935_v1, 16  ;;  %v6936_v0 = vpack.c.bf16 %v3138_v35, %v3138_v35  ;;  %v3092_v18 = vmul.f32 %v7795_v33, %v9534_v8  ;;  %v3338_v36 = vsel %vm9570_vm13, %v3330_v54, %v3337_v4 }
 0x1d1   : > { %v3093_v46 = vmul.f32 %v7803_v19, %v9534_v8  ;;  %v3463_v6 = vsel %vm9562_vm12, %v3339_v17, %v3462_v11  ;;  %v3343_v53 = vrot.slane %v3341_v10, 7  ;;  %3461 = vst [vmem:[#allocation2 + $0x58] sm:$0xf] %v3338_v36  ;;  %v8203_v33 = vmov (!%p6704_p7), 0  }
 0x1d2   : > { %v3528_v22 = vld [vmem:[#allocation2 + $0x50] sm:$0x1]  ;;  %3464 = vst [vmem:[#allocation2 + $0x5c] sm:$0x1] %v3463_v6  ;;  %v3349_v48 = vshrl.u32 %v6936_v0, 16  ;;  %v3119_v38 = vadd.f32 %v9539_v32, %v3092_v18  ;;  %v3352_v45 = vshll.u32 %v6936_v0, 16 }
 0x1d3   : > { %v3529_v34 = vsel %vm9600_vm14, 0, %v3528_v22  ;;  %v3120_v49 = vadd.f32 %v9539_v32, %v3093_v46  ;;  %v3346_v8 = vor.u32 %v3344_v24, %v3343_v53  ;;  %v3347_v7 = vrot.slane %v3343_v53, 4  ;;  %3544 = vst [vmem:[#allocation2] sm:$0xf] (!%p6704_p7), %v8203_v33  ;;  %3545 = vst [vmem:[#allocation2 + $0x4] sm:$0xf] (!%p6704_p7), %v8203_v33 }
 0x1d4   : > { %3530 = vst [vmem:[#allocation2 + $0x50] sm:$0x1] %v3529_v34  ;;  %v3351_v47 = vrot.slane %v3349_v48, 7  ;;  %v3139_v52 = vmax.f32 %v3119_v38, 0.0  ;;  %3546 = vst [vmem:[#allocation2 + $0x8] sm:$0x1] (!%p6704_p7), %v8203_v33 }
 0x1d5   : > { %v3140_v9 = vmax.f32 %v3120_v49, 0.0  ;;  %v3466_v58 = vsel %vm9555_vm11, %v3346_v8, %v3465_v16 }
 0x1d6   : > { %3467 = vst [vmem:[#allocation2 + $0x60] sm:$0xf] %v3466_v58  ;;  %v3354_v37 = vor.u32 %v3352_v45, %v3351_v47  ;;  %v3356_v42 = vrot.slane %v3351_v47, 4  ;;  %v6937_v27 = vpack.c.bf16 %v3139_v52, %v3139_v52 }
 0x1d7   : > { %v3500_v56 = vld [vmem:[#allocation2 + $0x54] sm:$0x1]  ;;  %v6938_v5 = vpack.c.bf16 %v3140_v9, %v3140_v9 }
 0x1d8   : > { %v3501_v61 = vsel %vm9562_vm12, 0, %v3500_v56  ;;  %v3355_v32 = vsel %vm9570_vm13, %v3347_v7, %v3354_v37  ;;  %v3470_v12 = vsel %vm9562_vm12, %v3356_v42, %v3469_v21  ;;  %v3358_v2 = vshrl.u32 %v6937_v27, 16 }
 0x1d9   : > { %3502 = vst [vmem:[#allocation2 + $0x54] sm:$0x1] %v3501_v61  ;;  %v3531_v15 = vld [vmem:[#allocation2 + $0x5c] sm:$0x1]  ;;  %3468 = vst [vmem:[#allocation2 + $0x64] sm:$0xf] %v3355_v32 }
 0x1da   : > { %3471 = vst [vmem:[#allocation2 + $0x68] sm:$0x1] %v3470_v12  ;;  %v3366_v44 = vshrl.u32 %v6938_v5, 16  ;;  %v3532_v50 = vsel %vm9600_vm14, 0, %v3531_v15  ;;  %v3360_v60 = vrot.slane %v3358_v2, 7  ;;  %v3361_v40 = vshll.u32 %v6937_v27, 16 }
 0x1db   : > { %3533 = vst [vmem:[#allocation2 + $0x5c] sm:$0x1] %v3532_v50  ;;  %v3369_v39 = vshll.u32 %v6938_v5, 16 }
 0x1dc   : > { %v3368_v30 = vrot.slane %v3366_v44, 7  ;;  %v3363_v59 = vor.u32 %v3361_v40, %v3360_v60  ;;  %v3364_v3 = vrot.slane %v3360_v60, 4 }
 0x1dd   : > { %v3503_v43 = vld [vmem:[#allocation2 + $0x60] sm:$0x1] }
 0x1de   : > { %v3371_v62 = vor.u32 %v3369_v39, %v3368_v30  ;;  %v3373_v13 = vrot.slane %v3368_v30, 4  ;;  %v3504_v63 = vsel %vm9562_vm12, 0, %v3503_v43  ;;  %v3473_v20 = vsel %vm9555_vm11, %v3363_v59, %v3472_v14 }
 0x1df   : > { %3505 = vst [vmem:[#allocation2 + $0x60] sm:$0x1] %v3504_v63  ;;  %3474 = vst [vmem:[#allocation2 + $0x6c] sm:$0xf] %v3473_v20 }
 0x1e0   : > { %v3372_v57 = vsel %vm9570_vm13, %v3364_v3, %v3371_v62  ;;  %v3477_v1 = vsel %vm9562_vm12, %v3373_v13, %v3476_v31 }
 0x1e1   : > { %v3534_v35 = vld [vmem:[#allocation2 + $0x68] sm:$0x1]  ;;  %3475 = vst [vmem:[#allocation2 + $0x70] sm:$0xf] %v3372_v57  ;;  %3478 = vst [vmem:[#allocation2 + $0x74] sm:$0x1] %v3477_v1 }
 0x1e2   : > { %v3535_v26 = vsel %vm9600_vm14, 0, %v3534_v35 }
 0x1e3   : > { %3536 = vst [vmem:[#allocation2 + $0x68] sm:$0x1] %v3535_v26 }
 0x1e4   : > { %3543 = sbr.rel (%p6704_p7) target bundleno = 491 (0x1eb), region = 52 }
 0x1e6   : > { %v3506_v41 = vld [vmem:[#allocation2 + $0x6c] sm:$0x1] }
 0x1e7   : > { %v3507_v28 = vsel %vm9562_vm12, 0, %v3506_v41 }
 0x1e8   : > { %v3537_v11 = vld [vmem:[#allocation2 + $0x74] sm:$0x1]  ;;  %3508 = vst [vmem:[#allocation2 + $0x6c] sm:$0x1] %v3507_v28 }
 0x1e9   : > { %v3538_v25 = vsel %vm9600_vm14, 0, %v3537_v11 }
 0x1ea   : > { %3539 = vst [vmem:[#allocation2 + $0x74] sm:$0x1] %v3538_v25 }
 0x1eb PF: > { %p6705_p8 = scmp.ne.s32.totalorder %s8185_s24, 1 }
 0x1ec   : > { %v8204_v19 = vmov (!%p6705_p8), 0  }
 0x1ed   : > { %3550 = sbr.rel (%p6705_p8) target bundleno = 500 (0x1f4), region = 56  ;;  %3552 = vst [vmem:[#allocation2 + $0x6c] sm:$0xf] (!%p6705_p8), %v8204_v19  ;;  %3553 = vst [vmem:[#allocation2 + $0x70] sm:$0xf] (!%p6705_p8), %v8204_v19 }
 0x1ee   : > { %3554 = vst [vmem:[#allocation2 + $0x74] sm:$0x1] (!%p6705_p8), %v8204_v19 }
 0x1f4 PF: > { %v8067_v29 = vld [vmem:[%s10872_s4 + $0x100] sm:$0xff]   ;;  %v8070_v4 = vld [vmem:[%s10872_s4 + $0x108] sm:$0xff]   ;;  %v8073_v22 = vld [vmem:[%s10872_s4 + $0x110] sm:$0xff]  }
 0x1f5   : > { %v8068_v23 = vld [vmem:[%s10872_s4 + $0x140] sm:$0xff]   ;;  %7284 = vmatprep.subr.bf16.mxu0 %v8067_v29  ;;  %v8071_v17 = vld [vmem:[%s10872_s4 + $0x148] sm:$0xff]   ;;  %v8074_v24 = vld [vmem:[%s10872_s4 + $0x150] sm:$0xff]  }
 0x1f6   : > { %v8069_v54 = vld [vmem:[%s10872_s4 + $0xc0] sm:$0xff]   ;;  %7632 = vmatprep.subr.bf16.mxu1 %v8068_v23  ;;  %v8072_v10 = vld [vmem:[%s10872_s4 + $0xc8] sm:$0xff]   ;;  %v8075_v0 = vld [vmem:[%s10872_s4 + $0xd0] sm:$0xff]  }
 0x1f7   : > { %7285 = vmatpush3.bf16.msra.mxu0 %v8069_v54  ;;  %7633 = vmatpush3.bf16.msra.mxu1 %v8068_v23  ;;  %v8076_v18 = vld [vmem:[%s10872_s4 + $0x118] sm:$0xff]   ;;  %v8079_v36 = vld [vmem:[%s10872_s4 + $0x120] sm:$0xff]   ;;  %v8082_v16 = vld [vmem:[%s10872_s4 + $0x128] sm:$0xff]  }
 0x1f8   : > { %7286 = vmatprep.subr.bf16.mxu0 %v8070_v4  ;;  %7634 = vmatprep.subr.bf16.mxu1 %v8071_v17  ;;  %v8077_v46 = vld [vmem:[%s10872_s4 + $0x158] sm:$0xff]   ;;  %v8080_v6 = vld [vmem:[%s10872_s4 + $0x160] sm:$0xff]   ;;  %v8083_v48 = vld [vmem:[%s10872_s4 + $0x168] sm:$0xff]  }
 0x1f9   : > { %v8078_v34 = vld [vmem:[%s10872_s4 + $0xd8] sm:$0xff]   ;;  %v8081_v53 = vld [vmem:[%s10872_s4 + $0xe0] sm:$0xff]   ;;  %v8084_v38 = vld [vmem:[%s10872_s4 + $0xe8] sm:$0xff]  }
 0x1fa   : > { %v8085_v49 = vld [vmem:[%s10872_s4 + $0x130] sm:$0xff]   ;;  %v8088_v45 = vld [vmem:[%s10872_s4 + $0x138] sm:$0xff]   ;;  %v9836_v9 = vld [vmem:[#allocation2 + $0xc] sm:$0xf] }
 0x1fb   : > { %7287 = vmatpush3.bf16.msra.mxu0 %v8072_v10  ;;  %7635 = vmatpush3.bf16.msra.mxu1 %v8071_v17  ;;  %v8086_v8 = vld [vmem:[%s10872_s4 + $0x170] sm:$0xff]   ;;  %v8089_v52 = vld [vmem:[%s10872_s4 + $0x178] sm:$0xff]   ;;  %v4021_v21 = vshrl.u32 %v9836_v9, 16  ;;  %v4024_v56 = vshll.u32 %v9836_v9, 16  ;;  %v6738_v32 = vrot.slane %v9836_v9, 9  ;;  %v8092_v63 = vld [vmem:[%s10872_s4 + $0x80] sm:$0xff]  }
 0x1fc   : > { %7288 = vmatprep.subr.bf16.mxu0 %v8073_v22  ;;  %7636 = vmatprep.subr.bf16.mxu1 %v8074_v24  ;;  %v8087_v47 = vld [vmem:[%s10872_s4 + $0xf0] sm:$0xff]   ;;  %v9844_v27 = vld [vmem:[#allocation2 + $0x18] sm:$0xf]  ;;  %v9851_v15 = vld [vmem:[#allocation2 + $0x1c] sm:$0xf] }
 0x1fd   : > { %v9838_v7 = vld [vmem:[#allocation2 + $0x10] sm:$0xf]  ;;  %v3998_v58 = vld [vmem:[#allocation2 + $0x14] sm:$0x1]  ;;  %v8090_v5 = vld [vmem:[%s10872_s4 + $0xf8] sm:$0xff]   ;;  %v4023_v44 = vrot.slane %v4021_v21, 4 }
 0x1fe   : > { %v4030_v37 = vshll.u32 %v9838_v7, 16  ;;  %v4034_v42 = vshrl.u32 %v9838_v7, 16  ;;  %v4040_v61 = vshll.u32 %v3998_v58, 16  ;;  %v4238_v12 = vrot.slane %v9838_v7, 5  ;;  %v4001_v14 = vld [vmem:[#allocation2 + $0x20] sm:$0x1] }
 0x1ff   : > { %7289 = vmatpush3.bf16.msra.mxu0 %v8075_v0  ;;  %7637 = vmatpush3.bf16.msra.mxu1 %v8074_v24  ;;  %v4241_v2 = vrot.slane %v3998_v58, 5  ;;  %v4026_v50 = vrot.slane %v4024_v56, 5  ;;  %v6746_v31 = vcombine.low %v9836_v9, %v9838_v7  ;;  %v6739_v62 = vrot.slane %v9844_v27, 9  ;;  %v9868_v25 = vld [vmem:[#allocation2 + $0x24] sm:$0xf] }
 0x200   : > { %7290 = vmatprep.subr.bf16.mxu0 %v8076_v18  ;;  %7638 = vmatprep.subr.bf16.mxu1 %v8077_v46  ;;  %v4032_v60 = vrot.slane %v4030_v37, 5  ;;  %v4036_v40 = vrot.slane %v4034_v42, 4  ;;  %v4042_v30 = vrot.slane %v4040_v61, 5  ;;  %v4239_v39 = vsel %vm8851_vm5, %v6738_v32, %v4238_v12  ;;  %v9870_v33 = vld [vmem:[#allocation2 + $0x28] sm:$0xf]  ;;  %v8095_v37 = vld [vmem:[%s10872_s4 + $0x90] sm:$0xff]  }
 0x201   : > { %v4240_v59 = vrot.slane %v4238_v12, 4  ;;  %v4027_v43 = vor.u32 %v4026_v50, %v4023_v44  ;;  %v4245_v13 = vrot.slane %v9851_v15, 5  ;;  %v4248_v57 = vrot.slane %v4001_v14, 5  ;;  %v9873_v4 = vld [vmem:[#allocation2 + $0x2c] sm:$0x1] }
 0x202   : > { %v4037_v3 = vor.u32 %v4036_v40, %v4032_v60  ;;  %v4045_v1 = vshrl.u32 %v9844_v27, 16  ;;  %v4048_v35 = vshll.u32 %v9844_v27, 16  ;;  %v4054_v54 = vshll.u32 %v9851_v15, 16  ;;  %v9880_v0 = vld [vmem:[#allocation2 + $0x30] sm:$0xf]  ;;  %v8102_v40 = vld [vmem:[%s10872_s4 + $0x40] sm:$0xff]  }
 0x203   : > { %7291 = vmatpush3.bf16.msra.mxu0 %v8078_v34  ;;  %7639 = vmatpush3.bf16.msra.mxu1 %v8077_v46  ;;  %v4242_v20 = vsel %vm8851_vm5, %v4240_v59, %v4241_v2  ;;  %v4028_v26 = vrot.slane %v4027_v43, 4  ;;  %v4246_v11 = vsel %vm8851_vm5, %v6739_v62, %v4245_v13  ;;  %v4247_v19 = vrot.slane %v4245_v13, 4  ;;  %v9882_v18 = vld [vmem:[#allocation2 + $0x34] sm:$0xf]  ;;  %v9907_v32 = vld [vmem:[#allocation2 + $0x3c] sm:$0xf] }
 0x204   : > { %7292 = vmatprep.subr.bf16.mxu0 %v8079_v36  ;;  %7640 = vmatprep.subr.bf16.mxu1 %v8080_v6  ;;  %v4038_v41 = vrot.slane %v4037_v3, 4  ;;  %v6762_v28 = vcombine.low %v4239_v39, %v4242_v20  ;;  %v4047_v29 = vrot.slane %v4045_v1, 4  ;;  %v4050_v23 = vrot.slane %v4048_v35, 5  ;;  %v9909_v12 = vld [vmem:[#allocation2 + $0x40] sm:$0xf] }
 0x205   : > { %v4033_v17 = vsel %vm8412_vm2, %v4028_v26, %v4032_v60  ;;  %v4058_v22 = vshrl.u32 %v9851_v15, 16  ;;  %v4064_v24 = vshll.u32 %v4001_v14, 16  ;;  %v4249_v34 = vsel %vm8851_vm5, %v4247_v19, %v4248_v57  ;;  %v9914_v60 = vld [vmem:[#allocation2 + $0x44] sm:$0x1]  ;;  %v9932_v20 = vld [vmem:[#allocation2 + $0x4c] sm:$0xf] }
 0x206   : > { %v4043_v10 = vsel %vm8412_vm2, %v4038_v41, %v4042_v30  ;;  %7648 = vmatprep.mubr.bf16.mxu1 %v6762_v28  ;;  %v4051_v36 = vor.u32 %v4050_v23, %v4047_v29  ;;  %v6747_v9 = vcombine.low %v9844_v27, %v9851_v15  ;;  %v6741_v58 = vrot.slane %v9880_v0, 9  ;;  %v8103_v43 = vld [vmem:[%s10872_s4] sm:$0xff]   ;;  %v9934_v57 = vld [vmem:[#allocation2 + $0x50] sm:$0x1]  ;;  %v8096_v28 = vld [vmem:[%s10872_s4 + $0x98] sm:$0xff]  }
 0x207   : > { %7293 = vmatpush3.bf16.msra.mxu0 %v8081_v53  ;;  %7641 = vmatpush3.bf16.msra.mxu1 %v8080_v6  ;;  %v6754_v46 = vcombine.low %v4033_v17, %v4043_v10  ;;  %v4056_v6 = vrot.slane %v4054_v54, 5  ;;  %v9886_v53 = vld [vmem:[#allocation2 + $0x38] sm:$0x1]  ;;  %v4259_v21 = vrot.slane %v9882_v18, 5  ;;  %v4069_v61 = vshrl.u32 %v9868_v25, 16 }
 0x208   : > { %7294 = vmatprep.subr.bf16.mxu0 %v8082_v16  ;;  %7642 = vmatprep.subr.bf16.mxu1 %v8083_v48  ;;  %v6763_v16 = vcombine.low %v4246_v11, %v4249_v34  ;;  %v4262_v56 = vrot.slane %v9886_v53, 5  ;;  %v4072_v50 = vshll.u32 %v9868_v25, 16  ;;  %v4078_v39 = vshll.u32 %v9870_v33, 16 }
 0x209   : > { %4612 = vmatprep.mubr.bf16.mxu0 %v6754_v46  ;;  %v4260_v15 = vsel %vm8851_vm5, %v6741_v58, %v4259_v21  ;;  %v4261_v44 = vrot.slane %v4259_v21, 4  ;;  %v4071_v30 = vrot.slane %v4069_v61, 4  ;;  %v4082_v59 = vshrl.u32 %v9870_v33, 16 }
 0x20a   : > { %v4080_v26 = vrot.slane %v4078_v39, 5  ;;  %v4088_v19 = vshll.u32 %v9873_v4, 16  ;;  %v6742_v29 = vrot.slane %v9907_v32, 9  ;;  %v4266_v23 = vrot.slane %v9909_v12, 5  ;;  %v8109_v39 = vld [vmem:[%s10872_s4 + $0x8] sm:$0xff]  }
 0x20b   : > { %7295 = vmatpush3.bf16.msra.mxu0 %v8084_v38  ;;  %7643 = vmatpush3.bf16.msra.mxu1 %v8083_v48  ;;  %v8093_v48 = vld [vmem:[%s10872_s4 + $0x88] sm:$0xff]   ;;  %v4060_v38 = vrot.slane %v4058_v22, 4  ;;  %v4263_v13 = vsel %vm8851_vm5, %v4261_v44, %v4262_v56  ;;  %v4084_v41 = vrot.slane %v4082_v59, 4  ;;  %v4269_v17 = vrot.slane %v9914_v60, 5 }
 0x20c   : > { %7296 = vmatprep.subr.bf16.mxu0 %v8085_v49  ;;  %7644 = vmatprep.subr.bf16.mxu1 %v8086_v8  ;;  %v4066_v49 = vrot.slane %v4064_v24, 5  ;;  %v6765_v35 = vcombine.low %v4260_v15, %v4263_v13  ;;  %v6748_v10 = vcombine.low %v9868_v25, %v9870_v33  ;;  %v4090_v46 = vrot.slane %v4088_v19, 5  ;;  %v9982_v44 = vld [vmem:[#allocation2 + $0x68] sm:$0x1] }
 0x20d   : > { %v4061_v7 = vor.u32 %v4060_v38, %v4056_v6  ;;  %v4085_v54 = vor.u32 %v4084_v41, %v4080_v26  ;;  %v4268_v34 = vrot.slane %v4266_v23, 4  ;;  %v9956_v38 = vld [vmem:[#allocation2 + $0x58] sm:$0xf] }
 0x20f   : > { %7297 = vmatpush3.bf16.msra.mxu0 %v8087_v47  ;;  %7645 = vmatpush3.bf16.msra.mxu1 %v8086_v8  ;;  %v6740_v8 = vrot.slane %v9868_v25, 9  ;;  %v4052_v47 = vrot.slane %v4051_v36, 4  ;;  %v4062_v2 = vrot.slane %v4061_v7, 4  ;;  %v8098_v36 = vld [vmem:[%s10872_s4 + $0xa0] sm:$0xff]   ;;  %v4273_v25 = vrot.slane %v9932_v20, 5 }
 0x210   : > { %7298 = vmatprep.subr.bf16.mxu0 %v8088_v45  ;;  %7646 = vmatprep.subr.bf16.mxu1 %v8089_v52  ;;  %v4252_v45 = vrot.slane %v9870_v33, 5  ;;  %v4276_v33 = vrot.slane %v9934_v57, 5 }
 0x211   : > { %v4057_v42 = vsel %vm8412_vm2, %v4052_v47, %v4056_v6  ;;  %v4067_v3 = vsel %vm8412_vm2, %v4062_v2, %v4066_v49  ;;  %v9951_v6 = vld [vmem:[#allocation2 + $0x54] sm:$0xf]  ;;  %v4096_v47 = vshll.u32 %v9880_v0, 16  ;;  %v4275_v56 = vrot.slane %v4273_v25, 4 }
 0x212   : > { %v4253_v27 = vsel %vm8851_vm5, %v6740_v8, %v4252_v45  ;;  %v6755_v1 = vcombine.low %v4057_v42, %v4067_v3  ;;  %v4270_v8 = vsel %vm8851_vm5, %v4268_v34, %v4269_v17  ;;  %v8108_v42 = vld [vmem:[%s10872_s4 + $0x48] sm:$0xff]   ;;  %v4280_v3 = vrot.slane %v9956_v38, 5  ;;  %v10019_v34 = vld [vmem:[#allocation2 + $0x4] sm:$0xf] }
 0x213   : > { %7299 = vmatpush3.bf16.msra.mxu0 %v8090_v5  ;;  %7647 = vmatpush3.bf16.msra.mxu1 %v8089_v52  ;;  %v4255_v52 = vrot.slane %v9873_v4, 5  ;;  %v4254_v5 = vrot.slane %v4252_v45, 4  ;;  %v4267_v4 = vsel %vm8851_vm5, %v6742_v29, %v4266_v23  ;;  %v4102_v45 = vshll.u32 %v9882_v18, 16  ;;  %v8101_v23 = vld [vmem:[%s10872_s4 + $0xb0] sm:$0xff]  }
 0x214   : > { %7664 = vmatprep.subr.bf16.mxu1 %v8092_v63  ;;  %7364 = vmatprep.subr.bf16.mxu0 %v8102_v40  ;;  %v6766_v58 = vcombine.low %v4267_v4, %v4270_v8  ;;  %v4098_v2 = vrot.slane %v4096_v47, 5  ;;  %v4106_v40 = vshrl.u32 %v9882_v18, 16  ;;  %v4282_v41 = vrot.slane %v4280_v3, 4  ;;  %v10017_v4 = vld [vmem:[#allocation2] sm:$0xf] }
 0x215   : > { %v4256_v14 = vsel %vm8851_vm5, %v4254_v5, %v4255_v52  ;;  %v9964_v52 = vld [vmem:[#allocation2 + $0x5c] sm:$0x1]  ;;  %v8099_v5 = vld [vmem:[%s10872_s4 + $0xa8] sm:$0xff]   ;;  %v9980_v15 = vrot.slane %v4102_v45, 5  ;;  %v4290_v29 = vrot.slane %v9982_v44, 5  ;;  %v4120_v17 = vshll.u32 %v9907_v32, 16 }
 0x216   : > { %4613 = vmatmul.mubr.bf16.vlgmr.msra.gmra.mrb[100].mxu0 %v6746_v31  ;;  %7649 = vmatmul.mubr.bf16.vlgmr.msra.gmra.mrb[60].mxu1 %v6763_v16  ;;  %v9923_v31 = vld [vmem:[#allocation2 + $0x48] sm:$0xf]  ;;  %v6764_v62 = vcombine.low %v4253_v27, %v4256_v14  ;;  %v4086_v16 = vrot.slane %v4085_v54, 4  ;;  %v4112_v14 = vshll.u32 %v9886_v53, 16  ;;  %v4108_v13 = vrot.slane %v4106_v40, 4 }
 0x217   : > { %7665 = vmatpush3.bf16.msra.mxu1 %v8092_v63  ;;  %v4074_v63 = vrot.slane %v4072_v50, 5  ;;  %7365 = vmatpush3.bf16.msra.mxu0 %v8103_v43  ;;  %v6743_v22 = vrot.slane %v9923_v31, 9  ;;  %v4277_v50 = vsel %vm8851_vm5, %v4275_v56, %v4276_v33  ;;  %v4117_v54 = vshrl.u32 %v9907_v32, 16 }
 0x218   : > { %7666 = vmatprep.subr.bf16.mxu1 %v8093_v48  ;;  %7652 = vmatprep.mubr.bf16.mxu1 %v6764_v62  ;;  %v4091_v7 = vsel %vm8412_vm2, %v4086_v16, %v4090_v46  ;;  %v4283_v62 = vrot.slane %v9964_v52, 5  ;;  %v4109_v19 = vor.u32 %v4108_v13, %v9980_v15  ;;  %v4126_v47 = vshll.u32 %v9909_v12, 16 }
 0x219   : > { %v4075_v11 = vor.u32 %v4074_v63, %v4071_v30  ;;  %4620 = vmatprep.mubr.bf16.mxu0 %v6755_v1  ;;  %v4274_v21 = vsel %vm8851_vm5, %v6743_v22, %v4273_v25  ;;  %v6744_v30 = vrot.slane %v9951_v6, 9  ;;  %v4114_v63 = vrot.slane %v4112_v14, 5  ;;  %7366 = vmatprep.subr.bf16.mxu0 %v8108_v42  ;;  %v8119_v14 = vld [vmem:[%s10872_s4 + $0x18] sm:$0xff]  }
 0x21a   : > { %v6767_v59 = vcombine.low %v4274_v21, %v4277_v50  ;;  %v6749_v1 = vcombine.low %v9880_v0, %v9882_v18  ;;  %v4284_v22 = vsel %vm8851_vm5, %v4282_v41, %v4283_v62  ;;  %v4110_v16 = vrot.slane %v4109_v19, 4  ;;  %v8117_v21 = vld [vmem:[%s10872_s4 + $0x58] sm:$0xff]  }
 0x21b   : > { %7667 = vmatpush3.bf16.msra.mxu1 %v8093_v48  ;;  %v4076_v24 = vrot.slane %v4075_v11, 4  ;;  %v4093_v48 = vshrl.u32 %v9880_v0, 16  ;;  %v8113_v11 = vld [vmem:[%s10872_s4 + $0x50] sm:$0xff]   ;;  %7367 = vmatpush3.bf16.msra.mxu0 %v8109_v39  ;;  %v4119_v33 = vrot.slane %v4117_v54, 4  ;;  %v4130_v45 = vshrl.u32 %v9909_v12, 16  ;;  %v8104_v50 = vld [vmem:[%s10872_s4 + $0xb8] sm:$0xff]  }
 0x21c   : > { %7668 = vmatprep.subr.bf16.mxu1 %v8095_v37  ;;  %7368 = vmatprep.subr.bf16.mxu0 %v8113_v11  ;;  %v4115_v56 = vsel %vm8412_vm2, %v4110_v16, %v4114_v63  ;;  %v4128_v40 = vrot.slane %v4126_v47, 5  ;;  %v6750_v18 = vcombine.low %v9907_v32, %v9909_v12  ;;  %v4144_v12 = vshll.u32 %v9923_v31, 16  ;;  %v10086_v16 = vld [vmem:[#allocation2 + $0x18] sm:$0xf] }
 0x21d   : > { %v4081_v49 = vsel %vm8412_vm2, %v4076_v24, %v4080_v26  ;;  %v4095_v61 = vrot.slane %v4093_v48, 4  ;;  %v4281_v26 = vsel %vm8851_vm5, %v6744_v30, %v4280_v3  ;;  %v4122_v48 = vrot.slane %v4120_v17, 5 }
 0x21e   : > { %4621 = vmatmul.mubr.bf16.gmra.mrb[104].mxu0 %v6747_v9  ;;  %7653 = vmatmul.mubr.bf16.gmra.mrb[64].mxu1 %v6765_v35  ;;  %v9966_v9 = vld [vmem:[#allocation2 + $0x60] sm:$0xf]  ;;  %v6756_v27 = vcombine.low %v4081_v49, %v4091_v7  ;;  %v6768_v25 = vcombine.low %v4281_v26, %v4284_v22  ;;  %v10024_v49 = vld [vmem:[#allocation2 + $0x8] sm:$0x1]  ;;  %v4136_v7 = vshll.u32 %v9914_v60, 16  ;;  %v6708_v47 = vrot.slane %v10086_v16, 9 }
 0x21f   : > { %7669 = vmatpush3.bf16.msra.mxu1 %v8095_v37  ;;  %v9972_v37 = vld [vmem:[#allocation2 + $0x64] sm:$0xf]  ;;  %7656 = vmatprep.mubr.bf16.mxu1 %v6766_v58  ;;  %v4099_v43 = vor.u32 %v4098_v2, %v4095_v61  ;;  %v6745_v53 = vrot.slane %v9966_v9, 9  ;;  %v10031_v58 = vld [vmem:[#allocation2 + $0xc] sm:$0xf]  ;;  %v6706_v61 = vrot.slane %v10017_v4, 9 }
 0x220   : > { %7670 = vmatprep.subr.bf16.mxu1 %v8096_v28  ;;  %4628 = vmatprep.mubr.bf16.mxu0 %v6756_v27  ;;  %v4123_v27 = vor.u32 %v4122_v48, %v4119_v33  ;;  %v10039_v2 = vld [vmem:[#allocation2 + $0x10] sm:$0xf]  ;;  %v4138_v39 = vrot.slane %v4136_v7, 5  ;;  %v6707_v62 = vrot.slane %v10031_v58, 9  ;;  %v8110_v22 = vld [vmem:[%s10872_s4 + $0x1c8] sm:$0xff]   ;;  %v4154_v33 = vshrl.u32 %v9932_v20, 16 }
 0x221   : > { %v4100_v35 = vrot.slane %v4099_v43, 4  ;;  %v3800_v43 = vrot.slane %v10024_v49, 5  ;;  %v3804_v13 = vrot.slane %v10039_v2, 5  ;;  %v4160_v48 = vshll.u32 %v9934_v57, 16  ;;  %v8111_v7 = vld [vmem:[%s10872_s4 + $0x188] sm:$0xff]  }
 0x222   : > { %v4124_v30 = vrot.slane %v4123_v27, 4  ;;  %v4165_v27 = vshrl.u32 %v9951_v6, 16 }
 0x223   : > { %7671 = vmatpush3.bf16.msra.mxu1 %v8096_v28  ;;  %v4287_v28 = vrot.slane %v9972_v37, 5  ;;  %v3806_v54 = vrot.slane %v3804_v13, 4  ;;  %v4162_v57 = vrot.slane %v4160_v48, 5 }
 0x224   : > { %7672 = vmatprep.subr.bf16.mxu1 %v8098_v36  ;;  %v4129_v11 = vsel %vm8412_vm2, %v4124_v30, %v4128_v40  ;;  %v10109_v30 = vld [vmem:[#allocation2 + $0x24] sm:$0xf] }
 0x225   : > { %v4288_v24 = vsel %vm8851_vm5, %v6745_v53, %v4287_v28  ;;  %v4289_v46 = vrot.slane %v4287_v28, 4  ;;  %v8106_v53 = vld [vmem:[%s10872_s4 + $0x1c0] sm:$0xff]   ;;  %v4141_v28 = vshrl.u32 %v9923_v31, 16 }
 0x226   : > { %4629 = vmatmul.mubr.bf16.gmra.mrb[108].mxu0 %v6748_v10  ;;  %7657 = vmatmul.mubr.bf16.gmra.mrb[68].mxu1 %v6767_v59  ;;  %v4105_v10 = vsel %vm8412_vm2, %v4100_v35, %v9980_v15  ;;  %v10041_v15 = vld [vmem:[#allocation2 + $0x14] sm:$0x1]  ;;  %v3797_v59 = vrot.slane %v10019_v34, 5  ;;  %v8122_v35 = vld [vmem:[%s10872_s4 + $0x60] sm:$0xff]  }
 0x227   : > { %7673 = vmatpush3.bf16.msra.mxu1 %v8098_v36  ;;  %v8115_v36 = vld [vmem:[%s10872_s4 + $0x10] sm:$0xff]   ;;  %v4291_v8 = vsel %vm8851_vm5, %v4289_v46, %v4290_v29  ;;  %7660 = vmatprep.mubr.bf16.mxu1 %v6768_v25  ;;  %v6757_v60 = vcombine.low %v4105_v10, %v4115_v56  ;;  %v3807_v63 = vrot.slane %v10041_v15, 5  ;;  %v3805_v29 = vsel %vm8851_vm5, %v6707_v62, %v3804_v13  ;;  %v10088_v25 = vld [vmem:[#allocation2 + $0x1c] sm:$0xf] }
 0x228   : > { %7674 = vmatprep.subr.bf16.mxu1 %v8099_v5  ;;  %v6769_v42 = vcombine.low %v4288_v24, %v4291_v8  ;;  %7369 = vmatpush3.bf16.msra.mxu0 %v8115_v36  ;;  %v3798_v26 = vsel %vm8851_vm5, %v6706_v61, %v3797_v59  ;;  %v3799_v41 = vrot.slane %v3797_v59, 4  ;;  %v4143_v24 = vrot.slane %v4141_v28, 4  ;;  %v10092_v8 = vld [vmem:[#allocation2 + $0x20] sm:$0x1]  ;;  %v10113_v59 = vld [vmem:[#allocation2 + $0x2c] sm:$0x1] }
 0x229   : > { %7370 = vmatprep.subr.bf16.mxu0 %v8117_v21  ;;  %4636 = vmatprep.mubr.bf16.mxu0 %v6757_v60  ;;  %v3808_v10 = vsel %vm8851_vm5, %v3806_v54, %v3807_v63  ;;  %v4150_v36 = vshll.u32 %v9932_v20, 16  ;;  %v4146_v21 = vrot.slane %v4144_v12, 5  ;;  %v4156_v61 = vrot.slane %v4154_v33, 4  ;;  %v8118_v54 = vld [vmem:[%s10872_s4 + $0x1d8] sm:$0xff]  }
 0x22a   : > { %v3801_v0 = vsel %vm8851_vm5, %v3799_v41, %v3800_v43  ;;  %v6731_v32 = vcombine.low %v3805_v29, %v3808_v10  ;;  %v6709_v62 = vrot.slane %v10109_v30, 9  ;;  %v4167_v10 = vrot.slane %v4165_v27, 4  ;;  %v10149_v33 = vld [vmem:[#allocation2 + $0x38] sm:$0x1]  ;;  %v10157_v27 = vld [vmem:[#allocation2 + $0x3c] sm:$0xf] }
 0x22b   : > { %7675 = vmatpush3.bf16.msra.mxu1 %v8099_v5  ;;  %v4132_v5 = vrot.slane %v4130_v45, 4  ;;  %v6730_v17 = vcombine.low %v3798_v26, %v3801_v0  ;;  %v3811_v45 = vrot.slane %v10088_v25, 5  ;;  %v4152_v56 = vrot.slane %v4150_v36, 5  ;;  %v10147_v36 = vld [vmem:[#allocation2 + $0x34] sm:$0xf] }
 0x22c   : > { %7676 = vmatprep.subr.bf16.mxu1 %v8101_v23  ;;  %7371 = vmatpush3.bf16.msra.mxu0 %v8119_v14  ;;  %v4147_v14 = vor.u32 %v4146_v21, %v4143_v24  ;;  %v8120_v24 = vld [vmem:[%s10872_s4 + $0x198] sm:$0xff]   ;;  %v4184_v12 = vshll.u32 %v9964_v52, 16  ;;  %v3825_v21 = vrot.slane %v10147_v36, 5 }
 0x22d   : > { %v4133_v3 = vor.u32 %v4132_v5, %v4128_v40  ;;  %7372 = vmatprep.subr.bf16.mxu0 %v8122_v35  ;;  %v3812_v60 = vsel %vm8851_vm5, %v6708_v47, %v3811_v45  ;;  %v8114_v40 = vld [vmem:[%s10872_s4 + $0x1d0] sm:$0xff]   ;;  %v8124_v5 = vld [vmem:[%s10872_s4 + $0x20] sm:$0xff]   ;;  %v4157_v43 = vor.u32 %v4156_v61, %v4152_v56  ;;  %v3821_v35 = vrot.slane %v10113_v59, 5  ;;  %v8126_v61 = vld [vmem:[%s10872_s4 + $0x68] sm:$0xff]  }
 0x22e   : > { %7661 = vmatmul.mubr.bf16.gmra.mrb[72].mxu1 %v6769_v42  ;;  %4637 = vmatmul.mubr.bf16.gmra.mrb[112].mxu0 %v6749_v1  ;;  %v8107_v1 = vld [vmem:[%s10872_s4 + $0x180] sm:$0xff]   ;;  %v3814_v42 = vrot.slane %v10092_v8, 5  ;;  %v4148_v63 = vrot.slane %v4147_v14, 4  ;;  %v4186_v52 = vrot.slane %v4184_v12, 5  ;;  %v4208_v12 = vshll.u32 %v9982_v44, 16  ;;  %v8131_v44 = vld [vmem:[%s10872_s4 + $0x70] sm:$0xff]  }
 0x22f   : > { %7677 = vmatpush3.bf16.msra.mxu1 %v8101_v23  ;;  %v4134_v19 = vrot.slane %v4133_v3, 4  ;;  %7680 = vmatprep.mubr.bf16.mxu1 %v6730_v17  ;;  %v4158_v41 = vrot.slane %v4157_v43, 4  ;;  %v8123_v47 = vld [vmem:[%s10872_s4 + $0x1e0] sm:$0xff]   ;;  %v6711_v43 = vrot.slane %v10157_v27, 9 }
 0x230   : > { %7678 = vmatprep.subr.bf16.mxu1 %v8104_v50  ;;  %7373 = vmatpush3.bf16.msra.mxu0 %v8124_v5  ;;  %v4153_v29 = vsel %vm8412_vm2, %v4148_v63, %v4152_v56  ;;  %v10166_v5 = vld [vmem:[#allocation2 + $0x40] sm:$0xf]  ;;  %v10168_v14 = vld [vmem:[#allocation2 + $0x44] sm:$0x1] }
 0x231   : > { %v4139_v23 = vsel %vm8412_vm2, %v4134_v19, %v4138_v39  ;;  %v10111_v39 = vld [vmem:[#allocation2 + $0x28] sm:$0xf]  ;;  %v8116_v19 = vld [vmem:[%s10872_s4 + $0x190] sm:$0xff]   ;;  %v4163_v0 = vsel %vm8412_vm2, %v4158_v41, %v4162_v57  ;;  %v8125_v63 = vld [vmem:[%s10872_s4 + $0x1a0] sm:$0xff]   ;;  %7374 = vmatprep.subr.bf16.mxu0 %v8126_v61 }
 0x232   : > { %v6758_v46 = vcombine.low %v4129_v11, %v4139_v23  ;;  %v3818_v13 = vrot.slane %v10111_v39, 5  ;;  %v6717_v26 = vcombine.low %v10109_v30, %v10111_v39  ;;  %v6759_v23 = vcombine.low %v4153_v29, %v4163_v0  ;;  %v8127_v0 = vld [vmem:[%s10872_s4 + $0x1e8] sm:$0xff]  }
 0x233   : > { %7679 = vmatpush3.bf16.msra.mxu1 %v8104_v50  ;;  %v3813_v50 = vrot.slane %v3811_v45, 4 }
 0x234   : > { %7444 = vmatprep.subr.bf16.mxu1 %v8106_v53  ;;  %4644 = vmatprep.mubr.bf16.mxu0 %v6758_v46  ;;  %v3819_v28 = vsel %vm8851_vm5, %v6709_v62, %v3818_v13  ;;  %v3820_v11 = vrot.slane %v3818_v13, 4  ;;  %v4174_v46 = vshll.u32 %v9956_v38, 16  ;;  %v3832_v62 = vrot.slane %v10166_v5, 5 }
 0x235   : > { %v3815_v3 = vsel %vm8851_vm5, %v3813_v50, %v3814_v42  ;;  %v3828_v42 = vrot.slane %v10149_v33, 5  ;;  %v3835_v13 = vrot.slane %v10168_v14, 5 }
 0x236   : > { %7681 = vmatmul.mubr.bf16.vlgmr.msra.gmra.mrb[60].mxu1 %v6731_v32  ;;  %4645 = vmatmul.mubr.bf16.gmra.mrb[116].mxu0 %v6750_v18  ;;  %v6732_v53 = vcombine.low %v3812_v60, %v3815_v3  ;;  %v6751_v18 = vcombine.low %v9923_v31, %v9932_v20  ;;  %v4178_v32 = vshrl.u32 %v9956_v38, 16  ;;  %v10145_v31 = vld [vmem:[#allocation2 + $0x30] sm:$0xf]  ;;  %v4176_v45 = vrot.slane %v4174_v46, 5 }
 0x237   : > { %7445 = vmatpush3.bf16.msra.mxu1 %v8107_v1  ;;  %v3822_v1 = vsel %vm8851_vm5, %v3820_v11, %v3821_v35  ;;  %4652 = vmatprep.mubr.bf16.mxu0 %v6759_v23  ;;  %v6710_v48 = vrot.slane %v10145_v31, 9  ;;  %v6718_v57 = vcombine.low %v10145_v31, %v10147_v36  ;;  %v3833_v29 = vsel %vm8851_vm5, %v6711_v43, %v3832_v62  ;;  %v8129_v23 = vld [vmem:[%s10872_s4 + $0x1a8] sm:$0xff]   ;;  %v10218_v43 = vld [vmem:[#allocation2 + $0x54] sm:$0xf] }
 0x238   : > { %7446 = vmatprep.subr.bf16.mxu1 %v8110_v22  ;;  %7684 = vmatprep.mubr.bf16.mxu1 %v6732_v53  ;;  %v6733_v17 = vcombine.low %v3819_v28, %v3822_v1  ;;  %v4168_v22 = vshll.u32 %v9951_v6, 16  ;;  %v6719_v53 = vcombine.low %v10157_v27, %v10166_v5  ;;  %v8128_v28 = vld [vmem:[%s10872_s4 + $0x28] sm:$0xff]   ;;  %v6752_v1 = vcombine.low %v9951_v6, %v9956_v38 }
 0x239   : > { %v3826_v50 = vsel %vm8851_vm5, %v6710_v48, %v3825_v21  ;;  %7375 = vmatpush3.bf16.msra.mxu0 %v8128_v28  ;;  %v4192_v46 = vshll.u32 %v9966_v9, 16  ;;  %v4198_v6 = vshll.u32 %v9972_v37, 16  ;;  %v4202_v38 = vshrl.u32 %v9972_v37, 16  ;;  %v10208_v48 = vld [vmem:[#allocation2 + $0x50] sm:$0x1] }
 0x23a   : > { %v4170_v20 = vrot.slane %v4168_v22, 5  ;;  %v3842_v61 = vrot.slane %v10208_v48, 5  ;;  %7376 = vmatprep.subr.bf16.mxu0 %v8131_v44  ;;  %v8132_v28 = vld [vmem:[%s10872_s4 + $0x1f0] sm:$0xff]   ;;  %v10267_v44 = vld [vmem:[#allocation2 + $0x18] sm:$0xf] }
 0x23b   : > { %7447 = vmatpush3.bf16.msra.mxu1 %v8111_v7  ;;  %v4180_v7 = vrot.slane %v4178_v32, 4  ;;  %v10203_v32 = vld [vmem:[#allocation2 + $0x48] sm:$0xf] }
 0x23c   : > { %7448 = vmatprep.subr.bf16.mxu1 %v8114_v40  ;;  %v4171_v56 = vor.u32 %v4170_v20, %v4167_v10  ;;  %v3827_v40 = vrot.slane %v3825_v21, 4  ;;  %v10206_v20 = vld [vmem:[#allocation2 + $0x4c] sm:$0xf]  ;;  %v4204_v21 = vrot.slane %v4202_v38, 4  ;;  %v8135_v38 = vld [vmem:[%s10872_s4 + $0x78] sm:$0xff]  }
 0x23d   : > { %v4181_v60 = vor.u32 %v4180_v7, %v4176_v45  ;;  %v4194_v7 = vrot.slane %v4192_v46, 5 }
 0x23e   : > { %7685 = vmatmul.mubr.bf16.gmra.mrb[64].mxu1 %v6733_v17  ;;  %4653 = vmatmul.mubr.bf16.gmra.mrb[120].mxu0 %v6751_v18  ;;  %v4172_v3 = vrot.slane %v4171_v56, 4  ;;  %v3829_v41 = vsel %vm8851_vm5, %v3827_v40, %v3828_v42  ;;  %v4210_v56 = vrot.slane %v4208_v12, 5  ;;  %v3839_v42 = vrot.slane %v10206_v20, 5 }
 0x23f   : > { %7449 = vmatpush3.bf16.msra.mxu1 %v8116_v19  ;;  %v4182_v35 = vrot.slane %v4181_v60, 4  ;;  %v6734_v19 = vcombine.low %v3826_v50, %v3829_v41  ;;  %v6720_v60 = vcombine.low %v10203_v32, %v10206_v20  ;;  %v3580_v12 = vshrl.u32 %v10017_v4, 16 }
 0x240   : > { %7450 = vmatprep.subr.bf16.mxu1 %v8118_v54  ;;  %v4177_v11 = vsel %vm8412_vm2, %v4172_v3, %v4176_v45  ;;  %v3834_v54 = vrot.slane %v3832_v62, 4  ;;  %v10220_v3 = vld [vmem:[#allocation2 + $0x58] sm:$0xf]  ;;  %v10222_v62 = vld [vmem:[#allocation2 + $0x5c] sm:$0x1] }
 0x241   : > { %v4187_v18 = vsel %vm8412_vm2, %v4182_v35, %v4186_v52  ;;  %7688 = vmatprep.mubr.bf16.mxu1 %v6734_v19  ;;  %v4200_v52 = vrot.slane %v4198_v6, 5  ;;  %v6713_v35 = vrot.slane %v10218_v43, 9  ;;  %v3846_v41 = vrot.slane %v10220_v3, 5 }
 0x242   : > { %v6760_v17 = vcombine.low %v4177_v11, %v4187_v18  ;;  %v3836_v10 = vsel %vm8851_vm5, %v3834_v54, %v3835_v13  ;;  %v8133_v54 = vld [vmem:[%s10872_s4 + $0x30] sm:$0xff]  }
 0x243   : > { %7451 = vmatpush3.bf16.msra.mxu1 %v8120_v24  ;;  %v6735_v22 = vcombine.low %v3833_v29, %v3836_v10  ;;  %v4189_v24 = vshrl.u32 %v9966_v9, 16  ;;  %v4205_v40 = vor.u32 %v4204_v21, %v4200_v52  ;;  %v3849_v29 = vrot.slane %v10222_v62, 5  ;;  %7377 = vmatpush3.bf16.msra.mxu0 %v8133_v54 }
 0x244   : > { %7452 = vmatprep.subr.bf16.mxu1 %v8123_v47  ;;  %4660 = vmatprep.mubr.bf16.mxu0 %v6760_v17  ;;  %v6712_v47 = vrot.slane %v10203_v32, 9  ;;  %v3847_v18 = vsel %vm8851_vm5, %v6713_v35, %v3846_v41  ;;  %v6716_v35 = vcombine.low %v10086_v16, %v10088_v25 }
 0x245   : > { %v4191_v45 = vrot.slane %v4189_v24, 4  ;;  %v4206_v19 = vrot.slane %v4205_v40, 4  ;;  %v6753_v24 = vcombine.low %v9966_v9, %v9972_v37  ;;  %v3583_v9 = vshll.u32 %v10017_v4, 16  ;;  %7378 = vmatprep.subr.bf16.mxu0 %v8135_v38  ;;  %v8137_v37 = vld [vmem:[%s10872_s4 + $0x38] sm:$0xff]  }
 0x246   : > { %4661 = vmatmul.mubr.bf16.gmra.mrb[124].mxu0 %v6752_v1  ;;  %7689 = vmatmul.mubr.bf16.gmra.mrb[68].mxu1 %v6735_v22  ;;  %v3840_v13 = vsel %vm8851_vm5, %v6712_v47, %v3839_v42  ;;  %v3848_v1 = vrot.slane %v3846_v41, 4  ;;  %v6714_v40 = vcombine.low %v10017_v4, %v10019_v34 }
 0x247   : > { %7453 = vmatpush3.bf16.msra.mxu1 %v8125_v63  ;;  %v4195_v50 = vor.u32 %v4194_v7, %v4191_v45  ;;  %v3841_v63 = vrot.slane %v3839_v42, 4  ;;  %v4211_v10 = vsel %vm8412_vm2, %v4206_v19, %v4210_v56  ;;  %v8136_v45 = vld [vmem:[%s10872_s4 + $0x1f8] sm:$0xff]   ;;  %v3582_v7 = vrot.slane %v3580_v12, 4  ;;  %7379 = vmatpush3.bf16.msra.mxu0 %v8137_v37 }
 0x248   : > { %7454 = vmatprep.subr.bf16.mxu1 %v8127_v0  ;;  %v3850_v6 = vsel %vm8851_vm5, %v3848_v1, %v3849_v29  ;;  %v3585_v21 = vrot.slane %v3583_v9, 5  ;;  %v3589_v56 = vshll.u32 %v10019_v34, 16  ;;  %v3593_v42 = vshrl.u32 %v10019_v34, 16 }
 0x249   : > { %v4196_v11 = vrot.slane %v4195_v50, 4  ;;  %v3843_v0 = vsel %vm8851_vm5, %v3841_v63, %v3842_v61  ;;  %v6737_v47 = vcombine.low %v3847_v18, %v3850_v6  ;;  %v3599_v61 = vshll.u32 %v10024_v49, 16  ;;  %v10269_v50 = vld [vmem:[#allocation2 + $0x1c] sm:$0xf] }
 0x24a   : > { %v6736_v22 = vcombine.low %v3840_v13, %v3843_v0  ;;  %v10276_v13 = vld [vmem:[%s10872_s4 + $0x200] sm:$0xff]   ;;  %v6715_v63 = vcombine.low %v10031_v58, %v10039_v2  ;;  %v3586_v49 = vor.u32 %v3585_v21, %v3582_v7  ;;  %v3591_v41 = vrot.slane %v3589_v56, 5 }
 0x24b   : > { %7455 = vmatpush3.bf16.msra.mxu1 %v8129_v23  ;;  %v8134_v23 = vld [vmem:[%s10872_s4 + $0x1b0] sm:$0xff]   ;;  %v4201_v17 = vsel %vm8412_vm2, %v4196_v11, %v4200_v52  ;;  %v8138_v52 = vld [vmem:[%s10872_s4 + $0x1b8] sm:$0xff]   ;;  %v10282_v11 = vld [vmem:[#allocation2 + $0x20] sm:$0x1]  ;;  %v5138_v19 = vshrl.u32 %v10267_v44, 16  ;;  %v3601_v4 = vrot.slane %v3599_v61, 5 }
 0x24c   : > { %7456 = vmatprep.subr.bf16.mxu1 %v8132_v28  ;;  %v6761_v46 = vcombine.low %v4201_v17, %v4211_v10  ;;  %7692 = vmatprep.mubr.bf16.mxu1 %v6736_v22  ;;  %v3595_v28 = vrot.slane %v3593_v42, 4  ;;  %v5141_v34 = vshll.u32 %v10267_v44, 16  ;;  %v5147_v29 = vshll.u32 %v10269_v50, 16  ;;  %v10297_v7 = vld [vmem:[#allocation2 + $0x24] sm:$0xf] }
 0x24d   : > { %v5151_v54 = vshrl.u32 %v10269_v50, 16  ;;  %v3587_v0 = vrot.slane %v3586_v49, 4  ;;  %v5140_v1 = vrot.slane %v5138_v19, 4  ;;  %v3604_v12 = vshrl.u32 %v10031_v58, 16  ;;  %v10303_v19 = vld [vmem:[#allocation2 + $0x28] sm:$0xf] }
 0x24e   : > { %4668 = vmatprep.mubr.bf16.mxu0 %v6761_v46  ;;  %7693 = vmatmul.mubr.bf16.gmra.mrb[72].mxu1 %v6737_v47  ;;  %v3596_v18 = vor.u32 %v3595_v28, %v3591_v41  ;;  %v5143_v17 = vrot.slane %v5141_v34, 5  ;;  %v5149_v10 = vrot.slane %v5147_v29, 5  ;;  %v3607_v9 = vshll.u32 %v10031_v58, 16  ;;  %v8150_v58 = vld [vmem:[%s10872_s4 + $0x218] sm:$0xff]  }
 0x24f   : > { %7457 = vmatpush3.bf16.msra.mxu1 %v8134_v23  ;;  %4669 = vmatmul.mubr.bf16.gmra.mrb[128].mxu0 %v6753_v24  ;;  %v5157_v23 = vshll.u32 %v10282_v11, 16  ;;  %v5153_v22 = vrot.slane %v5151_v54, 4  ;;  %v6826_v24 = vcombine.low %v10267_v44, %v10269_v50  ;;  %v3592_v46 = vsel %vm8412_vm2, %v3587_v0, %v3591_v41  ;;  %v5118_v0 = vld [vmem:[#allocation2 + $0x2c] sm:$0x1] }
 0x250   : > { %7458 = vmatprep.subr.bf16.mxu1 %v8136_v45  ;;  %v3597_v6 = vrot.slane %v3596_v18, 4  ;;  %v5144_v47 = vor.u32 %v5143_v17, %v5140_v1  ;;  %v3613_v37 = vshll.u32 %v10039_v2, 16  ;;  %v3606_v21 = vrot.slane %v3604_v12, 4 }
 0x251   : > { %v5159_v38 = vrot.slane %v5157_v23, 5  ;;  %v5154_v45 = vor.u32 %v5153_v22, %v5149_v10  ;;  %v3617_v56 = vshrl.u32 %v10039_v2, 16  ;;  %v3623_v42 = vshll.u32 %v10041_v15, 16 }
 0x252   : > { %v5145_v49 = vrot.slane %v5144_v47, 4  ;;  %v3609_v28 = vrot.slane %v3607_v9, 5  ;;  %v3615_v34 = vrot.slane %v3613_v37, 5  ;;  %v5162_v18 = vshrl.u32 %v10297_v7, 16 }
 0x253   : > { %7459 = vmatpush3.bf16.msra.mxu1 %v8138_v52  ;;  %v3602_v52 = vsel %vm8412_vm2, %v3597_v6, %v3601_v4  ;;  %v5155_v41 = vrot.slane %v5154_v45, 4  ;;  %v3619_v29 = vrot.slane %v3617_v56, 4  ;;  %v3625_v54 = vrot.slane %v3623_v42, 5 }
 0x254   : > { %7696 = vmatprep.subr.bf16.mxu1 %v10276_v13  ;;  %v6722_v61 = vcombine.low %v3592_v46, %v3602_v52  ;;  %v5150_v4 = vsel %vm8412_vm2, %v5145_v49, %v5149_v10  ;;  %v3610_v15 = vor.u32 %v3609_v28, %v3606_v21  ;;  %v5165_v23 = vshll.u32 %v10297_v7, 16  ;;  %v8144_v10 = vld [vmem:[%s10872_s4 + $0x208] sm:$0xff]  }
 0x255   : > { %v5160_v1 = vsel %vm8412_vm2, %v5155_v41, %v5159_v38  ;;  %v3620_v22 = vor.u32 %v3619_v29, %v3615_v34  ;;  %v5164_v46 = vrot.slane %v5162_v18, 4  ;;  %v5171_v6 = vshll.u32 %v10303_v19, 16 }
 0x256   : > { %4950 = vmatprep.mubr.bf16.mxu0 %v6722_v61  ;;  %v6834_v17 = vcombine.low %v5150_v4, %v5160_v1  ;;  %v3611_v12 = vrot.slane %v3610_v15, 4  ;;  %v5167_v47 = vrot.slane %v5165_v23, 5  ;;  %v5175_v45 = vshrl.u32 %v10303_v19, 16  ;;  %v10333_v4 = vld [vmem:[#allocation2 + $0x34] sm:$0xf] }
 0x257   : > { %4951 = vmatmul.mubr.bf16.vlgmr.msra.gmra.mrb[132].mxu0 %v6714_v40  ;;  %v5181_v9 = vshll.u32 %v5118_v0, 16  ;;  %v3621_v38 = vrot.slane %v3620_v22, 4  ;;  %v5173_v37 = vrot.slane %v5171_v6, 5  ;;  %v5362_v52 = vrot.slane %v10303_v19, 5 }
 0x258   : > { %5729 = vmatprep.mubr.bf16.mxu1 %v6834_v17  ;;  %v5365_v21 = vrot.slane %v5118_v0, 5  ;;  %v3616_v40 = vsel %vm8412_vm2, %v3611_v12, %v3615_v34  ;;  %v5168_v56 = vor.u32 %v5167_v47, %v5164_v46  ;;  %v5177_v42 = vrot.slane %v5175_v45, 4  ;;  %v8147_v34 = vld [vmem:[%s10872_s4 + $0x210] sm:$0xff]  }
 0x259   : > { %5730 = vmatmul.mubr.bf16.vlgmr.msra.gmra.mrb[76].mxu1 %v6826_v24  ;;  %v5183_v61 = vrot.slane %v5181_v9, 5  ;;  %v3626_v49 = vsel %vm8412_vm2, %v3621_v38, %v3625_v54  ;;  %v5364_v41 = vrot.slane %v5362_v52, 4  ;;  %v6827_v28 = vcombine.low %v10297_v7, %v10303_v19  ;;  %v10327_v24 = vld [vmem:[#allocation2 + $0x30] sm:$0xf]  ;;  %v10347_v9 = vld [vmem:[#allocation2 + $0x38] sm:$0x1] }
 0x25a   : > { %7697 = vmatpush3.bf16.msra.mxu1 %v10276_v13  ;;  %v3628_v29 = vshrl.u32 %v10086_v16, 16  ;;  %v6723_v0 = vcombine.low %v3616_v40, %v3626_v49  ;;  %v5169_v18 = vrot.slane %v5168_v56, 4  ;;  %v5178_v13 = vor.u32 %v5177_v42, %v5173_v37 }
 0x25b   : > { %7698 = vmatprep.subr.bf16.mxu1 %v8144_v10  ;;  %v3631_v54 = vshll.u32 %v10086_v16, 16  ;;  %v10337_v1 = vsel %vm8851_vm5, %v5364_v41, %v5365_v21  ;;  %v3637_v23 = vshll.u32 %v10088_v25, 16  ;;  %v3641_v17 = vshrl.u32 %v10088_v25, 16 }
 0x25c   : > { %v3630_v15 = vrot.slane %v3628_v29, 4  ;;  %4958 = vmatprep.mubr.bf16.mxu0 %v6723_v0  ;;  %v5174_v22 = vsel %vm8412_vm2, %v5169_v18, %v5173_v37  ;;  %v5179_v46 = vrot.slane %v5178_v13, 4  ;;  %v3647_v12 = vshll.u32 %v10092_v8, 16 }
 0x25d   : > { %v3633_v6 = vrot.slane %v3631_v54, 5  ;;  %v3639_v47 = vrot.slane %v3637_v23, 5  ;;  %v3643_v45 = vrot.slane %v3641_v17, 4  ;;  %v5186_v38 = vshrl.u32 %v10327_v24, 16 }
 0x25e   : > { %7699 = vmatpush3.bf16.msra.mxu1 %v8144_v10  ;;  %v5189_v21 = vshll.u32 %v10327_v24, 16  ;;  %v5184_v37 = vsel %vm8412_vm2, %v5179_v46, %v5183_v61  ;;  %v3649_v56 = vrot.slane %v3647_v12, 5  ;;  %v5195_v8 = vshll.u32 %v10333_v4, 16 }
 0x25f   : > { %4959 = vmatmul.mubr.bf16.gmra.mrb[136].mxu0 %v6715_v63  ;;  %v3634_v40 = vor.u32 %v3633_v6, %v3630_v15  ;;  %7700 = vmatprep.subr.bf16.mxu1 %v8147_v34  ;;  %v6835_v2 = vcombine.low %v5174_v22, %v5184_v37  ;;  %v3644_v63 = vor.u32 %v3643_v45, %v3639_v47  ;;  %v5188_v10 = vrot.slane %v5186_v38, 4  ;;  %v10362_v15 = vld [vmem:[#allocation2 + $0x3c] sm:$0xf]  ;;  %v8153_v6 = vld [vmem:[%s10872_s4 + $0x220] sm:$0xff]  }
 0x260   : > { %v5191_v42 = vrot.slane %v5189_v21, 5  ;;  %v5197_v41 = vrot.slane %v5195_v8, 5  ;;  %v5199_v29 = vshrl.u32 %v10333_v4, 16  ;;  %v5205_v0 = vshll.u32 %v10347_v9, 16  ;;  %v10376_v8 = vld [vmem:[#allocation2 + $0x44] sm:$0x1] }
 0x261   : > { %v3635_v49 = vrot.slane %v3634_v40, 4  ;;  %5737 = vmatprep.mubr.bf16.mxu1 %v6835_v2  ;;  %v3645_v61 = vrot.slane %v3644_v63, 4  ;;  %v6828_v13 = vcombine.low %v10327_v24, %v10333_v4  ;;  %v3652_v54 = vshrl.u32 %v10109_v30, 16  ;;  %v10374_v40 = vld [vmem:[#allocation2 + $0x40] sm:$0xf] }
 0x262   : > { %v5192_v18 = vor.u32 %v5191_v42, %v5188_v10  ;;  %7701 = vmatpush3.bf16.msra.mxu1 %v8147_v34  ;;  %v5201_v17 = vrot.slane %v5199_v29, 4  ;;  %v5207_v22 = vrot.slane %v5205_v0, 5  ;;  %v3655_v46 = vshll.u32 %v10109_v30, 16 }
 0x263   : > { %5738 = vmatmul.mubr.bf16.gmra.mrb[80].mxu1 %v6827_v28  ;;  %v3640_v23 = vsel %vm8412_vm2, %v3635_v49, %v3639_v47  ;;  %7702 = vmatprep.subr.bf16.mxu1 %v8150_v58  ;;  %v3650_v34 = vsel %vm8412_vm2, %v3645_v61, %v3649_v56  ;;  %v3654_v45 = vrot.slane %v3652_v54, 4  ;;  %v3661_v38 = vshll.u32 %v10111_v39, 16  ;;  %v8156_v61 = vld [vmem:[%s10872_s4 + $0x228] sm:$0xff]  }
 0x264   : > { %v5193_v12 = vrot.slane %v5192_v18, 4  ;;  %v6724_v28 = vcombine.low %v3640_v23, %v3650_v34  ;;  %v5202_v21 = vor.u32 %v5201_v17, %v5197_v41  ;;  %v3657_v37 = vrot.slane %v3655_v46, 5 }
 0x265   : > { %v3665_v47 = vshrl.u32 %v10111_v39, 16  ;;  %v3663_v63 = vrot.slane %v3661_v38, 5  ;;  %v3671_v10 = vshll.u32 %v10113_v59, 16  ;;  %v5210_v56 = vshrl.u32 %v10362_v15, 16 }
 0x266   : > { %v5198_v2 = vsel %vm8412_vm2, %v5193_v12, %v5197_v41  ;;  %7703 = vmatpush3.bf16.msra.mxu1 %v8150_v58  ;;  %4966 = vmatprep.mubr.bf16.mxu0 %v6724_v28  ;;  %v5203_v42 = vrot.slane %v5202_v21, 4  ;;  %v3658_v49 = vor.u32 %v3657_v37, %v3654_v45  ;;  %v5213_v0 = vshll.u32 %v10362_v15, 16 }
 0x267   : > { %v3667_v29 = vrot.slane %v3665_v47, 4  ;;  %7704 = vmatprep.subr.bf16.mxu1 %v8153_v6  ;;  %4967 = vmatmul.mubr.bf16.gmra.mrb[140].mxu0 %v6716_v35  ;;  %v3673_v41 = vrot.slane %v3671_v10, 5  ;;  %v5212_v59 = vrot.slane %v5210_v56, 4  ;;  %v5219_v18 = vshll.u32 %v10374_v40, 16 }
 0x268   : > { %v5223_v58 = vshrl.u32 %v10374_v40, 16  ;;  %v5208_v54 = vsel %vm8412_vm2, %v5203_v42, %v5207_v22  ;;  %v3659_v23 = vrot.slane %v3658_v49, 4  ;;  %v5215_v46 = vrot.slane %v5213_v0, 5  ;;  %v8159_v22 = vld [vmem:[%s10872_s4 + $0x230] sm:$0xff]   ;;  %v10407_v42 = vld [vmem:[#allocation2 + $0x48] sm:$0xf] }
 0x269   : > { %v3668_v17 = vor.u32 %v3667_v29, %v3663_v63  ;;  %v6836_v34 = vcombine.low %v5198_v2, %v5208_v54  ;;  %v5221_v12 = vrot.slane %v5219_v18, 5  ;;  %v5229_v38 = vshll.u32 %v10376_v8, 16  ;;  %v10409_v18 = vld [vmem:[#allocation2 + $0x4c] sm:$0xf] }
 0x26a   : > { %v5225_v45 = vrot.slane %v5223_v58, 4  ;;  %7705 = vmatpush3.bf16.msra.mxu1 %v8153_v6  ;;  %v3664_v16 = vsel %vm8412_vm2, %v3659_v23, %v3663_v63  ;;  %v5216_v35 = vor.u32 %v5215_v46, %v5212_v59  ;;  %v6829_v28 = vcombine.low %v10362_v15, %v10374_v40  ;;  %v8162_v23 = vld [vmem:[%s10872_s4 + $0x238] sm:$0xff]  }
 0x26b   : > { %v3669_v25 = vrot.slane %v3668_v17, 4  ;;  %7706 = vmatprep.subr.bf16.mxu1 %v8156_v61  ;;  %5745 = vmatprep.mubr.bf16.mxu1 %v6836_v34  ;;  %v5231_v37 = vrot.slane %v5229_v38, 5  ;;  %v3676_v47 = vshrl.u32 %v10145_v31, 16  ;;  %v3679_v6 = vshll.u32 %v10145_v31, 16  ;;  %v10419_v34 = vld [vmem:[#allocation2 + $0x50] sm:$0x1] }
 0x26c   : > { %v5226_v21 = vor.u32 %v5225_v45, %v5221_v12  ;;  %5746 = vmatmul.mubr.bf16.gmra.mrb[84].mxu1 %v6828_v13  ;;  %v5217_v63 = vrot.slane %v5216_v35, 4  ;;  %v3685_v10 = vshll.u32 %v10147_v36, 16  ;;  %v3689_v56 = vshrl.u32 %v10147_v36, 16 }
 0x26d   : > { %v3674_v2 = vsel %vm8412_vm2, %v3669_v25, %v3673_v41  ;;  %v3678_v0 = vrot.slane %v3676_v47, 4  ;;  %v3681_v59 = vrot.slane %v3679_v6, 5  ;;  %v3695_v41 = vshll.u32 %v10149_v33, 16 }
 0x26e   : > { %v6725_v49 = vcombine.low %v3664_v16, %v3674_v2  ;;  %v5227_v29 = vrot.slane %v5226_v21, 4  ;;  %7707 = vmatpush3.bf16.msra.mxu1 %v8156_v61  ;;  %v5222_v13 = vsel %vm8412_vm2, %v5217_v63, %v5221_v12  ;;  %v3687_v58 = vrot.slane %v3685_v10, 5 }
 0x26f   : > { %v3691_v54 = vrot.slane %v3689_v56, 4  ;;  %7708 = vmatprep.subr.bf16.mxu1 %v8159_v22  ;;  %v3682_v46 = vor.u32 %v3681_v59, %v3678_v0  ;;  %v5234_v61 = vshrl.u32 %v10407_v42, 16  ;;  %v5237_v12 = vshll.u32 %v10407_v42, 16  ;;  %v10438_v0 = vld [vmem:[#allocation2 + $0x54] sm:$0xf] }
 0x270   : > { %4974 = vmatprep.mubr.bf16.mxu0 %v6725_v49  ;;  %v5232_v17 = vsel %vm8412_vm2, %v5227_v29, %v5231_v37  ;;  %v3697_v38 = vrot.slane %v3695_v41, 5  ;;  %v5243_v16 = vshll.u32 %v10409_v18, 16  ;;  %v5247_v37 = vshrl.u32 %v10409_v18, 16 }
 0x271   : > { %v6837_v45 = vcombine.low %v5222_v13, %v5232_v17  ;;  %4975 = vmatmul.mubr.bf16.gmra.mrb[144].mxu0 %v6717_v26  ;;  %v3692_v33 = vor.u32 %v3691_v54, %v3687_v58  ;;  %v3683_v25 = vrot.slane %v3682_v46, 4  ;;  %v5236_v35 = vrot.slane %v5234_v61, 4 }
 0x272   : > { %v5239_v21 = vrot.slane %v5237_v12, 5  ;;  %7709 = vmatpush3.bf16.msra.mxu1 %v8159_v22  ;;  %v5245_v6 = vrot.slane %v5243_v16, 5  ;;  %v5253_v2 = vshll.u32 %v10419_v34, 16  ;;  %v6830_v63 = vcombine.low %v10407_v42, %v10409_v18 }
 0x273   : > { %5753 = vmatprep.mubr.bf16.mxu1 %v6837_v45  ;;  %v3693_v47 = vrot.slane %v3692_v33, 4  ;;  %7710 = vmatprep.subr.bf16.mxu1 %v8162_v23  ;;  %v3688_v30 = vsel %vm8412_vm2, %v3683_v25, %v3687_v58  ;;  %v5249_v26 = vrot.slane %v5247_v37, 4  ;;  %v3700_v10 = vshrl.u32 %v10157_v27, 16  ;;  %v10440_v58 = vld [vmem:[#allocation2 + $0x58] sm:$0xf] }
 0x274   : > { %v5240_v39 = vor.u32 %v5239_v21, %v5236_v35  ;;  %5754 = vmatmul.mubr.bf16.gmra.mrb[88].mxu1 %v6829_v28  ;;  %v5255_v56 = vrot.slane %v5253_v2, 5  ;;  %v3703_v49 = vshll.u32 %v10157_v27, 16  ;;  %v3709_v29 = vshll.u32 %v10166_v5, 16  ;;  %v10451_v35 = vld [vmem:[#allocation2 + $0x5c] sm:$0x1] }
 0x275   : > { %v3698_v22 = vsel %vm8412_vm2, %v3693_v47, %v3697_v38  ;;  %v5250_v54 = vor.u32 %v5249_v26, %v5245_v6  ;;  %v3702_v41 = vrot.slane %v3700_v10, 4  ;;  %v3713_v28 = vshrl.u32 %v10166_v5, 16 }
 0x276   : > { %v6726_v59 = vcombine.low %v3688_v30, %v3698_v22  ;;  %v5241_v13 = vrot.slane %v5240_v39, 4  ;;  %7711 = vmatpush3.bf16.msra.mxu1 %v8162_v23  ;;  %v3705_v17 = vrot.slane %v3703_v49, 5  ;;  %v3711_v46 = vrot.slane %v3709_v29, 5 }
 0x277   : > { %v3719_v61 = vshll.u32 %v10168_v14, 16  ;;  %v5251_v45 = vrot.slane %v5250_v54, 4  ;;  %v5258_v33 = vshrl.u32 %v10438_v0, 16  ;;  %v5261_v38 = vshll.u32 %v10438_v0, 16 }
 0x278   : > { %4982 = vmatprep.mubr.bf16.mxu0 %v6726_v59  ;;  %v5246_v12 = vsel %vm8412_vm2, %v5241_v13, %v5245_v6  ;;  %v3706_v23 = vor.u32 %v3705_v17, %v3702_v41  ;;  %v3715_v16 = vrot.slane %v3713_v28, 4  ;;  %v5267_v14 = vshll.u32 %v10440_v58, 16  ;;  %v10465_v17 = vld [vmem:[#allocation2 + $0x60] sm:$0xf] }
 0x279   : > { %4983 = vmatmul.mubr.bf16.gmra.mrb[148].mxu0 %v6718_v57  ;;  %v3721_v25 = vrot.slane %v3719_v61, 5  ;;  %v5256_v21 = vsel %vm8412_vm2, %v5251_v45, %v5255_v56  ;;  %v5260_v37 = vrot.slane %v5258_v33, 4  ;;  %v5263_v47 = vrot.slane %v5261_v38, 5  ;;  %v10470_v45 = vld [vmem:[#allocation2 + $0x64] sm:$0xf] }
 0x27a   : > { %v5271_v6 = vshrl.u32 %v10440_v58, 16  ;;  %v6838_v2 = vcombine.low %v5246_v12, %v5256_v21  ;;  %v3707_v30 = vrot.slane %v3706_v23, 4  ;;  %v3716_v39 = vor.u32 %v3715_v16, %v3711_v46 }
 0x27b   : > { %v5269_v26 = vrot.slane %v5267_v14, 5  ;;  %v5264_v31 = vor.u32 %v5263_v47, %v5260_v37  ;;  %v5277_v57 = vshll.u32 %v10451_v35, 16  ;;  %v6831_v10 = vcombine.low %v10438_v0, %v10440_v58  ;;  %v10478_v47 = vld [vmem:[#allocation2 + $0x68] sm:$0x1] }
 0x27c   : > { %v5273_v36 = vrot.slane %v5271_v6, 4  ;;  %5761 = vmatprep.mubr.bf16.mxu1 %v6838_v2  ;;  %v3712_v22 = vsel %vm8412_vm2, %v3707_v30, %v3711_v46  ;;  %v3717_v56 = vrot.slane %v3716_v39, 4  ;;  %v3724_v49 = vshrl.u32 %v10203_v32, 16 }
 0x27d   : > { %v3727_v29 = vshll.u32 %v10203_v32, 16  ;;  %5762 = vmatmul.mubr.bf16.gmra.mrb[92].mxu1 %v6830_v63  ;;  %v5265_v59 = vrot.slane %v5264_v31, 4  ;;  %v5279_v54 = vrot.slane %v5277_v57, 5  ;;  %v3733_v41 = vshll.u32 %v10206_v20, 16 }
 0x27e   : > { %v5274_v13 = vor.u32 %v5273_v36, %v5269_v26  ;;  %v3722_v28 = vsel %vm8412_vm2, %v3717_v56, %v3721_v25  ;;  %v3726_v61 = vrot.slane %v3724_v49, 4  ;;  %v3737_v46 = vshrl.u32 %v10206_v20, 16 }
 0x27f   : > { %v3729_v12 = vrot.slane %v3727_v29, 5  ;;  %v6727_v33 = vcombine.low %v3712_v22, %v3722_v28  ;;  %v5270_v63 = vsel %vm8412_vm2, %v5265_v59, %v5269_v26  ;;  %v3735_v23 = vrot.slane %v3733_v41, 5 }
 0x280   : > { %v5275_v38 = vrot.slane %v5274_v13, 4  ;;  %v3739_v14 = vrot.slane %v3737_v46, 4  ;;  %v3743_v21 = vshll.u32 %v10208_v48, 16  ;;  %v5282_v37 = vshrl.u32 %v10465_v17, 16  ;;  %v10497_v46 = vld [vmem:[#allocation2 + $0x6c] sm:$0xf] }
 0x281   : > { %v3730_v16 = vor.u32 %v3729_v12, %v3726_v61  ;;  %4990 = vmatprep.mubr.bf16.mxu0 %v6727_v33  ;;  %v5285_v6 = vshll.u32 %v10465_v17, 16  ;;  %v5291_v2 = vshll.u32 %v10470_v45, 16  ;;  %v5295_v30 = vshrl.u32 %v10470_v45, 16 }
 0x282   : > { %v5280_v25 = vsel %vm8412_vm2, %v5275_v38, %v5279_v54  ;;  %4991 = vmatmul.mubr.bf16.gmra.mrb[152].mxu0 %v6719_v53  ;;  %v3740_v26 = vor.u32 %v3739_v14, %v3735_v23  ;;  %v3745_v31 = vrot.slane %v3743_v21, 5  ;;  %v5284_v36 = vrot.slane %v5282_v37, 4  ;;  %v10500_v37 = vld [vmem:[#allocation2 + $0x70] sm:$0xf] }
 0x283   : > { %v6839_v39 = vcombine.low %v5270_v63, %v5280_v25  ;;  %v3731_v48 = vrot.slane %v3730_v16, 4  ;;  %v5287_v57 = vrot.slane %v5285_v6, 5  ;;  %v5293_v22 = vrot.slane %v5291_v2, 5  ;;  %v10506_v2 = vld [vmem:[#allocation2 + $0x74] sm:$0x1] }
 0x284   : > { %v5297_v56 = vrot.slane %v5295_v30, 4  ;;  %v3741_v29 = vrot.slane %v3740_v26, 4  ;;  %v5301_v59 = vshll.u32 %v10478_v47, 16  ;;  %v6832_v13 = vcombine.low %v10465_v17, %v10470_v45 }
 0x285   : > { %5769 = vmatprep.mubr.bf16.mxu1 %v6839_v39  ;;  %v3736_v49 = vsel %vm8412_vm2, %v3731_v48, %v3735_v23  ;;  %v5288_v27 = vor.u32 %v5287_v57, %v5284_v36  ;;  %v3748_v53 = vshrl.u32 %v10218_v43, 16  ;;  %v3751_v54 = vshll.u32 %v10218_v43, 16 }
 0x286   : > { %5770 = vmatmul.mubr.bf16.gmra.mrb[96].mxu1 %v6831_v10  ;;  %v5298_v5 = vor.u32 %v5297_v56, %v5293_v22  ;;  %v3746_v41 = vsel %vm8412_vm2, %v3741_v29, %v3745_v31  ;;  %v5303_v28 = vrot.slane %v5301_v59, 5  ;;  %v3757_v61 = vshll.u32 %v10220_v3, 16 }
 0x287   : > { %v3761_v12 = vshrl.u32 %v10220_v3, 16  ;;  %v6728_v33 = vcombine.low %v3736_v49, %v3746_v41  ;;  %v5289_v63 = vrot.slane %v5288_v27, 4  ;;  %v3750_v10 = vrot.slane %v3748_v53, 4 }
 0x288   : > { %v5299_v38 = vrot.slane %v5298_v5, 4  ;;  %v3753_v23 = vrot.slane %v3751_v54, 5  ;;  %v3759_v16 = vrot.slane %v3757_v61, 5  ;;  %v3767_v21 = vshll.u32 %v10222_v62, 16 }
 0x289   : > { %v3763_v14 = vrot.slane %v3761_v12, 4  ;;  %4998 = vmatprep.mubr.bf16.mxu0 %v6728_v33  ;;  %v5294_v25 = vsel %vm8412_vm2, %v5289_v63, %v5293_v22  ;;  %v5306_v30 = vshrl.u32 %v10497_v46, 16  ;;  %v5309_v39 = vshll.u32 %v10497_v46, 16 }
 0x28a   : > { %v5304_v6 = vsel %vm8412_vm2, %v5299_v38, %v5303_v28  ;;  %4999 = vmatmul.mubr.bf16.gmra.mrb[156].mxu0 %v6720_v60  ;;  %v3754_v62 = vor.u32 %v3753_v23, %v3750_v10  ;;  %v3769_v31 = vrot.slane %v3767_v21, 5  ;;  %v5315_v22 = vshll.u32 %v10500_v37, 16 }
 0x28b   : > { %v6840_v48 = vcombine.low %v5294_v25, %v5304_v6  ;;  %v3764_v26 = vor.u32 %v3763_v14, %v3759_v16  ;;  %v5308_v36 = vrot.slane %v5306_v30, 4  ;;  %v5311_v57 = vrot.slane %v5309_v39, 5 }
 0x28c   : > { %v5319_v56 = vshrl.u32 %v10500_v37, 16  ;;  %v3755_v49 = vrot.slane %v3754_v62, 4  ;;  %v5325_v59 = vshll.u32 %v10506_v2, 16  ;;  %v6721_v27 = vcombine.low %v10218_v43, %v10220_v3 }
 0x28d   : > { %5777 = vmatprep.mubr.bf16.mxu1 %v6840_v48  ;;  %v3765_v29 = vrot.slane %v3764_v26, 4  ;;  %v5312_v32 = vor.u32 %v5311_v57, %v5308_v36  ;;  %v5317_v20 = vrot.slane %v5315_v22, 5  ;;  %v6818_v5 = vrot.slane %v10267_v44, 9 }
 0x28e   : > { %5778 = vmatmul.mubr.bf16.gmra.mrb[100].mxu1 %v6832_v13  ;;  %v5321_v60 = vrot.slane %v5319_v56, 4  ;;  %v3760_v53 = vsel %vm8412_vm2, %v3755_v49, %v3759_v16  ;;  %v5327_v41 = vrot.slane %v5325_v59, 5  ;;  %v5355_v28 = vrot.slane %v10269_v50, 5 }
 0x28f   : > { %v3770_v54 = vsel %vm8412_vm2, %v3765_v29, %v3769_v31  ;;  %v5313_v12 = vrot.slane %v5312_v32, 4  ;;  %v5358_v43 = vrot.slane %v10282_v11, 5  ;;  %v6819_v13 = vrot.slane %v10297_v7, 9 }
 0x290   : > { %v6729_v61 = vcombine.low %v3760_v53, %v3770_v54  ;;  %v5322_v33 = vor.u32 %v5321_v60, %v5317_v20  ;;  %v5357_v3 = vrot.slane %v5355_v28, 4  ;;  %v5356_v38 = vsel %vm8851_vm5, %v6818_v5, %v5355_v28 }
 0x291   : > { %v5318_v44 = vsel %vm8412_vm2, %v5313_v12, %v5317_v20  ;;  %v5369_v10 = vrot.slane %v10333_v4, 5  ;;  %v5363_v11 = vsel %vm8851_vm5, %v6819_v13, %v5362_v52  ;;  %v6833_v23 = vcombine.low %v10497_v46, %v10500_v37 }
 0x292   : > { %5006 = vmatprep.mubr.bf16.mxu0 %v6729_v61  ;;  %v5323_v63 = vrot.slane %v5322_v33, 4  ;;  %v5359_v50 = vsel %vm8851_vm5, %v5357_v3, %v5358_v43  ;;  %v6843_v16 = vcombine.low %v5363_v11, %v10337_v1  ;;  %v6820_v4 = vrot.slane %v10327_v24, 9 }
 0x293   : > { %5007 = vmatmul.mubr.bf16.gmra.mrb[160].mxu0 %v6721_v27  ;;  %v6842_v21 = vcombine.low %v5356_v38, %v5359_v50  ;;  %v5371_v25 = vrot.slane %v5369_v10, 4  ;;  %v5372_v6 = vrot.slane %v10347_v9, 5  ;;  %v5376_v19 = vrot.slane %v10374_v40, 5 }
 0x294   : > { %v5328_v7 = vsel %vm8412_vm2, %v5323_v63, %v5327_v41  ;;  %v5370_v52 = vsel %vm8851_vm5, %v6820_v4, %v5369_v10  ;;  %v5383_v1 = vrot.slane %v10409_v18, 5  ;;  %v6821_v48 = vrot.slane %v10362_v15, 9 }
 0x295   : > { %v6841_v14 = vcombine.low %v5318_v44, %v5328_v7  ;;  %v5373_v30 = vsel %vm8851_vm5, %v5371_v25, %v5372_v6  ;;  %v5378_v24 = vrot.slane %v5376_v19, 4  ;;  %v5379_v62 = vrot.slane %v10376_v8, 5 }
 0x296   : > { %v6844_v39 = vcombine.low %v5370_v52, %v5373_v30  ;;  %v6822_v9 = vrot.slane %v10407_v42, 9  ;;  %v5385_v26 = vrot.slane %v5383_v1, 4  ;;  %v5386_v31 = vrot.slane %v10419_v34, 5 }
 0x297   : > { %5785 = vmatprep.mubr.bf16.mxu1 %v6841_v14  ;;  %v5377_v40 = vsel %vm8851_vm5, %v6821_v48, %v5376_v19  ;;  %v5380_v36 = vsel %vm8851_vm5, %v5378_v24, %v5379_v62  ;;  %v5390_v18 = vrot.slane %v10440_v58, 5  ;;  %v5397_v42 = vrot.slane %v10470_v45, 5 }
 0x298   : > { %5786 = vmatmul.mubr.bf16.gmra.mrb[104].mxu1 %v6833_v23  ;;  %v5384_v15 = vsel %vm8851_vm5, %v6822_v9, %v5383_v1  ;;  %v5387_v8 = vsel %vm8851_vm5, %v5385_v26, %v5386_v31  ;;  %v6845_v57 = vcombine.low %v5377_v40, %v5380_v36  ;;  %v6823_v22 = vrot.slane %v10438_v0, 9 }
 0x299   : > { %7712 = vmatprep.mubr.bf16.mxu1 %v6842_v21  ;;  %v6846_v34 = vcombine.low %v5384_v15, %v5387_v8  ;;  %v5392_v56 = vrot.slane %v5390_v18, 4  ;;  %v5393_v49 = vrot.slane %v10451_v35, 5  ;;  %v6824_v29 = vrot.slane %v10465_v17, 9 }
 0x29a   : > { %v5399_v59 = vrot.slane %v5397_v42, 4  ;;  %v5400_v58 = vrot.slane %v10478_v47, 5  ;;  %v5391_v27 = vsel %vm8851_vm5, %v6823_v22, %v5390_v18  ;;  %v5404_v32 = vrot.slane %v10500_v37, 5 }
 0x29b   : > { %v5394_v45 = vsel %vm8851_vm5, %v5392_v56, %v5393_v49  ;;  %v5398_v0 = vsel %vm8851_vm5, %v6824_v29, %v5397_v42  ;;  %v6825_v47 = vrot.slane %v10497_v46, 9  ;;  %v5407_v5 = vrot.slane %v10506_v2, 5 }
 0x29c   : > { %v5401_v35 = vsel %vm8851_vm5, %v5399_v59, %v5400_v58  ;;  %v6847_v17 = vcombine.low %v5391_v27, %v5394_v45  ;;  %v5406_v60 = vrot.slane %v5404_v32, 4 }
 0x29d   : > { %v6848_v20 = vcombine.low %v5398_v0, %v5401_v35  ;;  %v5405_v53 = vsel %vm8851_vm5, %v6825_v47, %v5404_v32 }
 0x29e   : > { %v5408_v37 = vsel %vm8851_vm5, %v5406_v60, %v5407_v5 }
 0x29f   : > { %v6849_v54 = vcombine.low %v5405_v53, %v5408_v37 }
 0x2a0   : > { %7713 = vmatmul.mubr.bf16.vlgmr.msra.gmra.mrb[60].mxu1 %v6843_v16 }
 0x2a1   : > { %7716 = vmatprep.mubr.bf16.mxu1 %v6844_v39 }
 0x2a8   : > { %7717 = vmatmul.mubr.bf16.gmra.mrb[64].mxu1 %v6845_v57 }
 0x2a9   : > { %7720 = vmatprep.mubr.bf16.mxu1 %v6846_v34 }
 0x2b0   : > { %7721 = vmatmul.mubr.bf16.gmra.mrb[68].mxu1 %v6847_v17 }
 0x2b1   : > { %7724 = vmatprep.mubr.bf16.mxu1 %v6848_v20 }
 0x2b8   : > { %7725 = vmatmul.mubr.bf16.gmra.mrb[72].mxu1 %v6849_v54 }
 0x2e9   : > { %v7300_v41 = vpop.f32.mrb[100].mxu0 }
 0x2ea   : > { %v7301_v28 = vpop.f32.mrb[101].mxu0 }
 0x2eb   : > { %v7302_v61 = vadd.f32 %v7301_v28, %v7300_v41  ;;  %v7303_v12 = vpop.f32.mrb[102].mxu0 }
 0x2ec   : > { %v7304_v33 = vpop.f32.mrb[103].mxu0 }
 0x2ed   : > { %v7305_v43 = vadd.f32 %v7304_v33, %v7303_v12 }
 0x2f1   : > { %v7306_v46 = vpop.f32.mrb[104].mxu0 }
 0x2f2   : > { %v7307_v3 = vpop.f32.mrb[105].mxu0 }
 0x2f3   : > { %v7308_v13 = vadd.f32 %v7307_v3, %v7306_v46  ;;  %v7309_v2 = vpop.f32.mrb[106].mxu0 }
 0x2f4   : > { %v7310_v44 = vpop.f32.mrb[107].mxu0 }
 0x2f5   : > { %v7311_v63 = vadd.f32 %v7310_v44, %v7309_v2 }
 0x2f9   : > { %v7312_v38 = vpop.f32.mrb[108].mxu0 }
 0x2fa   : > { %v7313_v10 = vpop.f32.mrb[109].mxu0 }
 0x2fb   : > { %v10583_v50 = vadd.f32 %v7313_v10, %v7312_v38  ;;  %v7315_v55 = vpop.f32.mrb[110].mxu0 }
 0x2fc   : > { %v7316_v11 = vpop.f32.mrb[111].mxu0 }
 0x2fd   : > { %v10585_v7 = vadd.f32 %v7316_v11, %v7315_v55 }
 0x301   : > { %v7318_v23 = vpop.f32.mrb[112].mxu0 }
 0x302   : > { %v7319_v16 = vpop.f32.mrb[113].mxu0 }
 0x303   : > { %v10587_v14 = vadd.f32 %v7319_v16, %v7318_v23  ;;  %v7321_v21 = vpop.f32.mrb[114].mxu0 }
 0x304   : > { %v7322_v4 = vpop.f32.mrb[115].mxu0 }
 0x305   : > { %v10589_v25 = vadd.f32 %v7322_v4, %v7321_v21 }
 0x309   : > { %v7324_v6 = vpop.f32.mrb[116].mxu0 }
 0x30a   : > { %v7325_v19 = vpop.f32.mrb[117].mxu0 }
 0x30b   : > { %v10591_v52 = vadd.f32 %v7325_v19, %v7324_v6  ;;  %v7327_v30 = vpop.f32.mrb[118].mxu0 }
 0x30c   : > { %v7328_v1 = vpop.f32.mrb[119].mxu0 }
 0x30d   : > { %v10593_v39 = vadd.f32 %v7328_v1, %v7327_v30 }
 0x311   : > { %v7330_v48 = vpop.f32.mrb[120].mxu0 }
 0x312   : > { %v7331_v24 = vpop.f32.mrb[121].mxu0 }
 0x313   : > { %v10595_v62 = vadd.f32 %v7331_v24, %v7330_v48  ;;  %v7333_v9 = vpop.f32.mrb[122].mxu0 }
 0x314   : > { %v7334_v26 = vpop.f32.mrb[123].mxu0 }
 0x315   : > { %v10597_v31 = vadd.f32 %v7334_v26, %v7333_v9 }
 0x319   : > { %v7336_v40 = vpop.f32.mrb[124].mxu0 }
 0x31a   : > { %v7337_v36 = vpop.f32.mrb[125].mxu0 }
 0x31b   : > { %v10599_v18 = vadd.f32 %v7337_v36, %v7336_v40  ;;  %v7339_v15 = vpop.f32.mrb[126].mxu0 }
 0x31c   : > { %v7340_v8 = vpop.f32.mrb[127].mxu0 }
 0x31d   : > { %v10601_v42 = vadd.f32 %v7340_v8, %v7339_v15 }
 0x322   : > { %v7342_v57 = vpop.f32.mrb[128].mxu0 }
 0x323   : > { %v7343_v34 = vpop.f32.mrb[129].mxu0 }
 0x324   : > { %v10603_v22 = vadd.f32 %v7343_v34, %v7342_v57  ;;  %v7345_v56 = vpop.f32.mrb[130].mxu0 }
 0x325   : > { %v7346_v49 = vpop.f32.mrb[131].mxu0 }
 0x326   : > { %v10605_v29 = vadd.f32 %v7346_v49, %v7345_v56 }
 0x32a   : > { %v7380_v59 = vpop.f32.mrb[132].mxu0 }
 0x32b   : > { %v7381_v58 = vpop.f32.mrb[133].mxu0 }
 0x32c   : > { %v7382_v27 = vadd.f32 %v7381_v58, %v7380_v59  ;;  %v7383_v45 = vpop.f32.mrb[134].mxu0  ;;  %v7460_v32 = vpop.f32.mrb[76].mxu1  ;;  %v6877_v58 = vld [vmem:[%s8378_s18 + $0x24] sm:$0xf] }
 0x32d   : > { %v7384_v0 = vpop.f32.mrb[135].mxu0  ;;  %v7461_v17 = vpop.f32.mrb[77].mxu1 }
 0x32e   : > { %v7811_v35 = vadd.f32 %v7382_v27, %v7302_v61  ;;  %v7385_v20 = vadd.f32 %v7384_v0, %v7383_v45  ;;  %v7462_v47 = vadd.f32 %v7461_v17, %v7460_v32  ;;  %v7463_v60 = vpop.f32.mrb[78].mxu1 }
 0x32f   : > { %v7464_v53 = vpop.f32.mrb[79].mxu1 }
 0x330   : > { %v7817_v5 = vadd.f32 %v7385_v20, %v7305_v43  ;;  %v7465_v37 = vadd.f32 %v7464_v53, %v7463_v60  ;;  %v10607_v54 = vadd.f32 %v7811_v35, %v7462_v47  ;;  %v5956_v20 = vshrl.u32 %v6877_v58, 16  ;;  %v6874_v60 = vld [vmem:[%s8378_s18 + $0x18] sm:$0xf] }
 0x331   : > { %v5959_v47 = vshll.u32 %v6877_v58, 16 }
 0x332   : > { %v7386_v41 = vpop.f32.mrb[136].mxu0  ;;  %v10609_v12 = vadd.f32 %v7817_v5, %v7465_v37 }
 0x333   : > { %v7387_v28 = vpop.f32.mrb[137].mxu0 }
 0x334   : > { %v7388_v33 = vadd.f32 %v7387_v28, %v7386_v41  ;;  %v7389_v46 = vpop.f32.mrb[138].mxu0 }
 0x335   : > { %v7390_v3 = vpop.f32.mrb[139].mxu0 }
 0x336   : > { %v7808_v2 = vadd.f32 %v7388_v33, %v7308_v13  ;;  %v7391_v44 = vadd.f32 %v7390_v3, %v7389_v46  ;;  %v7466_v38 = vpop.f32.mrb[80].mxu1  ;;  %v6878_v33 = vld [vmem:[%s8378_s18 + $0x28] sm:$0xf]  ;;  %v5932_v46 = vshrl.u32 %v6874_v60, 16  ;;  %v5935_v3 = vshll.u32 %v6874_v60, 16 }
 0x337   : > { %v7467_v61 = vpop.f32.mrb[81].mxu1 }
 0x338   : > { %v7814_v10 = vadd.f32 %v7391_v44, %v7311_v63  ;;  %v7468_v55 = vadd.f32 %v7467_v61, %v7466_v38  ;;  %v7469_v11 = vpop.f32.mrb[82].mxu1  ;;  %v5958_v44 = vrot.slane %v5956_v20, 4  ;;  %v5961_v38 = vrot.slane %v5959_v47, 5 }
 0x339   : > { %v7470_v23 = vpop.f32.mrb[83].mxu1 }
 0x33a   : > { %v7471_v43 = vadd.f32 %v7470_v23, %v7469_v11  ;;  %v10611_v16 = vadd.f32 %v7808_v2, %v7468_v55  ;;  %v7392_v21 = vpop.f32.mrb[140].mxu0  ;;  %v5965_v11 = vshll.u32 %v6878_v33, 16  ;;  %v6875_v23 = vld [vmem:[%s8378_s18 + $0x1c] sm:$0xf] }
 0x33b   : > { %v7393_v4 = vpop.f32.mrb[141].mxu0 }
 0x33c   : > { %v10613_v6 = vadd.f32 %v7814_v10, %v7471_v43  ;;  %v7394_v19 = vadd.f32 %v7393_v4, %v7392_v21  ;;  %v7395_v30 = vpop.f32.mrb[142].mxu0  ;;  %v5969_v21 = vshrl.u32 %v6878_v33, 16  ;;  %v5934_v4 = vrot.slane %v5932_v46, 4 }
 0x33d   : > { %v7396_v1 = vpop.f32.mrb[143].mxu0 }
 0x33e   : > { %v7823_v48 = vadd.f32 %v7394_v19, %v10583_v50  ;;  %v7397_v13 = vadd.f32 %v7396_v1, %v7395_v30  ;;  %v5937_v19 = vrot.slane %v5935_v3, 5  ;;  %v6880_v3 = vld [vmem:[%s8378_s18 + $0x30] sm:$0xf] }
 0x33f   : > { %v7472_v24 = vpop.f32.mrb[84].mxu1 }
 0x340   : > { %v7473_v9 = vpop.f32.mrb[85].mxu1  ;;  %v7829_v63 = vadd.f32 %v7397_v13, %v10585_v7 }
 0x341   : > { %v7474_v26 = vadd.f32 %v7473_v9, %v7472_v24  ;;  %v7475_v40 = vpop.f32.mrb[86].mxu1  ;;  %v5941_v9 = vshll.u32 %v6875_v23, 16 }
 0x342   : > { %v7476_v36 = vpop.f32.mrb[87].mxu1 }
 0x343   : > { %v7477_v15 = vadd.f32 %v7476_v36, %v7475_v40  ;;  %v10617_v57 = vadd.f32 %v7823_v48, %v7474_v26  ;;  %v5962_v48 = vor.u32 %v5961_v38, %v5958_v44  ;;  %v5967_v40 = vrot.slane %v5965_v11, 5 }
 0x344   : > { %v7398_v8 = vpop.f32.mrb[144].mxu0 }
 0x345   : > { %v7399_v34 = vpop.f32.mrb[145].mxu0  ;;  %v10619_v59 = vadd.f32 %v7829_v63, %v7477_v15  ;;  %v5945_v63 = vshrl.u32 %v6875_v23, 16  ;;  %v5938_v15 = vor.u32 %v5937_v19, %v5934_v4  ;;  %v5980_v19 = vshrl.u32 %v6880_v3, 16 }
 0x346   : > { %v7400_v56 = vadd.f32 %v7399_v34, %v7398_v8  ;;  %v7401_v49 = vpop.f32.mrb[146].mxu0  ;;  %v5971_v8 = vrot.slane %v5969_v21, 4  ;;  %v6889_v21 = vld [vmem:[%s8378_s18 + $0x54] sm:$0xf] }
 0x347   : > { %v7402_v50 = vpop.f32.mrb[147].mxu0  ;;  %v7478_v27 = vpop.f32.mrb[88].mxu1  ;;  %v10644_v47 = vrot.slane %v5938_v15, 4 }
 0x348   : > { %v7820_v45 = vadd.f32 %v7400_v56, %v10587_v14  ;;  %v7403_v7 = vadd.f32 %v7402_v50, %v7401_v49  ;;  %v7479_v32 = vpop.f32.mrb[89].mxu1  ;;  %v5963_v49 = vrot.slane %v5962_v48, 4  ;;  %v5972_v60 = vor.u32 %v5971_v8, %v5967_v40 }
 0x349   : > { %v7480_v0 = vadd.f32 %v7479_v32, %v7478_v27  ;;  %v7481_v35 = vpop.f32.mrb[90].mxu1  ;;  %v6876_v27 = vld [vmem:[%s8378_s18 + $0x20] sm:$0x1] }
 0x34a   : > { %v7826_v17 = vadd.f32 %v7403_v7, %v10589_v25  ;;  %v7482_v5 = vpop.f32.mrb[91].mxu1  ;;  %v5968_v33 = vsel %vm8412_vm2, %v5963_v49, %v5967_v40  ;;  %v5951_v46 = vshll.u32 %v6876_v27, 16  ;;  %v6052_v40 = vshrl.u32 %v6889_v21, 16  ;;  %v6890_v27 = vld [vmem:[%s8378_s18 + $0x58] sm:$0xf] }
 0x34b   : > { %v7483_v53 = vadd.f32 %v7482_v5, %v7481_v35  ;;  %v10625_v41 = vadd.f32 %v7820_v45, %v7480_v0  ;;  %v10639_v45 = vrot.slane %v5945_v63, 4  ;;  %v6883_v35 = vld [vmem:[%s8378_s18 + $0x3c] sm:$0xf]  ;;  %v6884_v5 = vld [vmem:[%s8378_s18 + $0x40] sm:$0xf] }
 0x34c   : > { %v7404_v37 = vpop.f32.mrb[148].mxu0  ;;  %v6007_v11 = vshll.u32 %v6883_v35, 16  ;;  %v6013_v23 = vshll.u32 %v6884_v5, 16 }
 0x34d   : > { %v7405_v28 = vpop.f32.mrb[149].mxu0  ;;  %v10628_v61 = vadd.f32 %v7826_v17, %v7483_v53 }
 0x34e   : > { %v7406_v14 = vadd.f32 %v7405_v28, %v7404_v37  ;;  %v7407_v2 = vpop.f32.mrb[150].mxu0 }
 0x34f   : > { %v7408_v25 = vpop.f32.mrb[151].mxu0 }
 0x350   : > { %v7835_v10 = vadd.f32 %v7406_v14, %v10591_v52  ;;  %v7409_v55 = vadd.f32 %v7408_v25, %v7407_v2  ;;  %v7484_v43 = vpop.f32.mrb[92].mxu1  ;;  %v6879_v52 = vld [vmem:[%s8378_s18 + $0x2c] sm:$0x1]  ;;  %v6004_v25 = vshrl.u32 %v6883_v35, 16  ;;  %v5982_v35 = vrot.slane %v5980_v19, 4 }
 0x351   : > { %v7485_v30 = vpop.f32.mrb[93].mxu1  ;;  %v5975_v58 = vshll.u32 %v6879_v52, 16  ;;  %v6055_v52 = vshll.u32 %v6889_v21, 16  ;;  %v6887_v19 = vld [vmem:[%s8378_s18 + $0x4c] sm:$0xf] }
 0x352   : > { %v7841_v1 = vadd.f32 %v7409_v55, %v10593_v39  ;;  %v7486_v13 = vadd.f32 %v7485_v30, %v7484_v43  ;;  %v7487_v24 = vpop.f32.mrb[94].mxu1  ;;  %v10636_v39 = vrot.slane %v5941_v9, 5  ;;  %v6017_v43 = vshrl.u32 %v6884_v5, 16 }
 0x353   : > { %v7488_v26 = vpop.f32.mrb[95].mxu1  ;;  %v10651_v44 = vrot.slane %v5975_v58, 5  ;;  %v5983_v30 = vshll.u32 %v6880_v3, 16  ;;  %v6885_v58 = vld [vmem:[%s8378_s18 + $0x44] sm:$0x1] }
 0x354   : > { %v7489_v36 = vadd.f32 %v7488_v26, %v7487_v24  ;;  %v10634_v34 = vadd.f32 %v7835_v10, %v7486_v13  ;;  %v5948_v38 = vor.u32 %v10639_v45, %v10636_v39  ;;  %v6881_v10 = vld [vmem:[%s8378_s18 + $0x34] sm:$0xf]  ;;  %v10660_v13 = vrot.slane %v5972_v60, 4 }
 0x355   : > { %v7410_v56 = vpop.f32.mrb[152].mxu0  ;;  %v10662_v24 = vrot.slane %v5951_v46, 5  ;;  %v5989_v9 = vshll.u32 %v6881_v10, 16  ;;  %v5993_v63 = vshrl.u32 %v6881_v10, 16  ;;  %v6006_v26 = vrot.slane %v6004_v25, 4 }
 0x356   : > { %v7411_v50 = vpop.f32.mrb[153].mxu0  ;;  %v10641_v7 = vadd.f32 %v7841_v1, %v7489_v36  ;;  %v5944_v49 = vsel %vm8412_vm2, %v10644_v47, %v10636_v39  ;;  %v6061_v25 = vshll.u32 %v6890_v27, 16  ;;  %v6886_v10 = vld [vmem:[%s8378_s18 + $0x48] sm:$0xf] }
 0x357   : > { %v7412_v32 = vadd.f32 %v7411_v50, %v7410_v56  ;;  %v7413_v0 = vpop.f32.mrb[154].mxu0  ;;  %v10666_v56 = vunpack.c.l.bf16 %v5968_v33  ;;  %v6009_v50 = vrot.slane %v6007_v11, 5  ;;  %v5995_v33 = vrot.slane %v5993_v63, 4 }
 0x358   : > { %v7414_v20 = vpop.f32.mrb[155].mxu0 }
 0x359   : > { %v7490_v17 = vpop.f32.mrb[96].mxu1  ;;  %v7832_v53 = vadd.f32 %v7412_v32, %v10595_v62  ;;  %v7415_v28 = vadd.f32 %v7414_v20, %v7413_v0  ;;  %v10674_v0 = vrot.slane %v6013_v23, 5  ;;  %v6019_v20 = vrot.slane %v6017_v43, 4 }
 0x35a   : > { %v7491_v37 = vpop.f32.mrb[97].mxu1  ;;  %v6010_v11 = vor.u32 %v6009_v50, %v6006_v26  ;;  %v6023_v23 = vshll.u32 %v6885_v58, 16  ;;  %v6065_v43 = vshrl.u32 %v6890_v27, 16  ;;  %v6063_v26 = vrot.slane %v6061_v25, 5 }
 0x35b   : > { %v7492_v14 = vadd.f32 %v7491_v37, %v7490_v17  ;;  %v7493_v2 = vpop.f32.mrb[98].mxu1  ;;  %v7838_v55 = vadd.f32 %v7415_v28, %v10597_v31  ;;  %v5985_v17 = vrot.slane %v5983_v30, 5  ;;  %v10677_v37 = vrot.slane %v5989_v9, 5  ;;  %v6882_v28 = vld [vmem:[%s8378_s18 + $0x38] sm:$0x1] }
 0x35c   : > { %v7494_v62 = vpop.f32.mrb[99].mxu1  ;;  %v5949_v9 = vrot.slane %v5948_v38, 4  ;;  %v5999_v63 = vshll.u32 %v6882_v28, 16  ;;  %v6037_v27 = vshll.u32 %v6887_v19, 16 }
 0x35d   : > { %v7495_v4 = vadd.f32 %v7494_v62, %v7493_v2  ;;  %v10658_v1 = vadd.f32 %v7832_v53, %v7492_v14  ;;  %v7416_v48 = vpop.f32.mrb[156].mxu0  ;;  %v6054_v14 = vrot.slane %v6052_v40, 4  ;;  %v6057_v2 = vrot.slane %v6055_v52, 5 }
 0x35e   : > { %v7417_v31 = vpop.f32.mrb[157].mxu0  ;;  %v5986_v21 = vor.u32 %v5985_v17, %v5982_v35  ;;  %v6031_v40 = vshll.u32 %v6886_v10, 16  ;;  %v6067_v35 = vrot.slane %v6065_v43, 4  ;;  %v10692_v43 = vrot.slane %v6037_v27, 5 }
 0x35f   : > { %v10664_v36 = vadd.f32 %v7838_v55, %v7495_v4  ;;  %v7418_v15 = vadd.f32 %v7417_v31, %v7416_v48  ;;  %v7419_v8 = vpop.f32.mrb[158].mxu0  ;;  %v6020_v4 = vor.u32 %v6019_v20, %v10674_v0  ;;  %v6028_v31 = vshrl.u32 %v6886_v10, 16 }
 0x360   : > { %v7420_v32 = vpop.f32.mrb[159].mxu0  ;;  %v6011_v20 = vrot.slane %v6010_v11, 4  ;;  %v6068_v11 = vor.u32 %v6067_v35, %v6063_v26 }
 0x361   : > { %v7496_v45 = vpop.f32.mrb[100].mxu1  ;;  %v7847_v60 = vadd.f32 %v7418_v15, %v10599_v18  ;;  %v7421_v53 = vadd.f32 %v7420_v32, %v7419_v8  ;;  %v6058_v15 = vor.u32 %v6057_v2, %v6054_v14  ;;  %v6891_v32 = vld [vmem:[%s8378_s18 + $0x5c] sm:$0x1]  ;;  %v6021_v38 = vrot.slane %v6020_v4, 4 }
 0x362   : > { %v7497_v5 = vpop.f32.mrb[101].mxu1  ;;  %v6001_v2 = vrot.slane %v5999_v63, 5  ;;  %v6071_v10 = vshll.u32 %v6891_v32, 16  ;;  %v6016_v63 = vsel %vm8412_vm2, %v6011_v20, %v10674_v0  ;;  %v6069_v0 = vrot.slane %v6068_v11, 4 }
 0x363   : > { %v7498_v46 = vadd.f32 %v7497_v5, %v7496_v45  ;;  %v7499_v3 = vpop.f32.mrb[102].mxu1  ;;  %v7853_v55 = vadd.f32 %v7421_v53, %v10601_v42  ;;  %v5996_v42 = vor.u32 %v5995_v33, %v10677_v37  ;;  %v6041_v45 = vshrl.u32 %v6887_v19, 16 }
 0x364   : > { %v7500_v62 = vpop.f32.mrb[103].mxu1  ;;  %v6025_v5 = vrot.slane %v6023_v23, 5  ;;  %v6030_v33 = vrot.slane %v6028_v31, 4  ;;  %v6059_v25 = vrot.slane %v6058_v15, 4  ;;  %v5978_v19 = vsel %vm8412_vm2, %v10660_v13, %v10651_v44  ;;  %v6895_v31 = vld [vmem:[%s8378_s18 + $0x6c] sm:$0xf] }
 0x365   : > { %v7501_v18 = vadd.f32 %v7500_v62, %v7499_v3  ;;  %v10684_v30 = vadd.f32 %v7847_v60, %v7498_v46  ;;  %v5987_v60 = vrot.slane %v5986_v21, 4  ;;  %v6033_v46 = vrot.slane %v6031_v40, 5  ;;  %v6896_v15 = vld [vmem:[%s8378_s18 + $0x70] sm:$0xf] }
 0x366   : > { %v7422_v48 = vpop.f32.mrb[160].mxu0  ;;  %v5997_v14 = vrot.slane %v5996_v42, 4  ;;  %v6043_v21 = vrot.slane %v6041_v45, 4  ;;  %v6026_v47 = vsel %vm8412_vm2, %v6021_v38, %v6025_v5  ;;  %v6064_v40 = vsel %vm8412_vm2, %v6059_v25, %v6063_v26  ;;  %v10737_v26 = vld [vmem:[%s10873_s5] ss:$0 sm:$0xff] }
 0x367   : > { %v7423_v52 = vpop.f32.mrb[161].mxu0  ;;  %v10687_v8 = vadd.f32 %v7853_v55, %v7501_v18  ;;  %v6888_v18 = vld [vmem:[%s8378_s18 + $0x50] sm:$0x1]  ;;  %v5992_v39 = vsel %vm8412_vm2, %v5987_v60, %v10677_v37  ;;  %v6188_v37 = vunpack.c.l.bf16 %v5978_v19  ;;  %v10728_v32 = vunpack.c.l.bf16 %v6016_v63  ;;  %v10756_v25 = vld [vmem:[%s10874_s6] ss:$0 sm:$0xff] }
 0x368   : > { %v7424_v50 = vadd.f32 %v7423_v52, %v7422_v48  ;;  %v7425_v58 = vpop.f32.mrb[162].mxu0  ;;  %v6002_v13 = vsel %vm8412_vm2, %v5997_v14, %v6001_v2  ;;  %v6073_v52 = vrot.slane %v6071_v10, 5  ;;  %v6044_v42 = vor.u32 %v6043_v21, %v10692_v43  ;;  %v6893_v19 = vld [vmem:[%s8378_s18 + $0x64] sm:$0xf] }
 0x369   : > { %v7426_v17 = vpop.f32.mrb[163].mxu0  ;;  %v10730_v35 = vunpack.c.l.bf16 %v6026_v47  ;;  %v10739_v60 = vunpack.c.l.bf16 %v5992_v39  ;;  %v10741_v38 = vunpack.c.l.bf16 %v6002_v13  ;;  %v10743_v5 = vunpack.c.l.bf16 %v6064_v40  ;;  %v6894_v40 = vld [vmem:[%s8378_s18 + $0x68] sm:$0x1] }
 0x36a   : > { %v7844_v53 = vadd.f32 %v7424_v50, %v10603_v22  ;;  %v7427_v28 = vadd.f32 %v7426_v17, %v7425_v58  ;;  %v10700_v22 = vunpack.c.l.bf16 %v5944_v49  ;;  %v6034_v49 = vor.u32 %v6033_v46, %v6030_v33 }
 0x36b   : > { %v7502_v3 = vpop.f32.mrb[104].mxu1  ;;  %v6100_v50 = vshrl.u32 %v6895_v31, 16  ;;  %v6103_v58 = vshll.u32 %v6895_v31, 16  ;;  %v10751_v14 = vrot.slane %v6044_v42, 4  ;;  %v6109_v2 = vshll.u32 %v6896_v15, 16 }
 0x36c   : > { %v7503_v55 = vpop.f32.mrb[105].mxu1  ;;  %v7850_v62 = vadd.f32 %v7427_v28, %v10605_v29  ;;  %v5954_v29 = vsel %vm8412_vm2, %v5949_v9, %v10662_v24  ;;  %v6047_v24 = vshll.u32 %v6888_v18, 16  ;;  %v10732_v17 = vrot.slane %v6034_v49, 4  ;;  %v6892_v28 = vld [vmem:[%s8378_s18 + $0x60] sm:$0xf] }
 0x36d   : > { %v7504_v23 = vadd.f32 %v7503_v55, %v7502_v3  ;;  %v7505_v4 = vpop.f32.mrb[106].mxu1  ;;  %v6186_v45 = vunpack.c.l.bf16 %v5954_v29  ;;  %v6074_v3 = vsel %vm8412_vm2, %v6069_v0, %v6073_v52  ;;  %v6105_v11 = vrot.slane %v6103_v58, 5 }
 0x36e   : > { %v7506_v48 = vpop.f32.mrb[107].mxu1  ;;  %v6113_v18 = vshrl.u32 %v6896_v15, 16  ;;  %v6076_v29 = vshrl.u32 %v6892_v28, 16  ;;  %v10768_v63 = vunpack.c.l.bf16 %v6074_v3  ;;  %v6079_v39 = vshll.u32 %v6892_v28, 16 }
 0x36f   : > { %v7507_v44 = vadd.f32 %v7506_v48, %v7505_v4  ;;  %v10720_v9 = vadd.f32 %v7844_v53, %v7504_v23  ;;  %v10745_v53 = vrot.slane %v6047_v24, 5  ;;  %v6040_v4 = vsel %vm8412_vm2, %v10732_v17, %v10692_v43  ;;  %v6897_v24 = vld [vmem:[%s8378_s18 + $0x74] sm:$0x1] }
 0x370   : > { %v10776_v43 = vrot.slane %v6109_v2, 5  ;;  %v6078_v42 = vrot.slane %v6076_v29, 4  ;;  %v6089_v15 = vshrl.u32 %v6893_v19, 16  ;;  %v6119_v3 = vshll.u32 %v6897_v24, 16 }
 0x371   : > { %v10726_v27 = vadd.f32 %v7850_v62, %v7507_v44  ;;  %v6102_v62 = vrot.slane %v6100_v50, 4  ;;  %v6050_v49 = vsel %vm8412_vm2, %v10751_v14, %v10745_v53  ;;  %v6115_v53 = vrot.slane %v6113_v18, 4 }
 0x372   : > { %v6095_v14 = vshll.u32 %v6894_v40, 16 }
 0x373   : > { %v7714_v20 = vpop.f32.mrb[60].mxu1  ;;  %v6106_v13 = vor.u32 %v6105_v11, %v6102_v62  ;;  %v6116_v40 = vor.u32 %v6115_v53, %v10776_v43 }
 0x374   : > { %v7810_v33 = vadd.f32 %v10611_v16, %v7714_v20  ;;  %v5828_v46 = vpop.f32.mrb[61].mxu1  ;;  %v6081_v20 = vrot.slane %v6079_v39, 5 }
 0x375   : > { %v7813_v10 = vadd.f32 %v10607_v54, %v5828_v46  ;;  %v7715_v55 = vpop.f32.mrb[62].mxu1 }
 0x376   : > { %v6148_v16 = vmul.f32 %v7810_v33, %v10737_v26  ;;  %v7816_v21 = vadd.f32 %v10613_v6, %v7715_v55  ;;  %v5831_v23 = vpop.f32.mrb[63].mxu1  ;;  %v10788_v55 = vrot.slane %v6106_v13, 4  ;;  %v6194_v13 = vunpack.c.l.bf16 %v6050_v49 }
 0x377   : > { %v6146_v54 = vmul.f32 %v7813_v10, %v10737_v26  ;;  %v7819_v48 = vadd.f32 %v10609_v12, %v5831_v23  ;;  %v6085_v12 = vshll.u32 %v6893_v19, 16 }
 0x378   : > { %v6171_v47 = vadd.f32 %v10756_v25, %v6148_v16  ;;  %v6149_v6 = vmul.f32 %v7816_v21, %v10737_v26 }
 0x379   : > { %v6169_v31 = vadd.f32 %v10756_v25, %v6146_v54  ;;  %v6147_v44 = vmul.f32 %v7819_v48, %v10737_v26  ;;  %v10790_v62 = vrot.slane %v6085_v12, 5  ;;  %v6091_v54 = vrot.slane %v6089_v15, 4 }
 0x37a   : > { %v6203_v0 = vadd.f32 %v10666_v56, %v6171_v47  ;;  %v6172_v52 = vadd.f32 %v10756_v25, %v6149_v6 }
 0x37b   : > { %v6201_v50 = vadd.f32 %v10700_v22, %v6169_v31  ;;  %v6170_v58 = vadd.f32 %v10756_v25, %v6147_v44  ;;  %v7718_v17 = vpop.f32.mrb[64].mxu1  ;;  %v6193_v44 = vunpack.c.l.bf16 %v6040_v4  ;;  %v6097_v4 = vrot.slane %v6095_v14, 5 }
 0x37c   : > { %v6204_v28 = vadd.f32 %v6188_v37, %v6172_v52  ;;  %v7822_v33 = vadd.f32 %v10625_v41, %v7718_v17  ;;  %v5844_v46 = vpop.f32.mrb[65].mxu1  ;;  %v6219_v22 = vmax.f32 %v6203_v0, 0.0  ;;  %v6121_v0 = vrot.slane %v6119_v3, 5 }
 0x37d   : > { %v6202_v2 = vadd.f32 %v6186_v45, %v6170_v58  ;;  %v7825_v56 = vadd.f32 %v10617_v57, %v5844_v46  ;;  %v7719_v10 = vpop.f32.mrb[66].mxu1  ;;  %v6217_v41 = vmax.f32 %v6201_v50, 0.0  ;;  %v6092_v17 = vor.u32 %v6091_v54, %v10790_v62 }
 0x37e   : > { %v6220_v11 = vmax.f32 %v6204_v28, 0.0  ;;  %v6152_v16 = vmul.f32 %v7822_v33, %v10737_v26  ;;  %v7828_v37 = vadd.f32 %v10628_v61, %v7719_v10  ;;  %v5847_v18 = vpop.f32.mrb[67].mxu1  ;;  %v6082_v61 = vor.u32 %v6081_v20, %v6078_v42 }
 0x37f   : > { %v6218_v21 = vmax.f32 %v6202_v2, 0.0  ;;  %v6150_v45 = vmul.f32 %v7825_v56, %v10737_v26  ;;  %v7831_v57 = vadd.f32 %v10619_v59, %v5847_v18  ;;  %v6117_v2 = vrot.slane %v6116_v40, 4 }
 0x380   : > { %v6963_v23 = vpack.c.bf16 %v6220_v11, %v6219_v22  ;;  %v6175_v19 = vadd.f32 %v10756_v25, %v6152_v16  ;;  %v6153_v29 = vmul.f32 %v7828_v37, %v10737_v26  ;;  %v6083_v58 = vrot.slane %v6082_v61, 4 }
 0x381   : > { %v6958_v48 = vpack.c.bf16 %v6218_v21, %v6217_v41  ;;  %v6173_v39 = vadd.f32 %v10756_v25, %v6150_v45  ;;  %v6151_v47 = vmul.f32 %v7831_v57, %v10737_v26 }
 0x382   : > { %6995 = vst [vmem:[%s8317_s12 + $0x8] sm:$0xff] %v6963_v23   ;;  %v6207_v6 = vadd.f32 %v10728_v32, %v6175_v19  ;;  %v6176_v31 = vadd.f32 %v10756_v25, %v6153_v29  ;;  %v6112_v32 = vsel %vm8412_vm2, %v10788_v55, %v10776_v43 }
 0x383   : > { %6959 = vst [vmem:[%s8317_s12] sm:$0xff] %v6958_v48   ;;  %v6205_v59 = vadd.f32 %v10739_v60, %v6173_v39  ;;  %v6174_v12 = vadd.f32 %v10756_v25, %v6151_v47  ;;  %v7722_v24 = vpop.f32.mrb[68].mxu1  ;;  %v6199_v45 = vunpack.c.l.bf16 %v6112_v32 }
 0x384   : > { %v6208_v52 = vadd.f32 %v10730_v35, %v6176_v31  ;;  %v7834_v42 = vadd.f32 %v10658_v1, %v7722_v24  ;;  %v5860_v15 = vpop.f32.mrb[69].mxu1  ;;  %v6223_v20 = vmax.f32 %v6207_v6, 0.0 }
 0x385   : > { %v6206_v49 = vadd.f32 %v10741_v38, %v6174_v12  ;;  %v7837_v60 = vadd.f32 %v10634_v34, %v5860_v15  ;;  %v7723_v50 = vpop.f32.mrb[70].mxu1  ;;  %v6221_v33 = vmax.f32 %v6205_v59, 0.0 }
 0x386   : > { %v6224_v53 = vmax.f32 %v6208_v52, 0.0  ;;  %v6156_v1 = vmul.f32 %v7834_v42, %v10737_v26  ;;  %v7840_v35 = vadd.f32 %v10664_v36, %v7723_v50  ;;  %v5863_v28 = vpop.f32.mrb[71].mxu1  ;;  %v6093_v36 = vrot.slane %v6092_v17, 4 }
 0x387   : > { %v6222_v43 = vmax.f32 %v6206_v49, 0.0  ;;  %v6154_v46 = vmul.f32 %v7837_v60, %v10737_v26  ;;  %v7843_v38 = vadd.f32 %v10641_v7, %v5863_v28  ;;  %v6088_v7 = vsel %vm8412_vm2, %v6083_v58, %v10790_v62 }
 0x388   : > { %v6973_v34 = vpack.c.bf16 %v6224_v53, %v6223_v20  ;;  %v6179_v3 = vadd.f32 %v10756_v25, %v6156_v1  ;;  %v6157_v14 = vmul.f32 %v7840_v35, %v10737_v26  ;;  %v6197_v29 = vunpack.c.l.bf16 %v6088_v7 }
 0x389   : > { %v6968_v56 = vpack.c.bf16 %v6222_v43, %v6221_v33  ;;  %v6177_v10 = vadd.f32 %v10756_v25, %v6154_v46  ;;  %v6155_v55 = vmul.f32 %v7843_v38, %v10737_v26  ;;  %v6098_v62 = vsel %vm8412_vm2, %v6093_v36, %v6097_v4 }
 0x38a   : > { %6997 = vst [vmem:[%s8317_s12 + $0x18] sm:$0xff] %v6973_v34   ;;  %v6211_v22 = vadd.f32 %v10743_v5, %v6179_v3  ;;  %v6180_v11 = vadd.f32 %v10756_v25, %v6157_v14  ;;  %v6122_v5 = vsel %vm8412_vm2, %v6117_v2, %v6121_v0 }
 0x38b   : > { %6996 = vst [vmem:[%s8317_s12 + $0x10] sm:$0xff] %v6968_v56   ;;  %v6209_v16 = vadd.f32 %v6193_v44, %v6177_v10  ;;  %v6178_v37 = vadd.f32 %v10756_v25, %v6155_v55  ;;  %v7726_v18 = vpop.f32.mrb[72].mxu1  ;;  %v6200_v59 = vunpack.c.l.bf16 %v6122_v5 }
 0x38c   : > { %v6212_v41 = vadd.f32 %v10768_v63, %v6180_v11  ;;  %v7846_v21 = vadd.f32 %v10720_v9, %v7726_v18  ;;  %v5876_v57 = vpop.f32.mrb[73].mxu1  ;;  %v6227_v48 = vmax.f32 %v6211_v22, 0.0 }
 0x38d   : > { %v6210_v23 = vadd.f32 %v6194_v13, %v6178_v37  ;;  %v7849_v19 = vadd.f32 %v10684_v30, %v5876_v57  ;;  %v7727_v54 = vpop.f32.mrb[74].mxu1  ;;  %v6225_v61 = vmax.f32 %v6209_v16, 0.0 }
 0x38e   : > { %v6228_v39 = vmax.f32 %v6212_v41, 0.0  ;;  %v6160_v63 = vmul.f32 %v7846_v21, %v10737_v26  ;;  %v7852_v9 = vadd.f32 %v10726_v27, %v7727_v54  ;;  %v5879_v47 = vpop.f32.mrb[75].mxu1  ;;  %v6198_v27 = vunpack.c.l.bf16 %v6098_v62 }
 0x38f   : > { %v6226_v6 = vmax.f32 %v6210_v23, 0.0  ;;  %v6158_v31 = vmul.f32 %v7849_v19, %v10737_v26  ;;  %v7855_v30 = vadd.f32 %v10687_v8, %v5879_v47 }
 0x390   : > { %v6983_v44 = vpack.c.bf16 %v6228_v39, %v6227_v48  ;;  %v6183_v13 = vadd.f32 %v10756_v25, %v6160_v63  ;;  %v6161_v51 = vmul.f32 %v7852_v9, %v10737_v26 }
 0x391   : > { %v6978_v12 = vpack.c.bf16 %v6226_v6, %v6225_v61  ;;  %v6181_v24 = vadd.f32 %v10756_v25, %v6158_v31  ;;  %v6159_v40 = vmul.f32 %v7855_v30, %v10737_v26 }
 0x392   : > { %6999 = vst [vmem:[%s8317_s12 + $0x28] sm:$0xff] %v6983_v44   ;;  %v6215_v0 = vadd.f32 %v6199_v45, %v6183_v13  ;;  %v6184_v52 = vadd.f32 %v10756_v25, %v6161_v51 }
 0x393   : > { %6998 = vst [vmem:[%s8317_s12 + $0x20] sm:$0xff] %v6978_v12   ;;  %v6213_v8 = vadd.f32 %v6197_v29, %v6181_v24  ;;  %v6182_v42 = vadd.f32 %v10756_v25, %v6159_v40 }
 0x394   : > { %v6216_v15 = vadd.f32 %v6200_v59, %v6184_v52  ;;  %v6231_v4 = vmax.f32 %v6215_v0, 0.0 }
 0x395   : > { %v6214_v32 = vadd.f32 %v6198_v27, %v6182_v42  ;;  %v6229_v60 = vmax.f32 %v6213_v8, 0.0 }
 0x396   : > { %v6232_v49 = vmax.f32 %v6216_v15, 0.0 }
 0x397   : > { %v6230_v50 = vmax.f32 %v6214_v32, 0.0 }
 0x398   : > { %v6993_v58 = vpack.c.bf16 %v6232_v49, %v6231_v4 }
 0x399   : > { %v6988_v17 = vpack.c.bf16 %v6230_v50, %v6229_v60 }
 0x39a   : > { %7001 = vst [vmem:[%s8317_s12 + $0x38] sm:$0xff] %v6993_v58  }
 0x39b   : > { %7000 = vst [vmem:[%s8317_s12 + $0x30] sm:$0xff] %v6988_v17  }
 0x39c PF: > { %s17_s28 = sadd.s32 1, %s8201_s28   ;;  %s10922_s24 = smov %s8193_s26 }
 0x39d   : > { %p14_p9 = scmp.ge.s32.totalorder %s17_s28, 6   ;;  %s10923_s25 = smov %s8197_s27 }
 0x39e   : > { %s10924_s26 = smov %s10927_s29  ;;  %s10925_s27 = smov %s10931_s30 }
 0x39f   :  { %16 = sbr.rel (!%p14_p9) target bundleno = 3 (0x3), region = 92 }

</bundles_post_ra>
